<compile_context>
chip_gen: v7x
topology: tpu7x:2x2x1
jax: 0.10.0
libtpu: 0.0.40
codegen_flags: <defaults>
</compile_context>

<pallas_src>
import functools
import math

import jax
import jax.numpy as jnp
import numpy as np
from jax.experimental import pallas as pl
from jax.experimental.pallas import tpu as pltpu  # noqa: F401  (TPU backend)

EPS = 1e-5


# ---------------------------------------------------------------------------
# In-kernel helpers (everything stays 2-D; no in-kernel reshapes).
# ---------------------------------------------------------------------------
def _conv_rows(a, w_mats, b_row, k, h_out):
    """VALID conv for one image in row layout.

    a      : (H_in, W_in*C_in)  activation slab
    w_mats : list of k banded weight matrices (W_in*C_in, W_out*C_out)
    b_row  : (1, W_out*C_out)   bias already tiled over output width
    """
    acc = jnp.dot(a[0:h_out, :], w_mats[0], preferred_element_type=jnp.float32)
    for di in range(1, k):
        acc = acc + jnp.dot(a[di:di + h_out, :], w_mats[di],
                            preferred_element_type=jnp.float32)
    return acc + b_row


def _bn_scale_shift(ys, gamma, beta, w_out, cout, count):
    """Training-mode BatchNorm2d stats in one pass (sum + sum-of-squares).

    ys : list (per image) of conv outputs, each (H_out, W_out*C_out).
    Returns per-channel (1, C_out) scale/shift with BN(y) = y*scale + shift.
    """
    cols = w_out * cout
    colsum = jnp.zeros((1, cols), jnp.float32)
    colsq = jnp.zeros((1, cols), jnp.float32)
    for y in ys:
        colsum = colsum + jnp.sum(y, axis=0, keepdims=True)
        colsq = colsq + jnp.sum(y * y, axis=0, keepdims=True)
    s = jnp.zeros((1, cout), jnp.float32)
    sq = jnp.zeros((1, cout), jnp.float32)
    for wo in range(w_out):                      # fold the width groups
        s = s + colsum[:, wo * cout:(wo + 1) * cout]
        sq = sq + colsq[:, wo * cout:(wo + 1) * cout]
    mean = s / count
    var = sq / count - mean * mean               # biased batch variance
    inv = jax.lax.rsqrt(var + EPS)
    scale = gamma * inv
    shift = beta - mean * scale
    return scale, shift


def _tile_lanes(row, reps):
    """(1, C) -> (1, reps*C) by lane concatenation (value[c] at col w*C+c)."""
    return jnp.concatenate([row] * reps, axis=1)


def _fold_bn_into_conv(w_ref, b_row, scale, shift, k, w_in, cout):
    """Fold y -> y*scale + shift (per input channel) into the next conv.

    w_ref : ref of the next layer's banded weights, shape (k, w_in*cout, cols)
    b_row : (1, cols) tiled bias of the next conv
    Returns (list of k effective weight matrices, effective bias row).
    """
    rows = w_in * cout
    scale_t = _tile_lanes(scale, w_in)           # (1, rows): scale[c] at w*C+c
    shift_t = _tile_lanes(shift, w_in)
    ri = jax.lax.broadcasted_iota(jnp.int32, (rows, rows), 0)
    ci = jax.lax.broadcasted_iota(jnp.int32, (rows, rows), 1)
    diag = jnp.where(ri == ci, scale_t, jnp.float32(0.0))  # diag(scale_t)
    w_eff, b_eff = [], b_row
    for di in range(k):
        w_di = w_ref[di]
        w_eff.append(jnp.dot(diag, w_di, preferred_element_type=jnp.float32))
        b_eff = b_eff + jnp.dot(shift_t, w_di,
                                preferred_element_type=jnp.float32)
    return w_eff, b_eff


# ---------------------------------------------------------------------------
# Kernel
# ---------------------------------------------------------------------------
def _block_kernel(x_ref,
                  w1_ref, b1_ref, g1_ref, be1_ref,
                  w2_ref, b2_ref, g2_ref, be2_ref,
                  w3_ref, b3_ref, g3_ref, be3_ref,
                  o_ref, *, k, n, h, w, cout):
    h1, w1 = h - (k - 1), w - (k - 1)
    h2, w2 = h1 - (k - 1), w1 - (k - 1)
    h3, w3 = h2 - (k - 1), w2 - (k - 1)

    # ---- layer 1: conv on the MXU -----------------------------------------
    w1_mats = [w1_ref[di] for di in range(k)]
    b1_row = b1_ref[...]
    y1 = [_conv_rows(x_ref[i].astype(jnp.float32), w1_mats, b1_row, k, h1)
          for i in range(n)]
    scale1, shift1 = _bn_scale_shift(y1, g1_ref[...], be1_ref[...],
                                     w1, cout, n * h1 * w1)

    # ---- BN1 folded into conv2; conv2 on the MXU --------------------------
    w2_mats, b2_row = _fold_bn_into_conv(w2_ref, b2_ref[...], scale1, shift1,
                                         k, w1, cout)
    y2 = [_conv_rows(a, w2_mats, b2_row, k, h2) for a in y1]
    scale2, shift2 = _bn_scale_shift(y2, g2_ref[...], be2_ref[...],
                                     w2, cout, n * h2 * w2)

    # ---- BN2 folded into conv3; conv3 on the MXU --------------------------
    w3_mats, b3_row = _fold_bn_into_conv(w3_ref, b3_ref[...], scale2, shift2,
                                         k, w2, cout)
    y3 = [_conv_rows(a, w3_mats, b3_row, k, h3) for a in y2]

    # ---- BN3 (elementwise: it feeds the ReLU, so it cannot be folded) -----
    scale3, shift3 = _bn_scale_shift(y3, g3_ref[...], be3_ref[...],
                                     w3, cout, n * h3 * w3)
    scale3_t = _tile_lanes(scale3, w3)           # (1, w3*cout)
    shift3_t = _tile_lanes(shift3, w3)
    for i in range(n):
        o_ref[i, :, :] = jnp.maximum(y3[i] * scale3_t + shift3_t,
                                     0.0).astype(o_ref.dtype)


# ---------------------------------------------------------------------------
# Host-side parameter packing / wrapper
# ---------------------------------------------------------------------------
def _band_weights(w_hwio, w_in):
    """Pack an HWIO conv weight into k banded matmul operands.

    band[di, wi*cin + c, wo*cout + o] = w_hwio[di, wi - wo, c, o]  (0<=wi-wo<k)
    so that  conv(x)[i, wo, o] = sum_di x_rows[i+di, :] @ band[di] + bias.
    """
    k, _, cin, cout = w_hwio.shape
    w_out = w_in - k + 1
    band = np.zeros((k, w_in * cin, w_out * cout), np.float32)
    for di in range(k):
        for wo in range(w_out):
            for dj in range(k):
                wi = wo + dj
                band[di, wi * cin:(wi + 1) * cin,
                     wo * cout:(wo + 1) * cout] = w_hwio[di, dj]
    return band


def _tile_bias(b, w_out):
    return np.tile(np.asarray(b, np.float32).reshape(-1), w_out).reshape(1, -1)


def init_params(key, cin, cout, k):
    """PyTorch-style default init: conv U(+-1/sqrt(fan_in)); BN gamma=1, beta=0."""
    ks = jax.random.split(key, 3)

    def conv_init(kk, fan_c):
        bound = 1.0 / math.sqrt(fan_c * k * k)
        kw, kb = jax.random.split(kk)
        wgt = jax.random.uniform(kw, (k, k, fan_c, cout), jnp.float32,
                                 -bound, bound)
        b = jax.random.uniform(kb, (cout,), jnp.float32, -bound, bound)
        return wgt, b

    w1, b1 = conv_init(ks[0], cin)
    w2, b2 = conv_init(ks[1], cout)
    w3, b3 = conv_init(ks[2], cout)
    ones = jnp.ones((1, cout), jnp.float32)
    zeros = jnp.zeros((1, cout), jnp.float32)
    return dict(w1=w1, b1=b1, g1=ones, be1=zeros,
                w2=w2, b2=b2, g2=ones, be2=zeros,
                w3=w3, b3=b3, g3=ones, be3=zeros)


def block_forward(x_nchw, params, k):
    n, cin, h, w = x_nchw.shape
    cout = params["w1"].shape[-1]
    h1, w1 = h - (k - 1), w - (k - 1)
    h2, w2 = h1 - (k - 1), w1 - (k - 1)
    h3, w3 = h2 - (k - 1), w2 - (k - 1)

    # Host-side constant weight packing (banded matmul operands + tiled bias).
    wb1 = _band_weights(np.asarray(params["w1"]), w)    # (k, w*cin,   w1*cout)
    wb2 = _band_weights(np.asarray(params["w2"]), w1)   # (k, w1*cout, w2*cout)
    wb3 = _band_weights(np.asarray(params["w3"]), w2)   # (k, w2*cout, w3*cout)
    bt1 = _tile_bias(params["b1"], w1)
    bt2 = _tile_bias(params["b2"], w2)
    bt3 = _tile_bias(params["b3"], w3)

    # NCHW -> per-image row slabs (N, H, W*C) so channels ride the lane axis.
    x_rows = jnp.transpose(x_nchw, (0, 2, 3, 1)).reshape(n, h, w * cin)
    x_rows = x_rows.astype(jnp.float32)

    kernel = functools.partial(_block_kernel, k=k, n=n, h=h, w=w, cout=cout)
    out_rows = pl.pallas_call(
        kernel,
        out_shape=jax.ShapeDtypeStruct((n, h3, w3 * cout), jnp.float32),
    )(x_rows, wb1, bt1, params["g1"], params["be1"],
      wb2, bt2, params["g2"], params["be2"],
      wb3, bt3, params["g3"], params["be3"])

    # (N, H3, W3*C) -> NCHW (PyTorch convention).
    return jnp.transpose(out_rows.reshape(n, h3, w3, cout), (0, 3, 1, 2))


# ---------------------------------------------------------------------------
# Pure-JAX reference (for self-check)
# ---------------------------------------------------------------------------
def _reference_forward(x_nchw, params):
    x = jnp.transpose(x_nchw, (0, 2, 3, 1)).astype(jnp.float32)

    def conv(x, wgt, b):
        y = jax.lax.conv_general_dilated(
            x, wgt, window_strides=(1, 1), padding="VALID",
            dimension_numbers=("NHWC", "HWIO", "NHWC"),
            precision=jax.lax.Precision.HIGHEST)
        return y + b.reshape(1, 1, 1, -1)

    def bn(y, g, be):
        mean = jnp.mean(y, axis=(0, 1, 2), keepdims=True)
        var = jnp.mean((y - mean) ** 2, axis=(0, 1, 2), keepdims=True)
        return ((y - mean) * jax.lax.rsqrt(var + EPS) * g.reshape(1, 1, 1, -1)
                + be.reshape(1, 1, 1, -1))

    y = bn(conv(x, params["w1"], params["b1"]), params["g1"], params["be1"])
    y = bn(conv(y, params["w2"], params["b2"]), params["g2"], params["be2"])
    y = bn(conv(y, params["w3"], params["b3"]), params["g3"], params["be3"])
    return jnp.transpose(jnp.maximum(y, 0.0), (0, 3, 1, 2))


if __name__ == "__main__":
    key = jax.random.PRNGKey(0)
    k_x, k_p = jax.random.split(key)

    # Block(in_channels=4, out_channels=8, kernel_size=3, activation_fn=ReLU)
    N, CIN, H, W = 2, 4, 16, 16
    COUT, K = 8, 3

    x = jax.random.normal(k_x, (N, CIN, H, W), jnp.float32)
    params = init_params(k_p, CIN, COUT, K)

    out = jax.block_until_ready(block_forward(x, params, K))
    assert out.shape == (N, COUT, H - 3 * (K - 1), W - 3 * (K - 1)), out.shape

    ref = jax.block_until_ready(_reference_forward(x, params))
    max_err = float(jnp.max(jnp.abs(out - ref)))
    assert max_err < 1e-2, f"kernel/reference mismatch: max abs err = {max_err}"

    print("KERNEL_OK")
</pallas_src>

<mosaic_0001>
module attributes {stable_mosaic.version = 11 : i64} {
  func.func @_block_kernel(%arg0: memref<2x16x64xf32, #tpu.memory_space<vmem>>, %arg1: memref<3x64x112xf32, #tpu.memory_space<vmem>>, %arg2: memref<1x112xf32, #tpu.memory_space<vmem>>, %arg3: memref<1x8xf32, #tpu.memory_space<vmem>>, %arg4: memref<1x8xf32, #tpu.memory_space<vmem>>, %arg5: memref<3x112x96xf32, #tpu.memory_space<vmem>>, %arg6: memref<1x96xf32, #tpu.memory_space<vmem>>, %arg7: memref<1x8xf32, #tpu.memory_space<vmem>>, %arg8: memref<1x8xf32, #tpu.memory_space<vmem>>, %arg9: memref<3x96x80xf32, #tpu.memory_space<vmem>>, %arg10: memref<1x80xf32, #tpu.memory_space<vmem>>, %arg11: memref<1x8xf32, #tpu.memory_space<vmem>>, %arg12: memref<1x8xf32, #tpu.memory_space<vmem>>, %arg13: memref<2x10x80xf32, #tpu.memory_space<vmem>>) attributes {dimension_semantics = [], scalar_prefetch = 0 : i64, scratch_operands = 0 : i64, tpu.core_type = #tpu.core_type<tc>} {
    %c0 = arith.constant 0 : index
    %c0_0 = arith.constant 0 : index
    %c0_1 = arith.constant 0 : index
    %0 = vector.load %arg1[%c0, %c0_0, %c0_1] : memref<3x64x112xf32, #tpu.memory_space<vmem>>, vector<1x64x112xf32>
    %1 = vector.shape_cast %0 : vector<1x64x112xf32> to vector<64x112xf32>
    %c1 = arith.constant 1 : index
    %c0_2 = arith.constant 0 : index
    %c0_3 = arith.constant 0 : index
    %2 = vector.load %arg1[%c1, %c0_2, %c0_3] : memref<3x64x112xf32, #tpu.memory_space<vmem>>, vector<1x64x112xf32>
    %3 = vector.shape_cast %2 : vector<1x64x112xf32> to vector<64x112xf32>
    %c2 = arith.constant 2 : index
    %c0_4 = arith.constant 0 : index
    %c0_5 = arith.constant 0 : index
    %4 = vector.load %arg1[%c2, %c0_4, %c0_5] : memref<3x64x112xf32, #tpu.memory_space<vmem>>, vector<1x64x112xf32>
    %5 = vector.shape_cast %4 : vector<1x64x112xf32> to vector<64x112xf32>
    %c0_6 = arith.constant 0 : index
    %c0_7 = arith.constant 0 : index
    %6 = vector.load %arg2[%c0_6, %c0_7] : memref<1x112xf32, #tpu.memory_space<vmem>>, vector<1x112xf32>
    %c0_8 = arith.constant 0 : index
    %c0_9 = arith.constant 0 : index
    %c0_10 = arith.constant 0 : index
    %7 = vector.load %arg0[%c0_8, %c0_9, %c0_10] : memref<2x16x64xf32, #tpu.memory_space<vmem>>, vector<1x16x64xf32>
    %8 = vector.shape_cast %7 : vector<1x16x64xf32> to vector<16x64xf32>
    %9 = vector.extract_strided_slice %8 {offsets = [0, 0], sizes = [14, 64], strides = [1, 1]} : vector<16x64xf32> to vector<14x64xf32>
    %cst = arith.constant dense<0.000000e+00> : vector<14x112xf32>
    %10 = tpu.matmul %9, %1, %cst {dimension_numbers = #tpu.dot_dimension_numbers<[1], [0], [0], [1], [0, 0, 1, 1], [], []>} : vector<14x64xf32>, vector<64x112xf32>, vector<14x112xf32> -> vector<14x112xf32>
    %11 = vector.extract_strided_slice %8 {offsets = [1, 0], sizes = [14, 64], strides = [1, 1]} : vector<16x64xf32> to vector<14x64xf32>
    %cst_11 = arith.constant dense<0.000000e+00> : vector<14x112xf32>
    %12 = tpu.matmul %11, %3, %cst_11 {dimension_numbers = #tpu.dot_dimension_numbers<[1], [0], [0], [1], [0, 0, 1, 1], [], []>} : vector<14x64xf32>, vector<64x112xf32>, vector<14x112xf32> -> vector<14x112xf32>
    %13 = arith.addf %10, %12 : vector<14x112xf32>
    %14 = vector.extract_strided_slice %8 {offsets = [2, 0], sizes = [14, 64], strides = [1, 1]} : vector<16x64xf32> to vector<14x64xf32>
    %cst_12 = arith.constant dense<0.000000e+00> : vector<14x112xf32>
    %15 = tpu.matmul %14, %5, %cst_12 {dimension_numbers = #tpu.dot_dimension_numbers<[1], [0], [0], [1], [0, 0, 1, 1], [], []>} : vector<14x64xf32>, vector<64x112xf32>, vector<14x112xf32> -> vector<14x112xf32>
    %16 = arith.addf %13, %15 : vector<14x112xf32>
    %17 = vector.broadcast %6 : vector<1x112xf32> to vector<14x112xf32>
    %18 = arith.addf %16, %17 : vector<14x112xf32>
    %c1_13 = arith.constant 1 : index
    %c0_14 = arith.constant 0 : index
    %c0_15 = arith.constant 0 : index
    %19 = vector.load %arg0[%c1_13, %c0_14, %c0_15] : memref<2x16x64xf32, #tpu.memory_space<vmem>>, vector<1x16x64xf32>
    %20 = vector.shape_cast %19 : vector<1x16x64xf32> to vector<16x64xf32>
    %21 = vector.extract_strided_slice %20 {offsets = [0, 0], sizes = [14, 64], strides = [1, 1]} : vector<16x64xf32> to vector<14x64xf32>
    %cst_16 = arith.constant dense<0.000000e+00> : vector<14x112xf32>
    %22 = tpu.matmul %21, %1, %cst_16 {dimension_numbers = #tpu.dot_dimension_numbers<[1], [0], [0], [1], [0, 0, 1, 1], [], []>} : vector<14x64xf32>, vector<64x112xf32>, vector<14x112xf32> -> vector<14x112xf32>
    %23 = vector.extract_strided_slice %20 {offsets = [1, 0], sizes = [14, 64], strides = [1, 1]} : vector<16x64xf32> to vector<14x64xf32>
    %cst_17 = arith.constant dense<0.000000e+00> : vector<14x112xf32>
    %24 = tpu.matmul %23, %3, %cst_17 {dimension_numbers = #tpu.dot_dimension_numbers<[1], [0], [0], [1], [0, 0, 1, 1], [], []>} : vector<14x64xf32>, vector<64x112xf32>, vector<14x112xf32> -> vector<14x112xf32>
    %25 = arith.addf %22, %24 : vector<14x112xf32>
    %26 = vector.extract_strided_slice %20 {offsets = [2, 0], sizes = [14, 64], strides = [1, 1]} : vector<16x64xf32> to vector<14x64xf32>
    %cst_18 = arith.constant dense<0.000000e+00> : vector<14x112xf32>
    %27 = tpu.matmul %26, %5, %cst_18 {dimension_numbers = #tpu.dot_dimension_numbers<[1], [0], [0], [1], [0, 0, 1, 1], [], []>} : vector<14x64xf32>, vector<64x112xf32>, vector<14x112xf32> -> vector<14x112xf32>
    %28 = arith.addf %25, %27 : vector<14x112xf32>
    %29 = vector.broadcast %6 : vector<1x112xf32> to vector<14x112xf32>
    %30 = arith.addf %28, %29 : vector<14x112xf32>
    %c0_19 = arith.constant 0 : index
    %c0_20 = arith.constant 0 : index
    %31 = vector.load %arg3[%c0_19, %c0_20] : memref<1x8xf32, #tpu.memory_space<vmem>>, vector<1x8xf32>
    %c0_21 = arith.constant 0 : index
    %c0_22 = arith.constant 0 : index
    %32 = vector.load %arg4[%c0_21, %c0_22] : memref<1x8xf32, #tpu.memory_space<vmem>>, vector<1x8xf32>
    %cst_23 = arith.constant 0.000000e+00 : f32
    %33 = vector.broadcast %cst_23 : f32 to vector<1x112xf32>
    %cst_24 = arith.constant 0.000000e+00 : f32
    %34 = vector.broadcast %cst_24 : f32 to vector<1x112xf32>
    %cst_25 = arith.constant dense<0.000000e+00> : vector<112xf32>
    %35 = vector.multi_reduction <add>, %18, %cst_25 [0] : vector<14x112xf32> to vector<112xf32>
    %36 = vector.shape_cast %35 : vector<112xf32> to vector<1x112xf32>
    %37 = arith.addf %33, %36 : vector<1x112xf32>
    %38 = arith.mulf %18, %18 : vector<14x112xf32>
    %cst_26 = arith.constant dense<0.000000e+00> : vector<112xf32>
    %39 = vector.multi_reduction <add>, %38, %cst_26 [0] : vector<14x112xf32> to vector<112xf32>
    %40 = vector.shape_cast %39 : vector<112xf32> to vector<1x112xf32>
    %41 = arith.addf %34, %40 : vector<1x112xf32>
    %cst_27 = arith.constant dense<0.000000e+00> : vector<112xf32>
    %42 = vector.multi_reduction <add>, %30, %cst_27 [0] : vector<14x112xf32> to vector<112xf32>
    %43 = vector.shape_cast %42 : vector<112xf32> to vector<1x112xf32>
    %44 = arith.addf %37, %43 : vector<1x112xf32>
    %45 = arith.mulf %30, %30 : vector<14x112xf32>
    %cst_28 = arith.constant dense<0.000000e+00> : vector<112xf32>
    %46 = vector.multi_reduction <add>, %45, %cst_28 [0] : vector<14x112xf32> to vector<112xf32>
    %47 = vector.shape_cast %46 : vector<112xf32> to vector<1x112xf32>
    %48 = arith.addf %41, %47 : vector<1x112xf32>
    %cst_29 = arith.constant 0.000000e+00 : f32
    %49 = vector.broadcast %cst_29 : f32 to vector<1x8xf32>
    %cst_30 = arith.constant 0.000000e+00 : f32
    %50 = vector.broadcast %cst_30 : f32 to vector<1x8xf32>
    %51 = vector.extract_strided_slice %44 {offsets = [0, 0], sizes = [1, 8], strides = [1, 1]} : vector<1x112xf32> to vector<1x8xf32>
    %52 = arith.addf %49, %51 : vector<1x8xf32>
    %53 = vector.extract_strided_slice %48 {offsets = [0, 0], sizes = [1, 8], strides = [1, 1]} : vector<1x112xf32> to vector<1x8xf32>
    %54 = arith.addf %50, %53 : vector<1x8xf32>
    %55 = vector.extract_strided_slice %44 {offsets = [0, 8], sizes = [1, 8], strides = [1, 1]} : vector<1x112xf32> to vector<1x8xf32>
    %56 = arith.addf %52, %55 : vector<1x8xf32>
    %57 = vector.extract_strided_slice %48 {offsets = [0, 8], sizes = [1, 8], strides = [1, 1]} : vector<1x112xf32> to vector<1x8xf32>
    %58 = arith.addf %54, %57 : vector<1x8xf32>
    %59 = vector.extract_strided_slice %44 {offsets = [0, 16], sizes = [1, 8], strides = [1, 1]} : vector<1x112xf32> to vector<1x8xf32>
    %60 = arith.addf %56, %59 : vector<1x8xf32>
    %61 = vector.extract_strided_slice %48 {offsets = [0, 16], sizes = [1, 8], strides = [1, 1]} : vector<1x112xf32> to vector<1x8xf32>
    %62 = arith.addf %58, %61 : vector<1x8xf32>
    %63 = vector.extract_strided_slice %44 {offsets = [0, 24], sizes = [1, 8], strides = [1, 1]} : vector<1x112xf32> to vector<1x8xf32>
    %64 = arith.addf %60, %63 : vector<1x8xf32>
    %65 = vector.extract_strided_slice %48 {offsets = [0, 24], sizes = [1, 8], strides = [1, 1]} : vector<1x112xf32> to vector<1x8xf32>
    %66 = arith.addf %62, %65 : vector<1x8xf32>
    %67 = vector.extract_strided_slice %44 {offsets = [0, 32], sizes = [1, 8], strides = [1, 1]} : vector<1x112xf32> to vector<1x8xf32>
    %68 = arith.addf %64, %67 : vector<1x8xf32>
    %69 = vector.extract_strided_slice %48 {offsets = [0, 32], sizes = [1, 8], strides = [1, 1]} : vector<1x112xf32> to vector<1x8xf32>
    %70 = arith.addf %66, %69 : vector<1x8xf32>
    %71 = vector.extract_strided_slice %44 {offsets = [0, 40], sizes = [1, 8], strides = [1, 1]} : vector<1x112xf32> to vector<1x8xf32>
    %72 = arith.addf %68, %71 : vector<1x8xf32>
    %73 = vector.extract_strided_slice %48 {offsets = [0, 40], sizes = [1, 8], strides = [1, 1]} : vector<1x112xf32> to vector<1x8xf32>
    %74 = arith.addf %70, %73 : vector<1x8xf32>
    %75 = vector.extract_strided_slice %44 {offsets = [0, 48], sizes = [1, 8], strides = [1, 1]} : vector<1x112xf32> to vector<1x8xf32>
    %76 = arith.addf %72, %75 : vector<1x8xf32>
    %77 = vector.extract_strided_slice %48 {offsets = [0, 48], sizes = [1, 8], strides = [1, 1]} : vector<1x112xf32> to vector<1x8xf32>
    %78 = arith.addf %74, %77 : vector<1x8xf32>
    %79 = vector.extract_strided_slice %44 {offsets = [0, 56], sizes = [1, 8], strides = [1, 1]} : vector<1x112xf32> to vector<1x8xf32>
    %80 = arith.addf %76, %79 : vector<1x8xf32>
    %81 = vector.extract_strided_slice %48 {offsets = [0, 56], sizes = [1, 8], strides = [1, 1]} : vector<1x112xf32> to vector<1x8xf32>
    %82 = arith.addf %78, %81 : vector<1x8xf32>
    %83 = vector.extract_strided_slice %44 {offsets = [0, 64], sizes = [1, 8], strides = [1, 1]} : vector<1x112xf32> to vector<1x8xf32>
    %84 = arith.addf %80, %83 : vector<1x8xf32>
    %85 = vector.extract_strided_slice %48 {offsets = [0, 64], sizes = [1, 8], strides = [1, 1]} : vector<1x112xf32> to vector<1x8xf32>
    %86 = arith.addf %82, %85 : vector<1x8xf32>
    %87 = vector.extract_strided_slice %44 {offsets = [0, 72], sizes = [1, 8], strides = [1, 1]} : vector<1x112xf32> to vector<1x8xf32>
    %88 = arith.addf %84, %87 : vector<1x8xf32>
    %89 = vector.extract_strided_slice %48 {offsets = [0, 72], sizes = [1, 8], strides = [1, 1]} : vector<1x112xf32> to vector<1x8xf32>
    %90 = arith.addf %86, %89 : vector<1x8xf32>
    %91 = vector.extract_strided_slice %44 {offsets = [0, 80], sizes = [1, 8], strides = [1, 1]} : vector<1x112xf32> to vector<1x8xf32>
    %92 = arith.addf %88, %91 : vector<1x8xf32>
    %93 = vector.extract_strided_slice %48 {offsets = [0, 80], sizes = [1, 8], strides = [1, 1]} : vector<1x112xf32> to vector<1x8xf32>
    %94 = arith.addf %90, %93 : vector<1x8xf32>
    %95 = vector.extract_strided_slice %44 {offsets = [0, 88], sizes = [1, 8], strides = [1, 1]} : vector<1x112xf32> to vector<1x8xf32>
    %96 = arith.addf %92, %95 : vector<1x8xf32>
    %97 = vector.extract_strided_slice %48 {offsets = [0, 88], sizes = [1, 8], strides = [1, 1]} : vector<1x112xf32> to vector<1x8xf32>
    %98 = arith.addf %94, %97 : vector<1x8xf32>
    %99 = vector.extract_strided_slice %44 {offsets = [0, 96], sizes = [1, 8], strides = [1, 1]} : vector<1x112xf32> to vector<1x8xf32>
    %100 = arith.addf %96, %99 : vector<1x8xf32>
    %101 = vector.extract_strided_slice %48 {offsets = [0, 96], sizes = [1, 8], strides = [1, 1]} : vector<1x112xf32> to vector<1x8xf32>
    %102 = arith.addf %98, %101 : vector<1x8xf32>
    %103 = vector.extract_strided_slice %44 {offsets = [0, 104], sizes = [1, 8], strides = [1, 1]} : vector<1x112xf32> to vector<1x8xf32>
    %104 = arith.addf %100, %103 : vector<1x8xf32>
    %105 = vector.extract_strided_slice %48 {offsets = [0, 104], sizes = [1, 8], strides = [1, 1]} : vector<1x112xf32> to vector<1x8xf32>
    %106 = arith.addf %102, %105 : vector<1x8xf32>
    %cst_31 = arith.constant 3.920000e+02 : f32
    %107 = vector.broadcast %cst_31 : f32 to vector<1x8xf32>
    %108 = arith.divf %104, %107 : vector<1x8xf32>
    %cst_32 = arith.constant 3.920000e+02 : f32
    %109 = vector.broadcast %cst_32 : f32 to vector<1x8xf32>
    %110 = arith.divf %106, %109 : vector<1x8xf32>
    %111 = arith.mulf %108, %108 : vector<1x8xf32>
    %112 = arith.subf %110, %111 : vector<1x8xf32>
    %cst_33 = arith.constant 9.99999974E-6 : f32
    %113 = vector.broadcast %cst_33 : f32 to vector<1x8xf32>
    %114 = arith.addf %112, %113 : vector<1x8xf32>
    %115 = math.rsqrt %114 : vector<1x8xf32>
    %116 = arith.mulf %31, %115 : vector<1x8xf32>
    %117 = arith.mulf %108, %116 : vector<1x8xf32>
    %118 = arith.subf %32, %117 : vector<1x8xf32>
    %c0_34 = arith.constant 0 : index
    %c0_35 = arith.constant 0 : index
    %119 = vector.load %arg6[%c0_34, %c0_35] : memref<1x96xf32, #tpu.memory_space<vmem>>, vector<1x96xf32>
    %120 = tpu.concatenate %116, %116, %116, %116, %116, %116, %116, %116, %116, %116, %116, %116, %116, %116 in 1 : vector<1x8xf32>, vector<1x8xf32>, vector<1x8xf32>, vector<1x8xf32>, vector<1x8xf32>, vector<1x8xf32>, vector<1x8xf32>, vector<1x8xf32>, vector<1x8xf32>, vector<1x8xf32>, vector<1x8xf32>, vector<1x8xf32>, vector<1x8xf32>, vector<1x8xf32> -> vector<1x112xf32>
    %121 = tpu.concatenate %118, %118, %118, %118, %118, %118, %118, %118, %118, %118, %118, %118, %118, %118 in 1 : vector<1x8xf32>, vector<1x8xf32>, vector<1x8xf32>, vector<1x8xf32>, vector<1x8xf32>, vector<1x8xf32>, vector<1x8xf32>, vector<1x8xf32>, vector<1x8xf32>, vector<1x8xf32>, vector<1x8xf32>, vector<1x8xf32>, vector<1x8xf32>, vector<1x8xf32> -> vector<1x112xf32>
    %122 = tpu.iota {dimensions = array<i32: 0>} : vector<112x112xi32>
    %123 = tpu.iota {dimensions = array<i32: 1>} : vector<112x112xi32>
    %124 = arith.cmpi eq, %122, %123 : vector<112x112xi32>
    %cst_36 = arith.constant 0.000000e+00 : f32
    %125 = vector.shape_cast %120 : vector<1x112xf32> to vector<1x112xf32>
    %126 = vector.broadcast %125 : vector<1x112xf32> to vector<112x112xf32>
    %127 = vector.broadcast %cst_36 : f32 to vector<112x112xf32>
    %128 = arith.select %124, %126, %127 : vector<112x112xi1>, vector<112x112xf32>
    %c0_37 = arith.constant 0 : index
    %c0_38 = arith.constant 0 : index
    %c0_39 = arith.constant 0 : index
    %129 = vector.load %arg5[%c0_37, %c0_38, %c0_39] : memref<3x112x96xf32, #tpu.memory_space<vmem>>, vector<1x112x96xf32>
    %130 = vector.shape_cast %129 : vector<1x112x96xf32> to vector<112x96xf32>
    %cst_40 = arith.constant dense<0.000000e+00> : vector<112x96xf32>
    %131 = tpu.matmul %128, %130, %cst_40 {dimension_numbers = #tpu.dot_dimension_numbers<[1], [0], [0], [1], [0, 0, 1, 1], [], []>} : vector<112x112xf32>, vector<112x96xf32>, vector<112x96xf32> -> vector<112x96xf32>
    %cst_41 = arith.constant dense<0.000000e+00> : vector<1x96xf32>
    %132 = tpu.matmul %121, %130, %cst_41 {dimension_numbers = #tpu.dot_dimension_numbers<[1], [0], [0], [1], [0, 0, 1, 1], [], []>} : vector<1x112xf32>, vector<112x96xf32>, vector<1x96xf32> -> vector<1x96xf32>
    %133 = arith.addf %119, %132 : vector<1x96xf32>
    %c1_42 = arith.constant 1 : index
    %c0_43 = arith.constant 0 : index
    %c0_44 = arith.constant 0 : index
    %134 = vector.load %arg5[%c1_42, %c0_43, %c0_44] : memref<3x112x96xf32, #tpu.memory_space<vmem>>, vector<1x112x96xf32>
    %135 = vector.shape_cast %134 : vector<1x112x96xf32> to vector<112x96xf32>
    %cst_45 = arith.constant dense<0.000000e+00> : vector<112x96xf32>
    %136 = tpu.matmul %128, %135, %cst_45 {dimension_numbers = #tpu.dot_dimension_numbers<[1], [0], [0], [1], [0, 0, 1, 1], [], []>} : vector<112x112xf32>, vector<112x96xf32>, vector<112x96xf32> -> vector<112x96xf32>
    %cst_46 = arith.constant dense<0.000000e+00> : vector<1x96xf32>
    %137 = tpu.matmul %121, %135, %cst_46 {dimension_numbers = #tpu.dot_dimension_numbers<[1], [0], [0], [1], [0, 0, 1, 1], [], []>} : vector<1x112xf32>, vector<112x96xf32>, vector<1x96xf32> -> vector<1x96xf32>
    %138 = arith.addf %133, %137 : vector<1x96xf32>
    %c2_47 = arith.constant 2 : index
    %c0_48 = arith.constant 0 : index
    %c0_49 = arith.constant 0 : index
    %139 = vector.load %arg5[%c2_47, %c0_48, %c0_49] : memref<3x112x96xf32, #tpu.memory_space<vmem>>, vector<1x112x96xf32>
    %140 = vector.shape_cast %139 : vector<1x112x96xf32> to vector<112x96xf32>
    %cst_50 = arith.constant dense<0.000000e+00> : vector<112x96xf32>
    %141 = tpu.matmul %128, %140, %cst_50 {dimension_numbers = #tpu.dot_dimension_numbers<[1], [0], [0], [1], [0, 0, 1, 1], [], []>} : vector<112x112xf32>, vector<112x96xf32>, vector<112x96xf32> -> vector<112x96xf32>
    %cst_51 = arith.constant dense<0.000000e+00> : vector<1x96xf32>
    %142 = tpu.matmul %121, %140, %cst_51 {dimension_numbers = #tpu.dot_dimension_numbers<[1], [0], [0], [1], [0, 0, 1, 1], [], []>} : vector<1x112xf32>, vector<112x96xf32>, vector<1x96xf32> -> vector<1x96xf32>
    %143 = arith.addf %138, %142 : vector<1x96xf32>
    %144 = vector.extract_strided_slice %18 {offsets = [0, 0], sizes = [12, 112], strides = [1, 1]} : vector<14x112xf32> to vector<12x112xf32>
    %cst_52 = arith.constant dense<0.000000e+00> : vector<12x96xf32>
    %145 = tpu.matmul %144, %131, %cst_52 {dimension_numbers = #tpu.dot_dimension_numbers<[1], [0], [0], [1], [0, 0, 1, 1], [], []>} : vector<12x112xf32>, vector<112x96xf32>, vector<12x96xf32> -> vector<12x96xf32>
    %146 = vector.extract_strided_slice %18 {offsets = [1, 0], sizes = [12, 112], strides = [1, 1]} : vector<14x112xf32> to vector<12x112xf32>
    %cst_53 = arith.constant dense<0.000000e+00> : vector<12x96xf32>
    %147 = tpu.matmul %146, %136, %cst_53 {dimension_numbers = #tpu.dot_dimension_numbers<[1], [0], [0], [1], [0, 0, 1, 1], [], []>} : vector<12x112xf32>, vector<112x96xf32>, vector<12x96xf32> -> vector<12x96xf32>
    %148 = arith.addf %145, %147 : vector<12x96xf32>
    %149 = vector.extract_strided_slice %18 {offsets = [2, 0], sizes = [12, 112], strides = [1, 1]} : vector<14x112xf32> to vector<12x112xf32>
    %cst_54 = arith.constant dense<0.000000e+00> : vector<12x96xf32>
    %150 = tpu.matmul %149, %141, %cst_54 {dimension_numbers = #tpu.dot_dimension_numbers<[1], [0], [0], [1], [0, 0, 1, 1], [], []>} : vector<12x112xf32>, vector<112x96xf32>, vector<12x96xf32> -> vector<12x96xf32>
    %151 = arith.addf %148, %150 : vector<12x96xf32>
    %152 = vector.broadcast %143 : vector<1x96xf32> to vector<12x96xf32>
    %153 = arith.addf %151, %152 : vector<12x96xf32>
    %154 = vector.extract_strided_slice %30 {offsets = [0, 0], sizes = [12, 112], strides = [1, 1]} : vector<14x112xf32> to vector<12x112xf32>
    %cst_55 = arith.constant dense<0.000000e+00> : vector<12x96xf32>
    %155 = tpu.matmul %154, %131, %cst_55 {dimension_numbers = #tpu.dot_dimension_numbers<[1], [0], [0], [1], [0, 0, 1, 1], [], []>} : vector<12x112xf32>, vector<112x96xf32>, vector<12x96xf32> -> vector<12x96xf32>
    %156 = vector.extract_strided_slice %30 {offsets = [1, 0], sizes = [12, 112], strides = [1, 1]} : vector<14x112xf32> to vector<12x112xf32>
    %cst_56 = arith.constant dense<0.000000e+00> : vector<12x96xf32>
    %157 = tpu.matmul %156, %136, %cst_56 {dimension_numbers = #tpu.dot_dimension_numbers<[1], [0], [0], [1], [0, 0, 1, 1], [], []>} : vector<12x112xf32>, vector<112x96xf32>, vector<12x96xf32> -> vector<12x96xf32>
    %158 = arith.addf %155, %157 : vector<12x96xf32>
    %159 = vector.extract_strided_slice %30 {offsets = [2, 0], sizes = [12, 112], strides = [1, 1]} : vector<14x112xf32> to vector<12x112xf32>
    %cst_57 = arith.constant dense<0.000000e+00> : vector<12x96xf32>
    %160 = tpu.matmul %159, %141, %cst_57 {dimension_numbers = #tpu.dot_dimension_numbers<[1], [0], [0], [1], [0, 0, 1, 1], [], []>} : vector<12x112xf32>, vector<112x96xf32>, vector<12x96xf32> -> vector<12x96xf32>
    %161 = arith.addf %158, %160 : vector<12x96xf32>
    %162 = vector.broadcast %143 : vector<1x96xf32> to vector<12x96xf32>
    %163 = arith.addf %161, %162 : vector<12x96xf32>
    %c0_58 = arith.constant 0 : index
    %c0_59 = arith.constant 0 : index
    %164 = vector.load %arg7[%c0_58, %c0_59] : memref<1x8xf32, #tpu.memory_space<vmem>>, vector<1x8xf32>
    %c0_60 = arith.constant 0 : index
    %c0_61 = arith.constant 0 : index
    %165 = vector.load %arg8[%c0_60, %c0_61] : memref<1x8xf32, #tpu.memory_space<vmem>>, vector<1x8xf32>
    %cst_62 = arith.constant 0.000000e+00 : f32
    %166 = vector.broadcast %cst_62 : f32 to vector<1x96xf32>
    %cst_63 = arith.constant 0.000000e+00 : f32
    %167 = vector.broadcast %cst_63 : f32 to vector<1x96xf32>
    %cst_64 = arith.constant dense<0.000000e+00> : vector<96xf32>
    %168 = vector.multi_reduction <add>, %153, %cst_64 [0] : vector<12x96xf32> to vector<96xf32>
    %169 = vector.shape_cast %168 : vector<96xf32> to vector<1x96xf32>
    %170 = arith.addf %166, %169 : vector<1x96xf32>
    %171 = arith.mulf %153, %153 : vector<12x96xf32>
    %cst_65 = arith.constant dense<0.000000e+00> : vector<96xf32>
    %172 = vector.multi_reduction <add>, %171, %cst_65 [0] : vector<12x96xf32> to vector<96xf32>
    %173 = vector.shape_cast %172 : vector<96xf32> to vector<1x96xf32>
    %174 = arith.addf %167, %173 : vector<1x96xf32>
    %cst_66 = arith.constant dense<0.000000e+00> : vector<96xf32>
    %175 = vector.multi_reduction <add>, %163, %cst_66 [0] : vector<12x96xf32> to vector<96xf32>
    %176 = vector.shape_cast %175 : vector<96xf32> to vector<1x96xf32>
    %177 = arith.addf %170, %176 : vector<1x96xf32>
    %178 = arith.mulf %163, %163 : vector<12x96xf32>
    %cst_67 = arith.constant dense<0.000000e+00> : vector<96xf32>
    %179 = vector.multi_reduction <add>, %178, %cst_67 [0] : vector<12x96xf32> to vector<96xf32>
    %180 = vector.shape_cast %179 : vector<96xf32> to vector<1x96xf32>
    %181 = arith.addf %174, %180 : vector<1x96xf32>
    %cst_68 = arith.constant 0.000000e+00 : f32
    %182 = vector.broadcast %cst_68 : f32 to vector<1x8xf32>
    %cst_69 = arith.constant 0.000000e+00 : f32
    %183 = vector.broadcast %cst_69 : f32 to vector<1x8xf32>
    %184 = vector.extract_strided_slice %177 {offsets = [0, 0], sizes = [1, 8], strides = [1, 1]} : vector<1x96xf32> to vector<1x8xf32>
    %185 = arith.addf %182, %184 : vector<1x8xf32>
    %186 = vector.extract_strided_slice %181 {offsets = [0, 0], sizes = [1, 8], strides = [1, 1]} : vector<1x96xf32> to vector<1x8xf32>
    %187 = arith.addf %183, %186 : vector<1x8xf32>
    %188 = vector.extract_strided_slice %177 {offsets = [0, 8], sizes = [1, 8], strides = [1, 1]} : vector<1x96xf32> to vector<1x8xf32>
    %189 = arith.addf %185, %188 : vector<1x8xf32>
    %190 = vector.extract_strided_slice %181 {offsets = [0, 8], sizes = [1, 8], strides = [1, 1]} : vector<1x96xf32> to vector<1x8xf32>
    %191 = arith.addf %187, %190 : vector<1x8xf32>
    %192 = vector.extract_strided_slice %177 {offsets = [0, 16], sizes = [1, 8], strides = [1, 1]} : vector<1x96xf32> to vector<1x8xf32>
    %193 = arith.addf %189, %192 : vector<1x8xf32>
    %194 = vector.extract_strided_slice %181 {offsets = [0, 16], sizes = [1, 8], strides = [1, 1]} : vector<1x96xf32> to vector<1x8xf32>
    %195 = arith.addf %191, %194 : vector<1x8xf32>
    %196 = vector.extract_strided_slice %177 {offsets = [0, 24], sizes = [1, 8], strides = [1, 1]} : vector<1x96xf32> to vector<1x8xf32>
    %197 = arith.addf %193, %196 : vector<1x8xf32>
    %198 = vector.extract_strided_slice %181 {offsets = [0, 24], sizes = [1, 8], strides = [1, 1]} : vector<1x96xf32> to vector<1x8xf32>
    %199 = arith.addf %195, %198 : vector<1x8xf32>
    %200 = vector.extract_strided_slice %177 {offsets = [0, 32], sizes = [1, 8], strides = [1, 1]} : vector<1x96xf32> to vector<1x8xf32>
    %201 = arith.addf %197, %200 : vector<1x8xf32>
    %202 = vector.extract_strided_slice %181 {offsets = [0, 32], sizes = [1, 8], strides = [1, 1]} : vector<1x96xf32> to vector<1x8xf32>
    %203 = arith.addf %199, %202 : vector<1x8xf32>
    %204 = vector.extract_strided_slice %177 {offsets = [0, 40], sizes = [1, 8], strides = [1, 1]} : vector<1x96xf32> to vector<1x8xf32>
    %205 = arith.addf %201, %204 : vector<1x8xf32>
    %206 = vector.extract_strided_slice %181 {offsets = [0, 40], sizes = [1, 8], strides = [1, 1]} : vector<1x96xf32> to vector<1x8xf32>
    %207 = arith.addf %203, %206 : vector<1x8xf32>
    %208 = vector.extract_strided_slice %177 {offsets = [0, 48], sizes = [1, 8], strides = [1, 1]} : vector<1x96xf32> to vector<1x8xf32>
    %209 = arith.addf %205, %208 : vector<1x8xf32>
    %210 = vector.extract_strided_slice %181 {offsets = [0, 48], sizes = [1, 8], strides = [1, 1]} : vector<1x96xf32> to vector<1x8xf32>
    %211 = arith.addf %207, %210 : vector<1x8xf32>
    %212 = vector.extract_strided_slice %177 {offsets = [0, 56], sizes = [1, 8], strides = [1, 1]} : vector<1x96xf32> to vector<1x8xf32>
    %213 = arith.addf %209, %212 : vector<1x8xf32>
    %214 = vector.extract_strided_slice %181 {offsets = [0, 56], sizes = [1, 8], strides = [1, 1]} : vector<1x96xf32> to vector<1x8xf32>
    %215 = arith.addf %211, %214 : vector<1x8xf32>
    %216 = vector.extract_strided_slice %177 {offsets = [0, 64], sizes = [1, 8], strides = [1, 1]} : vector<1x96xf32> to vector<1x8xf32>
    %217 = arith.addf %213, %216 : vector<1x8xf32>
    %218 = vector.extract_strided_slice %181 {offsets = [0, 64], sizes = [1, 8], strides = [1, 1]} : vector<1x96xf32> to vector<1x8xf32>
    %219 = arith.addf %215, %218 : vector<1x8xf32>
    %220 = vector.extract_strided_slice %177 {offsets = [0, 72], sizes = [1, 8], strides = [1, 1]} : vector<1x96xf32> to vector<1x8xf32>
    %221 = arith.addf %217, %220 : vector<1x8xf32>
    %222 = vector.extract_strided_slice %181 {offsets = [0, 72], sizes = [1, 8], strides = [1, 1]} : vector<1x96xf32> to vector<1x8xf32>
    %223 = arith.addf %219, %222 : vector<1x8xf32>
    %224 = vector.extract_strided_slice %177 {offsets = [0, 80], sizes = [1, 8], strides = [1, 1]} : vector<1x96xf32> to vector<1x8xf32>
    %225 = arith.addf %221, %224 : vector<1x8xf32>
    %226 = vector.extract_strided_slice %181 {offsets = [0, 80], sizes = [1, 8], strides = [1, 1]} : vector<1x96xf32> to vector<1x8xf32>
    %227 = arith.addf %223, %226 : vector<1x8xf32>
    %228 = vector.extract_strided_slice %177 {offsets = [0, 88], sizes = [1, 8], strides = [1, 1]} : vector<1x96xf32> to vector<1x8xf32>
    %229 = arith.addf %225, %228 : vector<1x8xf32>
    %230 = vector.extract_strided_slice %181 {offsets = [0, 88], sizes = [1, 8], strides = [1, 1]} : vector<1x96xf32> to vector<1x8xf32>
    %231 = arith.addf %227, %230 : vector<1x8xf32>
    %cst_70 = arith.constant 2.880000e+02 : f32
    %232 = vector.broadcast %cst_70 : f32 to vector<1x8xf32>
    %233 = arith.divf %229, %232 : vector<1x8xf32>
    %cst_71 = arith.constant 2.880000e+02 : f32
    %234 = vector.broadcast %cst_71 : f32 to vector<1x8xf32>
    %235 = arith.divf %231, %234 : vector<1x8xf32>
    %236 = arith.mulf %233, %233 : vector<1x8xf32>
    %237 = arith.subf %235, %236 : vector<1x8xf32>
    %cst_72 = arith.constant 9.99999974E-6 : f32
    %238 = vector.broadcast %cst_72 : f32 to vector<1x8xf32>
    %239 = arith.addf %237, %238 : vector<1x8xf32>
    %240 = math.rsqrt %239 : vector<1x8xf32>
    %241 = arith.mulf %164, %240 : vector<1x8xf32>
    %242 = arith.mulf %233, %241 : vector<1x8xf32>
    %243 = arith.subf %165, %242 : vector<1x8xf32>
    %c0_73 = arith.constant 0 : index
    %c0_74 = arith.constant 0 : index
    %244 = vector.load %arg10[%c0_73, %c0_74] : memref<1x80xf32, #tpu.memory_space<vmem>>, vector<1x80xf32>
    %245 = tpu.concatenate %241, %241, %241, %241, %241, %241, %241, %241, %241, %241, %241, %241 in 1 : vector<1x8xf32>, vector<1x8xf32>, vector<1x8xf32>, vector<1x8xf32>, vector<1x8xf32>, vector<1x8xf32>, vector<1x8xf32>, vector<1x8xf32>, vector<1x8xf32>, vector<1x8xf32>, vector<1x8xf32>, vector<1x8xf32> -> vector<1x96xf32>
    %246 = tpu.concatenate %243, %243, %243, %243, %243, %243, %243, %243, %243, %243, %243, %243 in 1 : vector<1x8xf32>, vector<1x8xf32>, vector<1x8xf32>, vector<1x8xf32>, vector<1x8xf32>, vector<1x8xf32>, vector<1x8xf32>, vector<1x8xf32>, vector<1x8xf32>, vector<1x8xf32>, vector<1x8xf32>, vector<1x8xf32> -> vector<1x96xf32>
    %247 = tpu.iota {dimensions = array<i32: 0>} : vector<96x96xi32>
    %248 = tpu.iota {dimensions = array<i32: 1>} : vector<96x96xi32>
    %249 = arith.cmpi eq, %247, %248 : vector<96x96xi32>
    %cst_75 = arith.constant 0.000000e+00 : f32
    %250 = vector.shape_cast %245 : vector<1x96xf32> to vector<1x96xf32>
    %251 = vector.broadcast %250 : vector<1x96xf32> to vector<96x96xf32>
    %252 = vector.broadcast %cst_75 : f32 to vector<96x96xf32>
    %253 = arith.select %249, %251, %252 : vector<96x96xi1>, vector<96x96xf32>
    %c0_76 = arith.constant 0 : index
    %c0_77 = arith.constant 0 : index
    %c0_78 = arith.constant 0 : index
    %254 = vector.load %arg9[%c0_76, %c0_77, %c0_78] : memref<3x96x80xf32, #tpu.memory_space<vmem>>, vector<1x96x80xf32>
    %255 = vector.shape_cast %254 : vector<1x96x80xf32> to vector<96x80xf32>
    %cst_79 = arith.constant dense<0.000000e+00> : vector<96x80xf32>
    %256 = tpu.matmul %253, %255, %cst_79 {dimension_numbers = #tpu.dot_dimension_numbers<[1], [0], [0], [1], [0, 0, 1, 1], [], []>} : vector<96x96xf32>, vector<96x80xf32>, vector<96x80xf32> -> vector<96x80xf32>
    %cst_80 = arith.constant dense<0.000000e+00> : vector<1x80xf32>
    %257 = tpu.matmul %246, %255, %cst_80 {dimension_numbers = #tpu.dot_dimension_numbers<[1], [0], [0], [1], [0, 0, 1, 1], [], []>} : vector<1x96xf32>, vector<96x80xf32>, vector<1x80xf32> -> vector<1x80xf32>
    %258 = arith.addf %244, %257 : vector<1x80xf32>
    %c1_81 = arith.constant 1 : index
    %c0_82 = arith.constant 0 : index
    %c0_83 = arith.constant 0 : index
    %259 = vector.load %arg9[%c1_81, %c0_82, %c0_83] : memref<3x96x80xf32, #tpu.memory_space<vmem>>, vector<1x96x80xf32>
    %260 = vector.shape_cast %259 : vector<1x96x80xf32> to vector<96x80xf32>
    %cst_84 = arith.constant dense<0.000000e+00> : vector<96x80xf32>
    %261 = tpu.matmul %253, %260, %cst_84 {dimension_numbers = #tpu.dot_dimension_numbers<[1], [0], [0], [1], [0, 0, 1, 1], [], []>} : vector<96x96xf32>, vector<96x80xf32>, vector<96x80xf32> -> vector<96x80xf32>
    %cst_85 = arith.constant dense<0.000000e+00> : vector<1x80xf32>
    %262 = tpu.matmul %246, %260, %cst_85 {dimension_numbers = #tpu.dot_dimension_numbers<[1], [0], [0], [1], [0, 0, 1, 1], [], []>} : vector<1x96xf32>, vector<96x80xf32>, vector<1x80xf32> -> vector<1x80xf32>
    %263 = arith.addf %258, %262 : vector<1x80xf32>
    %c2_86 = arith.constant 2 : index
    %c0_87 = arith.constant 0 : index
    %c0_88 = arith.constant 0 : index
    %264 = vector.load %arg9[%c2_86, %c0_87, %c0_88] : memref<3x96x80xf32, #tpu.memory_space<vmem>>, vector<1x96x80xf32>
    %265 = vector.shape_cast %264 : vector<1x96x80xf32> to vector<96x80xf32>
    %cst_89 = arith.constant dense<0.000000e+00> : vector<96x80xf32>
    %266 = tpu.matmul %253, %265, %cst_89 {dimension_numbers = #tpu.dot_dimension_numbers<[1], [0], [0], [1], [0, 0, 1, 1], [], []>} : vector<96x96xf32>, vector<96x80xf32>, vector<96x80xf32> -> vector<96x80xf32>
    %cst_90 = arith.constant dense<0.000000e+00> : vector<1x80xf32>
    %267 = tpu.matmul %246, %265, %cst_90 {dimension_numbers = #tpu.dot_dimension_numbers<[1], [0], [0], [1], [0, 0, 1, 1], [], []>} : vector<1x96xf32>, vector<96x80xf32>, vector<1x80xf32> -> vector<1x80xf32>
    %268 = arith.addf %263, %267 : vector<1x80xf32>
    %269 = vector.extract_strided_slice %153 {offsets = [0, 0], sizes = [10, 96], strides = [1, 1]} : vector<12x96xf32> to vector<10x96xf32>
    %cst_91 = arith.constant dense<0.000000e+00> : vector<10x80xf32>
    %270 = tpu.matmul %269, %256, %cst_91 {dimension_numbers = #tpu.dot_dimension_numbers<[1], [0], [0], [1], [0, 0, 1, 1], [], []>} : vector<10x96xf32>, vector<96x80xf32>, vector<10x80xf32> -> vector<10x80xf32>
    %271 = vector.extract_strided_slice %153 {offsets = [1, 0], sizes = [10, 96], strides = [1, 1]} : vector<12x96xf32> to vector<10x96xf32>
    %cst_92 = arith.constant dense<0.000000e+00> : vector<10x80xf32>
    %272 = tpu.matmul %271, %261, %cst_92 {dimension_numbers = #tpu.dot_dimension_numbers<[1], [0], [0], [1], [0, 0, 1, 1], [], []>} : vector<10x96xf32>, vector<96x80xf32>, vector<10x80xf32> -> vector<10x80xf32>
    %273 = arith.addf %270, %272 : vector<10x80xf32>
    %274 = vector.extract_strided_slice %153 {offsets = [2, 0], sizes = [10, 96], strides = [1, 1]} : vector<12x96xf32> to vector<10x96xf32>
    %cst_93 = arith.constant dense<0.000000e+00> : vector<10x80xf32>
    %275 = tpu.matmul %274, %266, %cst_93 {dimension_numbers = #tpu.dot_dimension_numbers<[1], [0], [0], [1], [0, 0, 1, 1], [], []>} : vector<10x96xf32>, vector<96x80xf32>, vector<10x80xf32> -> vector<10x80xf32>
    %276 = arith.addf %273, %275 : vector<10x80xf32>
    %277 = vector.broadcast %268 : vector<1x80xf32> to vector<10x80xf32>
    %278 = arith.addf %276, %277 : vector<10x80xf32>
    %279 = vector.extract_strided_slice %163 {offsets = [0, 0], sizes = [10, 96], strides = [1, 1]} : vector<12x96xf32> to vector<10x96xf32>
    %cst_94 = arith.constant dense<0.000000e+00> : vector<10x80xf32>
    %280 = tpu.matmul %279, %256, %cst_94 {dimension_numbers = #tpu.dot_dimension_numbers<[1], [0], [0], [1], [0, 0, 1, 1], [], []>} : vector<10x96xf32>, vector<96x80xf32>, vector<10x80xf32> -> vector<10x80xf32>
    %281 = vector.extract_strided_slice %163 {offsets = [1, 0], sizes = [10, 96], strides = [1, 1]} : vector<12x96xf32> to vector<10x96xf32>
    %cst_95 = arith.constant dense<0.000000e+00> : vector<10x80xf32>
    %282 = tpu.matmul %281, %261, %cst_95 {dimension_numbers = #tpu.dot_dimension_numbers<[1], [0], [0], [1], [0, 0, 1, 1], [], []>} : vector<10x96xf32>, vector<96x80xf32>, vector<10x80xf32> -> vector<10x80xf32>
    %283 = arith.addf %280, %282 : vector<10x80xf32>
    %284 = vector.extract_strided_slice %163 {offsets = [2, 0], sizes = [10, 96], strides = [1, 1]} : vector<12x96xf32> to vector<10x96xf32>
    %cst_96 = arith.constant dense<0.000000e+00> : vector<10x80xf32>
    %285 = tpu.matmul %284, %266, %cst_96 {dimension_numbers = #tpu.dot_dimension_numbers<[1], [0], [0], [1], [0, 0, 1, 1], [], []>} : vector<10x96xf32>, vector<96x80xf32>, vector<10x80xf32> -> vector<10x80xf32>
    %286 = arith.addf %283, %285 : vector<10x80xf32>
    %287 = vector.broadcast %268 : vector<1x80xf32> to vector<10x80xf32>
    %288 = arith.addf %286, %287 : vector<10x80xf32>
    %c0_97 = arith.constant 0 : index
    %c0_98 = arith.constant 0 : index
    %289 = vector.load %arg11[%c0_97, %c0_98] : memref<1x8xf32, #tpu.memory_space<vmem>>, vector<1x8xf32>
    %c0_99 = arith.constant 0 : index
    %c0_100 = arith.constant 0 : index
    %290 = vector.load %arg12[%c0_99, %c0_100] : memref<1x8xf32, #tpu.memory_space<vmem>>, vector<1x8xf32>
    %cst_101 = arith.constant 0.000000e+00 : f32
    %291 = vector.broadcast %cst_101 : f32 to vector<1x80xf32>
    %cst_102 = arith.constant 0.000000e+00 : f32
    %292 = vector.broadcast %cst_102 : f32 to vector<1x80xf32>
    %cst_103 = arith.constant dense<0.000000e+00> : vector<80xf32>
    %293 = vector.multi_reduction <add>, %278, %cst_103 [0] : vector<10x80xf32> to vector<80xf32>
    %294 = vector.shape_cast %293 : vector<80xf32> to vector<1x80xf32>
    %295 = arith.addf %291, %294 : vector<1x80xf32>
    %296 = arith.mulf %278, %278 : vector<10x80xf32>
    %cst_104 = arith.constant dense<0.000000e+00> : vector<80xf32>
    %297 = vector.multi_reduction <add>, %296, %cst_104 [0] : vector<10x80xf32> to vector<80xf32>
    %298 = vector.shape_cast %297 : vector<80xf32> to vector<1x80xf32>
    %299 = arith.addf %292, %298 : vector<1x80xf32>
    %cst_105 = arith.constant dense<0.000000e+00> : vector<80xf32>
    %300 = vector.multi_reduction <add>, %288, %cst_105 [0] : vector<10x80xf32> to vector<80xf32>
    %301 = vector.shape_cast %300 : vector<80xf32> to vector<1x80xf32>
    %302 = arith.addf %295, %301 : vector<1x80xf32>
    %303 = arith.mulf %288, %288 : vector<10x80xf32>
    %cst_106 = arith.constant dense<0.000000e+00> : vector<80xf32>
    %304 = vector.multi_reduction <add>, %303, %cst_106 [0] : vector<10x80xf32> to vector<80xf32>
    %305 = vector.shape_cast %304 : vector<80xf32> to vector<1x80xf32>
    %306 = arith.addf %299, %305 : vector<1x80xf32>
    %cst_107 = arith.constant 0.000000e+00 : f32
    %307 = vector.broadcast %cst_107 : f32 to vector<1x8xf32>
    %cst_108 = arith.constant 0.000000e+00 : f32
    %308 = vector.broadcast %cst_108 : f32 to vector<1x8xf32>
    %309 = vector.extract_strided_slice %302 {offsets = [0, 0], sizes = [1, 8], strides = [1, 1]} : vector<1x80xf32> to vector<1x8xf32>
    %310 = arith.addf %307, %309 : vector<1x8xf32>
    %311 = vector.extract_strided_slice %306 {offsets = [0, 0], sizes = [1, 8], strides = [1, 1]} : vector<1x80xf32> to vector<1x8xf32>
    %312 = arith.addf %308, %311 : vector<1x8xf32>
    %313 = vector.extract_strided_slice %302 {offsets = [0, 8], sizes = [1, 8], strides = [1, 1]} : vector<1x80xf32> to vector<1x8xf32>
    %314 = arith.addf %310, %313 : vector<1x8xf32>
    %315 = vector.extract_strided_slice %306 {offsets = [0, 8], sizes = [1, 8], strides = [1, 1]} : vector<1x80xf32> to vector<1x8xf32>
    %316 = arith.addf %312, %315 : vector<1x8xf32>
    %317 = vector.extract_strided_slice %302 {offsets = [0, 16], sizes = [1, 8], strides = [1, 1]} : vector<1x80xf32> to vector<1x8xf32>
    %318 = arith.addf %314, %317 : vector<1x8xf32>
    %319 = vector.extract_strided_slice %306 {offsets = [0, 16], sizes = [1, 8], strides = [1, 1]} : vector<1x80xf32> to vector<1x8xf32>
    %320 = arith.addf %316, %319 : vector<1x8xf32>
    %321 = vector.extract_strided_slice %302 {offsets = [0, 24], sizes = [1, 8], strides = [1, 1]} : vector<1x80xf32> to vector<1x8xf32>
    %322 = arith.addf %318, %321 : vector<1x8xf32>
    %323 = vector.extract_strided_slice %306 {offsets = [0, 24], sizes = [1, 8], strides = [1, 1]} : vector<1x80xf32> to vector<1x8xf32>
    %324 = arith.addf %320, %323 : vector<1x8xf32>
    %325 = vector.extract_strided_slice %302 {offsets = [0, 32], sizes = [1, 8], strides = [1, 1]} : vector<1x80xf32> to vector<1x8xf32>
    %326 = arith.addf %322, %325 : vector<1x8xf32>
    %327 = vector.extract_strided_slice %306 {offsets = [0, 32], sizes = [1, 8], strides = [1, 1]} : vector<1x80xf32> to vector<1x8xf32>
    %328 = arith.addf %324, %327 : vector<1x8xf32>
    %329 = vector.extract_strided_slice %302 {offsets = [0, 40], sizes = [1, 8], strides = [1, 1]} : vector<1x80xf32> to vector<1x8xf32>
    %330 = arith.addf %326, %329 : vector<1x8xf32>
    %331 = vector.extract_strided_slice %306 {offsets = [0, 40], sizes = [1, 8], strides = [1, 1]} : vector<1x80xf32> to vector<1x8xf32>
    %332 = arith.addf %328, %331 : vector<1x8xf32>
    %333 = vector.extract_strided_slice %302 {offsets = [0, 48], sizes = [1, 8], strides = [1, 1]} : vector<1x80xf32> to vector<1x8xf32>
    %334 = arith.addf %330, %333 : vector<1x8xf32>
    %335 = vector.extract_strided_slice %306 {offsets = [0, 48], sizes = [1, 8], strides = [1, 1]} : vector<1x80xf32> to vector<1x8xf32>
    %336 = arith.addf %332, %335 : vector<1x8xf32>
    %337 = vector.extract_strided_slice %302 {offsets = [0, 56], sizes = [1, 8], strides = [1, 1]} : vector<1x80xf32> to vector<1x8xf32>
    %338 = arith.addf %334, %337 : vector<1x8xf32>
    %339 = vector.extract_strided_slice %306 {offsets = [0, 56], sizes = [1, 8], strides = [1, 1]} : vector<1x80xf32> to vector<1x8xf32>
    %340 = arith.addf %336, %339 : vector<1x8xf32>
    %341 = vector.extract_strided_slice %302 {offsets = [0, 64], sizes = [1, 8], strides = [1, 1]} : vector<1x80xf32> to vector<1x8xf32>
    %342 = arith.addf %338, %341 : vector<1x8xf32>
    %343 = vector.extract_strided_slice %306 {offsets = [0, 64], sizes = [1, 8], strides = [1, 1]} : vector<1x80xf32> to vector<1x8xf32>
    %344 = arith.addf %340, %343 : vector<1x8xf32>
    %345 = vector.extract_strided_slice %302 {offsets = [0, 72], sizes = [1, 8], strides = [1, 1]} : vector<1x80xf32> to vector<1x8xf32>
    %346 = arith.addf %342, %345 : vector<1x8xf32>
    %347 = vector.extract_strided_slice %306 {offsets = [0, 72], sizes = [1, 8], strides = [1, 1]} : vector<1x80xf32> to vector<1x8xf32>
    %348 = arith.addf %344, %347 : vector<1x8xf32>
    %cst_109 = arith.constant 2.000000e+02 : f32
    %349 = vector.broadcast %cst_109 : f32 to vector<1x8xf32>
    %350 = arith.divf %346, %349 : vector<1x8xf32>
    %cst_110 = arith.constant 2.000000e+02 : f32
    %351 = vector.broadcast %cst_110 : f32 to vector<1x8xf32>
    %352 = arith.divf %348, %351 : vector<1x8xf32>
    %353 = arith.mulf %350, %350 : vector<1x8xf32>
    %354 = arith.subf %352, %353 : vector<1x8xf32>
    %cst_111 = arith.constant 9.99999974E-6 : f32
    %355 = vector.broadcast %cst_111 : f32 to vector<1x8xf32>
    %356 = arith.addf %354, %355 : vector<1x8xf32>
    %357 = math.rsqrt %356 : vector<1x8xf32>
    %358 = arith.mulf %289, %357 : vector<1x8xf32>
    %359 = arith.mulf %350, %358 : vector<1x8xf32>
    %360 = arith.subf %290, %359 : vector<1x8xf32>
    %361 = tpu.concatenate %358, %358, %358, %358, %358, %358, %358, %358, %358, %358 in 1 : vector<1x8xf32>, vector<1x8xf32>, vector<1x8xf32>, vector<1x8xf32>, vector<1x8xf32>, vector<1x8xf32>, vector<1x8xf32>, vector<1x8xf32>, vector<1x8xf32>, vector<1x8xf32> -> vector<1x80xf32>
    %362 = tpu.concatenate %360, %360, %360, %360, %360, %360, %360, %360, %360, %360 in 1 : vector<1x8xf32>, vector<1x8xf32>, vector<1x8xf32>, vector<1x8xf32>, vector<1x8xf32>, vector<1x8xf32>, vector<1x8xf32>, vector<1x8xf32>, vector<1x8xf32>, vector<1x8xf32> -> vector<1x80xf32>
    %363 = vector.broadcast %361 : vector<1x80xf32> to vector<10x80xf32>
    %364 = arith.mulf %278, %363 : vector<10x80xf32>
    %365 = vector.broadcast %362 : vector<1x80xf32> to vector<10x80xf32>
    %366 = arith.addf %364, %365 : vector<10x80xf32>
    %cst_112 = arith.constant 0.000000e+00 : f32
    %367 = vector.broadcast %cst_112 : f32 to vector<10x80xf32>
    %368 = arith.maximumf %366, %367 : vector<10x80xf32>
    %c0_113 = arith.constant 0 : index
    %c0_114 = arith.constant 0 : index
    %c0_115 = arith.constant 0 : index
    %369 = vector.load %arg13[%c0_113, %c0_114, %c0_115] : memref<2x10x80xf32, #tpu.memory_space<vmem>>, vector<1x10x80xf32>
    %370 = vector.shape_cast %369 : vector<1x10x80xf32> to vector<10x80xf32>
    %371 = vector.shape_cast %368 : vector<10x80xf32> to vector<1x10x80xf32>
    tpu.vector_store %arg13[%c0_113, %c0_114, %c0_115], %371 {strides = array<i32>} : memref<2x10x80xf32, #tpu.memory_space<vmem>>, vector<1x10x80xf32>,
    %372 = vector.broadcast %361 : vector<1x80xf32> to vector<10x80xf32>
    %373 = arith.mulf %288, %372 : vector<10x80xf32>
    %374 = vector.broadcast %362 : vector<1x80xf32> to vector<10x80xf32>
    %375 = arith.addf %373, %374 : vector<10x80xf32>
    %cst_116 = arith.constant 0.000000e+00 : f32
    %376 = vector.broadcast %cst_116 : f32 to vector<10x80xf32>
    %377 = arith.maximumf %375, %376 : vector<10x80xf32>
    %c1_117 = arith.constant 1 : index
    %c0_118 = arith.constant 0 : index
    %c0_119 = arith.constant 0 : index
    %378 = vector.load %arg13[%c1_117, %c0_118, %c0_119] : memref<2x10x80xf32, #tpu.memory_space<vmem>>, vector<1x10x80xf32>
    %379 = vector.shape_cast %378 : vector<1x10x80xf32> to vector<10x80xf32>
    %380 = vector.shape_cast %377 : vector<10x80xf32> to vector<1x10x80xf32>
    tpu.vector_store %arg13[%c1_117, %c0_118, %c0_119], %380 {strides = array<i32>} : memref<2x10x80xf32, #tpu.memory_space<vmem>>, vector<1x10x80xf32>,
    return
  }
}

</mosaic_0001>

<bundles_post_ra>
// kernel: tpu_custom_call.1
= control target key start
LH: loop header
LB: loop body
LE: loop exit
PB: predicated region body
PF: predicated region fallthrough
CT: control target
= control target key end

     0   :  { %vm7623_vm0 = vcmask 1046528   ;;  %vm79_vm1 = vcmask 523264   ;;  %vm7622_vm2 = vcmask 1045504   ;;  %vm587_vm3 = vcmask 914432   ;;  %s7620_s29 = smov 120   ;;  %s6136_s30 = smov 104   ;;  %s7604_s1 = inlined_call_operand.vmem [shape: f32[3,64,112], index: 1, kind: input, shape index: {}]   ;;  %s7605_s0 = inlined_call_operand.vmem [shape: f32[2,16,64], index: 0, kind: input, shape index: {}]   ;;  %s7606_s2 = inlined_call_operand.vmem [shape: f32[1,112], index: 2, kind: input, shape index: {}]   ;;  %s7607_s5 = inlined_call_operand.vmem [shape: f32[3,112,96], index: 5, kind: input, shape index: {}]   ;;  %s7608_s3 = inlined_call_operand.vmem [shape: f32[1,8], index: 3, kind: input, shape index: {}]   ;;  %s7609_s4 = inlined_call_operand.vmem [shape: f32[1,8], index: 4, kind: input, shape index: {}]   ;;  %s7610_s6 = inlined_call_operand.vmem [shape: f32[1,96], index: 6, kind: input, shape index: {}]   ;;  %s7611_s9 = inlined_call_operand.vmem [shape: f32[3,96,80], index: 9, kind: input, shape index: {}]   ;;  %s7612_s7 = inlined_call_operand.vmem [shape: f32[1,8], index: 7, kind: input, shape index: {}]   ;;  %s7613_s8 = inlined_call_operand.vmem [shape: f32[1,8], index: 8, kind: input, shape index: {}]   ;;  %s7614_s10 = inlined_call_operand.vmem [shape: f32[1,80], index: 10, kind: input, shape index: {}]   ;;  %s7615_s11 = inlined_call_operand.vmem [shape: f32[1,8], index: 11, kind: input, shape index: {}]   ;;  %s7616_s12 = inlined_call_operand.vmem [shape: f32[1,8], index: 12, kind: input, shape index: {}]   ;;  %s7617_s13 = inlined_call_operand.vmem [shape: f32[2,10,80], index: 13, kind: output, shape index: {}]  }
   0x1   :  { %v3813_v0 = vld [vmem:[%s7604_s1 + $0x40] sm:$0xff]  ;;  %v3814_v1 = vld [vmem:[%s7604_s1 + $0x48] sm:$0xff]  ;;  %v3815_v2 = vld [vmem:[%s7604_s1 + $0x50] sm:$0xff]  ;;  %vm585_vm4 = vcmask 916480   ;;  %s6137_s14 = smov 96   ;;  %s6139_s15 = smov 80  }
   0x2   :  { %v5395_v3 = vpack.c.bf16 %v3814_v1, %v3813_v0  ;;  %v3816_v4 = vld [vmem:[%s7604_s1 + $0x58] sm:$0xff]  ;;  %v3817_v6 = vld [vmem:[%s7604_s1 + $0x60] sm:$0xff]  ;;  %v3818_v7 = vld [vmem:[%s7604_s1 + $0x68] sm:$0xff]  ;;  %s6140_s16 = smov 72   ;;  %s6141_s17 = smov 64   ;;  %vm7624_vm5 = vmmov 0  }
   0x3   :  { %v5399_v5 = vpack.c.bf16 %v3816_v4, %v3815_v2  ;;  %v6243_v8 = vld [vmem:[%s7605_s0] sm:$0xff]  ;;  %v6248_v9 = vld [vmem:[%s7605_s0 + $0x8] sm:$0xff]  ;;  %v6255_v12 = vld [vmem:[%s7605_s0 + $0x10] sm:$0xff]  ;;  %v5403_v14 = vpack.c.bf16 %v3818_v7, %v3817_v6  ;;  %s6142_s18 = smov 56   ;;  %s6143_s19 = smov 48   ;;  %vm794_vm6 = vcmask 64512  }
   0x4   :  { %5396 = vmatprep.subr.bf16.mxu0 %v5395_v3  ;;  %5444 = vmatprep.subr.bf16.mxu1 %v5395_v3  ;;  %v76_v10 = vrot.slane %v6243_v8, 1  ;;  %v77_v11 = vrot.slane %v6248_v9, 1  ;;  %v6260_v13 = vld [vmem:[%s7605_s0 + $0x18] sm:$0xff]  ;;  %v336_v15 = vrot.slane %v6255_v12, 1  ;;  %v3819_v17 = vld [vmem:[%s7604_s1 + $0x70] sm:$0xff]  ;;  %v44_v22 = vld [vmem:[%s7604_s1] sm:$0xff] }
   0x5   :  { %5398 = vmatpush3.bf16.msra.mxu0 %v5395_v3  ;;  %5446 = vmatpush3.bf16.msra.mxu1 %v5395_v3  ;;  %v337_v16 = vrot.slane %v6260_v13, 1  ;;  %v3820_v18 = vld [vmem:[%s7604_s1 + $0x78] sm:$0xff]  ;;  %v45_v23 = vld [vmem:[%s7604_s1 + $0x8] sm:$0xff]  ;;  %v46_v25 = vld [vmem:[%s7604_s1 + $0x10] sm:$0xff]  ;;  %v239_v39 = vrot.slane %v6243_v8, 2  ;;  %v240_v40 = vrot.slane %v6248_v9, 2 }
   0x6   :  { %5400 = vmatprep.subr.bf16.mxu0 %v5399_v5  ;;  %5448 = vmatprep.subr.bf16.mxu1 %v5399_v5  ;;  %v78_v19 = vsel %vm7623_vm0, %v76_v10, %v77_v11  ;;  %v5407_v21 = vpack.c.bf16 %v3820_v18, %v3819_v17  ;;  %v5411_v24 = vpack.c.bf16 %v45_v23, %v44_v22  ;;  %v47_v26 = vld [vmem:[%s7604_s1 + $0x18] sm:$0xff]  ;;  %v48_v28 = vld [vmem:[%s7604_s1 + $0x20] sm:$0xff]  ;;  %v49_v29 = vld [vmem:[%s7604_s1 + $0x28] sm:$0xff]  ;;  %v497_v41 = vrot.slane %v6255_v12, 2  ;;  %s6138_s0 = smov 88   ;;  %s6144_s20 = smov 40  }
   0x7   :  { %4502 = vmatprep.mubr.msk.f32.mxu0 %vm79_vm1, %v78_v19  ;;  %v338_v20 = vsel %vm7623_vm0, %v336_v15, %v337_v16  ;;  %v5415_v27 = vpack.c.bf16 %v47_v26, %v46_v25  ;;  %v5419_v30 = vpack.c.bf16 %v49_v29, %v48_v28  ;;  %v50_v31 = vld [vmem:[%s7604_s1 + $0x30] sm:$0xff]  ;;  %v51_v32 = vld [vmem:[%s7604_s1 + $0x38] sm:$0xff]  ;;  %v3821_v34 = vld [vmem:[%s7604_s1 + $0x80] sm:$0xff]  ;;  %v498_v42 = vrot.slane %v6260_v13, 2  ;;  %s6145_s21 = smov 32   ;;  %s6146_s22 = smov 24  }
   0x8   :  { %4559 = vmatprep.mubr.msk.f32.mxu1 %vm79_vm1, %v338_v20  ;;  %v5423_v33 = vpack.c.bf16 %v51_v32, %v50_v31  ;;  %v3822_v35 = vld [vmem:[%s7604_s1 + $0x88] sm:$0xff]  ;;  %v3823_v37 = vld [vmem:[%s7604_s1 + $0x90] sm:$0xff]  ;;  %v3824_v38 = vld [vmem:[%s7604_s1 + $0x98] sm:$0xff]  ;;  %v241_v46 = vsel %vm7622_vm2, %v239_v39, %v240_v40  ;;  %s6147_s24 = smov 16   ;;  %s6148_s25 = smov 8   ;;  %vm796_vm7 = vcmask 130048  }
   0x9   :  { %5402 = vmatpush3.bf16.msra.mxu0 %v5399_v5  ;;  %5450 = vmatpush3.bf16.msra.mxu1 %v5399_v5  ;;  %v5427_v36 = vpack.c.bf16 %v3822_v35, %v3821_v34  ;;  %v5431_v43 = vpack.c.bf16 %v3824_v38, %v3823_v37  ;;  %v3825_v44 = vld [vmem:[%s7604_s1 + $0xa0] sm:$0xff]  ;;  %v3826_v45 = vld [vmem:[%s7604_s1 + $0xa8] sm:$0xff]  ;;  %v499_v47 = vsel %vm7622_vm2, %v497_v41, %v498_v42  ;;  %v3827_v49 = vld [vmem:[%s7604_s1 + $0xb0] sm:$0xff]  ;;  %vm798_vm8 = vcmask 195584   ;;  %s7646_s27 = smov 112  }
   0xa   :  { %5404 = vmatprep.subr.bf16.mxu0 %v5403_v14  ;;  %5452 = vmatprep.subr.bf16.mxu1 %v5403_v14  ;;  %v5435_v48 = vpack.c.bf16 %v3826_v45, %v3825_v44  ;;  %v3828_v50 = vld [vmem:[%s7604_s1 + $0xb8] sm:$0xff]  ;;  %v3835_v52 = vld [vmem:[%s7606_s2] ss:$0 sm:$0xff]  ;;  %s7618_s2 = smov 112   ;;  %vm800_vm9 = vcmask 261120   ;;  %vm802_vm10 = vcmask 326656  }
   0xb   :  { %v5439_v51 = vpack.c.bf16 %v3828_v50, %v3827_v49  ;;  %vm804_vm11 = vcmask 392192   ;;  %vm806_vm12 = vcmask 457728   ;;  %vm809_vm13 = vcmask 588800  }
   0xc   :  { %vm811_vm14 = vcmask 654336   ;;  %vm813_vm15 = vcmask 719872   ;;  %vm7626_vm2 = vcmask 850944  }
   0xd   :  { %5406 = vmatpush3.bf16.msra.mxu0 %v5403_v14  ;;  %5454 = vmatpush3.bf16.msra.mxu1 %v5403_v14 }
   0xe   :  { %5408 = vmatprep.subr.bf16.mxu0 %v5407_v21  ;;  %5456 = vmatprep.subr.bf16.mxu1 %v5407_v21 }
  0x11   :  { %5410 = vmatpush3.bf16.msra.mxu0 %v5407_v21  ;;  %5458 = vmatpush3.bf16.msra.mxu1 %v5407_v21 }
  0x12   :  { %5412 = vmatprep.subr.bf16.mxu0 %v5411_v24  ;;  %5460 = vmatprep.subr.bf16.mxu1 %v5411_v24 }
  0x14   :  { %4503 = vmatmul.mubr.msk.f32.vlgmr.msra.gmra.mrb[0].mxu0 %vm79_vm1, %v77_v11  ;;  %4560 = vmatmul.mubr.msk.f32.vlgmr.msra.gmra.mrb[0].mxu1 %vm79_vm1, %v337_v16 }
  0x15   :  { %5414 = vmatpush3.bf16.msra.mxu0 %v5411_v24  ;;  %5462 = vmatpush3.bf16.msra.mxu1 %v5411_v24 }
  0x16   :  { %5416 = vmatprep.subr.bf16.mxu0 %v5415_v27  ;;  %5464 = vmatprep.subr.bf16.mxu1 %v5415_v27 }
  0x17   :  { %4521 = vmatprep.mubr.msk.f32.mxu0 %vm79_vm1, %v6243_v8  ;;  %4578 = vmatprep.mubr.msk.f32.mxu1 %vm79_vm1, %v6255_v12 }
  0x19   :  { %5418 = vmatpush3.bf16.msra.mxu0 %v5415_v27  ;;  %5466 = vmatpush3.bf16.msra.mxu1 %v5415_v27 }
  0x1a   :  { %5420 = vmatprep.subr.bf16.mxu0 %v5419_v30  ;;  %5468 = vmatprep.subr.bf16.mxu1 %v5419_v30 }
  0x1d   :  { %5422 = vmatpush3.bf16.msra.mxu0 %v5419_v30  ;;  %5470 = vmatpush3.bf16.msra.mxu1 %v5419_v30 }
  0x1e   :  { %5424 = vmatprep.subr.bf16.mxu0 %v5423_v33  ;;  %5472 = vmatprep.subr.bf16.mxu1 %v5423_v33 }
  0x21   :  { %5426 = vmatpush3.bf16.msra.mxu0 %v5423_v33  ;;  %5474 = vmatpush3.bf16.msra.mxu1 %v5423_v33 }
  0x22   :  { %5428 = vmatprep.subr.bf16.mxu0 %v5427_v36  ;;  %5476 = vmatprep.subr.bf16.mxu1 %v5427_v36 }
  0x24   :  { %4522 = vmatmul.mubr.msk.f32.vlgmr.msra.gmra.mrb[0].mxu0 %vm79_vm1, %v6248_v9  ;;  %4579 = vmatmul.mubr.msk.f32.vlgmr.msra.gmra.mrb[0].mxu1 %vm79_vm1, %v6260_v13 }
  0x25   :  { %5430 = vmatpush3.bf16.msra.mxu0 %v5427_v36  ;;  %5478 = vmatpush3.bf16.msra.mxu1 %v5427_v36 }
  0x26   :  { %5432 = vmatprep.subr.bf16.mxu0 %v5431_v43  ;;  %5480 = vmatprep.subr.bf16.mxu1 %v5431_v43 }
  0x27   :  { %4540 = vmatprep.mubr.msk.f32.mxu0 %vm79_vm1, %v241_v46  ;;  %4597 = vmatprep.mubr.msk.f32.mxu1 %vm79_vm1, %v499_v47 }
  0x29   :  { %5434 = vmatpush3.bf16.msra.mxu0 %v5431_v43  ;;  %5482 = vmatpush3.bf16.msra.mxu1 %v5431_v43 }
  0x2a   :  { %5436 = vmatprep.subr.bf16.mxu0 %v5435_v48  ;;  %5484 = vmatprep.subr.bf16.mxu1 %v5435_v48 }
  0x2d   :  { %5438 = vmatpush3.bf16.msra.mxu0 %v5435_v48  ;;  %5486 = vmatpush3.bf16.msra.mxu1 %v5435_v48 }
  0x2e   :  { %5440 = vmatprep.subr.bf16.mxu0 %v5439_v51  ;;  %5488 = vmatprep.subr.bf16.mxu1 %v5439_v51 }
  0x31   :  { %5442 = vmatpush3.bf16.msra.mxu0 %v5439_v51  ;;  %5490 = vmatpush3.bf16.msra.mxu1 %v5439_v51 }
  0x34   :  { %4541 = vmatmul.mubr.msk.f32.vlgmr.msra.gmra.mrb[0].mxu0 %vm79_vm1, %v240_v40  ;;  %4598 = vmatmul.mubr.msk.f32.vlgmr.msra.gmra.mrb[0].mxu1 %vm79_vm1, %v498_v42 }
 0x107   :  { %v4542_v53 = vpop.f32.mrb[0].mxu0  ;;  %v4599_v54 = vpop.f32.mrb[0].mxu1 }
 0x108   :  { %v6345_v55 = vadd.f32 %v4542_v53, %v3835_v52  ;;  %v6347_v56 = vadd.f32 %v4599_v54, %v3835_v52  ;;  %v312_v57 = vpop.f32.mrb[1].mxu0  ;;  %v570_v58 = vpop.f32.mrb[1].mxu1 }
 0x109   :  { %v6349_v59 = vadd.f32 %v3835_v52, %v312_v57  ;;  %v6351_v60 = vadd.f32 %v3835_v52, %v570_v58 }
 0x10a   :  { %v588_v61 = vsel %vm587_vm3, %v6345_v55, 0.0  ;;  %v598_v62 = vmul.f32 %v6345_v55, %v6345_v55  ;;  %v610_v63 = vsel %vm587_vm3, %v6347_v56, 0.0  ;;  %v620_v0 = vmul.f32 %v6347_v56, %v6347_v56 }
 0x10b   :  { %v586_v1 = vsel %vm585_vm4, %v6349_v59, 0.0  ;;  %v597_v2 = vmul.f32 %v6349_v59, %v6349_v59  ;;  %v609_v3 = vsel %vm585_vm4, %v6351_v60, 0.0  ;;  %v619_v4 = vmul.f32 %v6351_v60, %v6351_v60 }
 0x10c   :  { %v600_v5 = vsel %vm587_vm3, %v598_v62, 0.0  ;;  %v622_v6 = vsel %vm587_vm3, %v620_v0, 0.0  ;;  %v589_v7 = vadd.f32 %v588_v61, %v586_v1  ;;  %v611_v8 = vadd.f32 %v610_v63, %v609_v3 }
 0x10d   :  { %v599_v9 = vsel %vm585_vm4, %v597_v2, 0.0  ;;  %v621_v10 = vsel %vm585_vm4, %v619_v4, 0.0  ;;  %vm815_vm3 = vcmask 785408  }
 0x10e   :  { %v590_v11 = vrot.slane %v589_v7, 4  ;;  %v601_v12 = vadd.f32 %v600_v5, %v599_v9  ;;  %v612_v13 = vrot.slane %v611_v8, 4  ;;  %v623_v14 = vadd.f32 %v622_v6, %v621_v10 }
 0x110   :  { %v591_v15 = vadd.f32 %v590_v11, %v589_v7  ;;  %v602_v16 = vrot.slane %v601_v12, 4  ;;  %v613_v17 = vadd.f32 %v612_v13, %v611_v8  ;;  %v624_v18 = vrot.slane %v623_v14, 4 }
 0x112   :  { %v592_v19 = vrot.slane %v591_v15, 2  ;;  %v603_v20 = vadd.f32 %v602_v16, %v601_v12  ;;  %v614_v21 = vrot.slane %v613_v17, 2  ;;  %v625_v22 = vadd.f32 %v624_v18, %v623_v14 }
 0x114   :  { %v593_v23 = vadd.f32 %v592_v19, %v591_v15  ;;  %v604_v24 = vrot.slane %v603_v20, 2  ;;  %v615_v25 = vadd.f32 %v614_v21, %v613_v17  ;;  %v626_v26 = vrot.slane %v625_v22, 2 }
 0x116   :  { %v594_v27 = vrot.slane %v593_v23, 1  ;;  %v605_v28 = vadd.f32 %v604_v24, %v603_v20  ;;  %v616_v29 = vrot.slane %v615_v25, 1  ;;  %v627_v30 = vadd.f32 %v626_v26, %v625_v22 }
 0x118   :  { %v595_v31 = vadd.f32 %v594_v27, %v593_v23  ;;  %v606_v32 = vrot.slane %v605_v28, 1  ;;  %v617_v33 = vadd.f32 %v616_v29, %v615_v25  ;;  %v628_v34 = vrot.slane %v627_v30, 1 }
 0x11a   :  { %v607_v35 = vadd.f32 %v606_v32, %v605_v28  ;;  %v618_v36 = vadd.f32 %v617_v33, %v595_v31  ;;  %v629_v37 = vadd.f32 %v628_v34, %v627_v30 }
 0x11c   :  { %643 = vrot.lane.b32.xlu1 %v618_v36, %s7618_s2  ;;  %634 = vrot.lane.b32.xlu0 %v618_v36, %s7620_s29  ;;  %v630_v38 = vadd.f32 %v629_v37, %v607_v35  ;;  %v926_v37 = vld [vmem:[%s7607_s5 + $0x8] sm:$0xff] }
 0x120   :  { %647 = vrot.lane.b32.xlu1 %v630_v38, %s7618_s2  ;;  %651 = vrot.lane.b32.xlu0 %v618_v36, %s6136_s30 }
 0x124   :  { %655 = vrot.lane.b32.xlu1 %v630_v38, %s6136_s30  ;;  %659 = vrot.lane.b32.xlu0 %v618_v36, %s6137_s14 }
 0x128   :  { %663 = vrot.lane.b32.xlu1 %v630_v38, %s6137_s14  ;;  %667 = vrot.lane.b32.xlu0 %v618_v36, %s6138_s0 }
 0x12c   :  { %671 = vrot.lane.b32.xlu1 %v630_v38, %s6138_s0  ;;  %675 = vrot.lane.b32.xlu0 %v618_v36, %s6139_s15 }
 0x130   :  { %679 = vrot.lane.b32.xlu1 %v630_v38, %s6139_s15  ;;  %683 = vrot.lane.b32.xlu0 %v618_v36, %s6140_s16 }
 0x134   :  { %687 = vrot.lane.b32.xlu1 %v630_v38, %s6140_s16  ;;  %639 = vrot.lane.b32.xlu0 %v630_v38, %s7620_s29 }
 0x138   :  { %695 = vrot.lane.b32.xlu1 %v630_v38, %s6141_s17  ;;  %691 = vrot.lane.b32.xlu0 %v618_v36, %s6141_s17 }
 0x13c   :  { %703 = vrot.lane.b32.xlu1 %v630_v38, %s6142_s18  ;;  %699 = vrot.lane.b32.xlu0 %v618_v36, %s6142_s18 }
 0x140   :  { %711 = vrot.lane.b32.xlu1 %v630_v38, %s6143_s19  ;;  %707 = vrot.lane.b32.xlu0 %v618_v36, %s6143_s19 }
 0x144   :  { %719 = vrot.lane.b32.xlu1 %v630_v38, %s6144_s20  ;;  %715 = vrot.lane.b32.xlu0 %v618_v36, %s6144_s20 }
 0x148   :  { %727 = vrot.lane.b32.xlu1 %v630_v38, %s6145_s21  ;;  %723 = vrot.lane.b32.xlu0 %v618_v36, %s6145_s21 }
 0x14c   :  { %735 = vrot.lane.b32.xlu1 %v630_v38, %s6146_s22  ;;  %731 = vrot.lane.b32.xlu0 %v618_v36, %s6146_s22 }
 0x18e   :  { %v644_v39 = vpop.permute.xlu1 %643  ;;  %v635_v40 = vpop.permute.xlu0 %634 }
 0x18f   :  { %v637_v51 = vadd.f32 %v635_v40, %v618_v36  ;;  %v925_v36 = vld [vmem:[%s7607_s5] sm:$0xff]  ;;  %v927_v40 = vld [vmem:[%s7607_s5 + $0x10] sm:$0xff] }
 0x191   :  { %v646_v54 = vadd.f32 %v644_v39, %v637_v51  ;;  %v5491_v39 = vpack.c.bf16 %v926_v37, %v925_v36  ;;  %v931_v51 = vld [vmem:[%s7607_s5 + $0x30] sm:$0xff] }
 0x192   :  { %v648_v41 = vpop.permute.xlu1 %647  ;;  %v652_v42 = vpop.permute.xlu0 %651 }
 0x193   :  { %v654_v63 = vadd.f32 %v652_v42, %v646_v54  ;;  %5492 = vmatprep.subr.bf16.mxu0 %v5491_v39 }
 0x194   :  { %5494 = vmatpush3.bf16.msra.mxu0 %v5491_v39 }
 0x196   :  { %v656_v43 = vpop.permute.xlu1 %655  ;;  %v660_v44 = vpop.permute.xlu0 %659 }
 0x197   :  { %v662_v1 = vadd.f32 %v660_v44, %v654_v63  ;;  %v583_v44 = vld [vmem:[%s7608_s3] sm:$0x1]  ;;  %v936_v63 = vld [vmem:[%s7607_s5 + $0x58] sm:$0xff] }
 0x19a   :  { %v664_v45 = vpop.permute.xlu1 %663  ;;  %v668_v46 = vpop.permute.xlu0 %667 }
 0x19b   :  { %v670_v5 = vadd.f32 %v668_v46, %v662_v1  ;;  %v930_v46 = vld [vmem:[%s7607_s5 + $0x28] sm:$0xff]  ;;  %v6149_v1 = vmov 0.0|0.0  }
 0x19c   :  { %5519 = vmatprep.subr.bf16.mxu1 %v6149_v1 }
 0x19d   :  { %5521 = vmatpush3.bf16.msra.mxu1 %v5491_v39 }
 0x19e   :  { %v672_v47 = vpop.permute.xlu1 %671  ;;  %v676_v48 = vpop.permute.xlu0 %675  ;;  %5522 = vmatprep.subr.bf16.mxu1 %v6149_v1 }
 0x19f   :  { %v678_v7 = vadd.f32 %v676_v48, %v670_v5  ;;  %v3859_v5 = vld [vmem:[%s7607_s5 + $0x70] sm:$0xff] }
 0x1a2   :  { %v680_v49 = vpop.permute.xlu1 %679  ;;  %v684_v50 = vpop.permute.xlu0 %683 }
 0x1a3   :  { %v686_v11 = vadd.f32 %v684_v50, %v678_v7 }
 0x1a6   :  { %v688_v52 = vpop.permute.xlu1 %687  ;;  %v640_v53 = vpop.permute.xlu0 %639 }
 0x1a7   :  { %v642_v57 = vadd.f32 %v640_v53, %v630_v38  ;;  %v751_v38 = vlaneseq }
 0x1a9   :  { %v650_v58 = vadd.f32 %v648_v41, %v642_v57  ;;  %v928_v41 = vld [vmem:[%s7607_s5 + $0x18] sm:$0xff]  ;;  %v6416_v42 = vshrl.u32 %v751_v38, 7  ;;  %v933_v57 = vld [vmem:[%s7607_s5 + $0x40] sm:$0xff]  ;;  %v6525_v36 = vand.u32 127, %v751_v38 }
 0x1aa   :  { %v696_v61 = vpop.permute.xlu1 %695  ;;  %v692_v62 = vpop.permute.xlu0 %691  ;;  %v3861_v38 = vld [vmem:[%s7607_s5 + $0x80] sm:$0xff] }
 0x1ab   :  { %v658_v0 = vadd.f32 %v656_v43, %v650_v58  ;;  %v694_v14 = vadd.f32 %v692_v62, %v686_v11  ;;  %v5495_v43 = vpack.c.bf16 %v928_v41, %v927_v40  ;;  %v934_v58 = vld [vmem:[%s7607_s5 + $0x48] sm:$0xff]  ;;  %v935_v62 = vld [vmem:[%s7607_s5 + $0x50] sm:$0xff]  ;;  %v6528_v37 = vadd.s32 8, %v6416_v42 }
 0x1ac   :  { %v6531_v39 = vadd.s32 16, %v6416_v42  ;;  %vm7628_vm0 = vcmp.eq.s32.totalorder %v6416_v42, %v6525_v36 }
 0x1ad   :  { %v666_v2 = vadd.f32 %v664_v45, %v658_v0  ;;  %5496 = vmatprep.subr.bf16.mxu0 %v5495_v43  ;;  %v929_v45 = vld [vmem:[%s7607_s5 + $0x20] sm:$0xff]  ;;  %v5511_v0 = vpack.c.bf16 %v936_v63, %v935_v62  ;;  %5524 = vmatpush3.bf16.msra.mxu1 %v5495_v43  ;;  %v3864_v62 = vld [vmem:[%s7607_s5 + $0x98] sm:$0xff] }
 0x1ae   :  { %v704_v3 = vpop.permute.xlu1 %703  ;;  %v700_v4 = vpop.permute.xlu0 %699  ;;  %5498 = vmatpush3.bf16.msra.mxu0 %v5495_v43  ;;  %v5499_v48 = vpack.c.bf16 %v930_v46, %v929_v45  ;;  %5525 = vmatprep.subr.bf16.mxu1 %v6149_v1  ;;  %v3862_v45 = vld [vmem:[%s7607_s5 + $0x88] sm:$0xff] }
 0x1af   :  { %v674_v6 = vadd.f32 %v672_v47, %v666_v2  ;;  %v702_v18 = vadd.f32 %v700_v4, %v694_v14  ;;  %v6428_v47 = vsub.s32 0, %v6416_v42  ;;  %v937_v2 = vld [vmem:[%s7607_s5 + $0x60] sm:$0xff] }
 0x1b0   :  { %5500 = vmatprep.subr.bf16.mxu0 %v5499_v48 }
 0x1b1   :  { %v682_v8 = vadd.f32 %v680_v49, %v674_v6  ;;  %v3860_v6 = vld [vmem:[%s7607_s5 + $0x78] sm:$0xff]  ;;  %5527 = vmatpush3.bf16.msra.mxu1 %v5499_v48 }
 0x1b2   :  { %v712_v9 = vpop.permute.xlu1 %711  ;;  %v708_v10 = vpop.permute.xlu0 %707  ;;  %5502 = vmatpush3.bf16.msra.mxu0 %v5499_v48  ;;  %5528 = vmatprep.subr.bf16.mxu1 %v6149_v1  ;;  %v6549_v48 = vadd.s32 24, %v6416_v42 }
 0x1b3   :  { %v690_v12 = vadd.f32 %v688_v52, %v682_v8  ;;  %v710_v20 = vadd.f32 %v708_v10, %v702_v18  ;;  %v932_v52 = vld [vmem:[%s7607_s5 + $0x38] sm:$0xff]  ;;  %v6476_v8 = vpack.c.bf16 %v3860_v6, %v3859_v5 }
 0x1b4   :  { %v5503_v54 = vpack.c.bf16 %v932_v52, %v931_v51 }
 0x1b5   :  { %v698_v13 = vadd.f32 %v696_v61, %v690_v12  ;;  %v5507_v61 = vpack.c.bf16 %v934_v58, %v933_v57  ;;  %v6151_v12 = vmov 0.0   ;;  %v6570_v57 = vpack.c.bf16 %v3862_v45, %v3861_v38 }
 0x1b6   :  { %v720_v15 = vpop.permute.xlu1 %719  ;;  %v716_v16 = vpop.permute.xlu0 %715  ;;  %5504 = vmatprep.subr.bf16.mxu0 %v5503_v54  ;;  %5530 = vmatpush3.bf16.msra.mxu1 %v5503_v54 }
 0x1b7   :  { %v706_v17 = vadd.f32 %v704_v3, %v698_v13  ;;  %v718_v24 = vadd.f32 %v716_v16, %v710_v20  ;;  %5506 = vmatpush3.bf16.msra.mxu0 %v5503_v54  ;;  %v938_v3 = vld [vmem:[%s7607_s5 + $0x68] sm:$0xff]  ;;  %5531 = vmatprep.subr.bf16.mxu1 %v6149_v1 }
 0x1b8   :  { %5508 = vmatprep.subr.bf16.mxu0 %v5507_v61  ;;  %v5515_v4 = vpack.c.bf16 %v938_v3, %v937_v2  ;;  %4677 = vmatprep.mubr.msk.f32.mxu1 %vm7624_vm5, %v6151_v12  ;;  %vm7627_vm5 = vcmp.eq.s32.totalorder %v6528_v37, %v6525_v36  ;;  %v6600_v2 = vadd.s32 48, %v6416_v42 }
 0x1b9   :  { %v714_v19 = vadd.f32 %v712_v9, %v706_v17  ;;  %v584_v9 = vld [vmem:[%s7609_s4] sm:$0x1] }
 0x1ba   :  { %v728_v21 = vpop.permute.xlu1 %727  ;;  %v724_v22 = vpop.permute.xlu0 %723  ;;  %5533 = vmatpush3.bf16.msra.mxu1 %v5507_v61 }
 0x1bb   :  { %v722_v23 = vadd.f32 %v720_v15, %v714_v19  ;;  %v726_v26 = vadd.f32 %v724_v22, %v718_v24  ;;  %5510 = vmatpush3.bf16.msra.mxu0 %v5507_v61  ;;  %5534 = vmatprep.subr.bf16.mxu1 %v6149_v1  ;;  %v3863_v61 = vld [vmem:[%s7607_s5 + $0x90] sm:$0xff] }
 0x1bc   :  { %5512 = vmatprep.subr.bf16.mxu0 %v5511_v0  ;;  %v6604_v6 = vpack.c.bf16 %v3864_v62, %v3863_v61  ;;  %v890_v62 = vadd.s32 104, %v6416_v42 }
 0x1bd   :  { %v730_v25 = vadd.f32 %v728_v21, %v722_v23 }
 0x1be   :  { %v736_v27 = vpop.permute.xlu1 %735  ;;  %v732_v28 = vpop.permute.xlu0 %731  ;;  %5536 = vmatpush3.bf16.msra.mxu1 %v5511_v0 }
 0x1bf   :  { %v738_v29 = vadd.f32 %v736_v27, %v730_v25  ;;  %v734_v30 = vadd.f32 %v732_v28, %v726_v26  ;;  %5514 = vmatpush3.bf16.msra.mxu0 %v5511_v0  ;;  %5537 = vmatprep.subr.bf16.mxu1 %v6149_v1  ;;  %v6592_v0 = vadd.s32 40, %v6416_v42 }
 0x1c0   :  { %5516 = vmatprep.subr.bf16.mxu0 %v5515_v4 }
 0x1c1   :  { %v6399_v31 = vmul.f32 0.0025510204, %v734_v30  ;;  %v741_v32 = vmul.f32 0.0025510204, %v738_v29 }
 0x1c2   :  { %5539 = vmatpush3.bf16.msra.mxu1 %v5515_v4 }
 0x1c3   :  { %v742_v33 = vmul.f32 %v6399_v31, %v6399_v31  ;;  %5518 = vmatpush3.bf16.msra.mxu0 %v5515_v4  ;;  %5568 = vmatprep.subr.bf16.mxu1 %v6149_v1 }
 0x1c4   :  { %5541 = vmatprep.subr.bf16.mxu0 %v6476_v8 }
 0x1c5   :  { %v743_v34 = vsub.f32 %v741_v32, %v742_v33 }
 0x1c7   :  { %v744_v35 = vadd.f32 1e-05, %v743_v34 }
 0x1c9   :  { %6128 = vrsqrt.f32 %v744_v35 }
 0x1d3   :  { %v6129_v49 = vpop.eup %6128 }
 0x1d4   :  { %v6430_v50 = vmul.f32 %v6129_v49, %v583_v44  ;;  %v6554_v49 = vadd.s32 32, %v6416_v42 }
 0x1d6   :  { %v754_v53 = vrot.slane %v6430_v50, %v6428_v47  ;;  %v747_v7 = vmul.f32 %v6430_v50, %v6399_v31 }
 0x1d8   :  { %758 = vrot.lane.b32.xlu1 %v754_v53, %s6147_s24  ;;  %755 = vrot.lane.b32.xlu0 %v754_v53, %s6148_s25  ;;  %v6485_v10 = vsub.f32 %v584_v9, %v747_v7 }
 0x1da   :  { %v823_v11 = vrot.slane %v6485_v10, %v6428_v47 }
 0x1dc   :  { %764 = vrot.lane.b32.xlu1 %v754_v53, %s6145_s21  ;;  %761 = vrot.lane.b32.xlu0 %v754_v53, %s6146_s22 }
 0x1e0   :  { %770 = vrot.lane.b32.xlu1 %v754_v53, %s6143_s19  ;;  %767 = vrot.lane.b32.xlu0 %v754_v53, %s6144_s20 }
 0x1e4   :  { %776 = vrot.lane.b32.xlu1 %v754_v53, %s6141_s17  ;;  %773 = vrot.lane.b32.xlu0 %v754_v53, %s6142_s18 }
 0x1e8   :  { %782 = vrot.lane.b32.xlu1 %v754_v53, %s6139_s15  ;;  %779 = vrot.lane.b32.xlu0 %v754_v53, %s6140_s16 }
 0x1ec   :  { %788 = vrot.lane.b32.xlu1 %v754_v53, %s6137_s14  ;;  %785 = vrot.lane.b32.xlu0 %v754_v53, %s6138_s0 }
 0x1f0   :  { %791 = vrot.lane.b32.xlu0 %v754_v53, %s6136_s30  ;;  %824 = vrot.lane.b32.xlu1 %v823_v11, %s6148_s25 }
 0x1f4   :  { %827 = vrot.lane.b32.xlu0 %v823_v11, %s6147_s24  ;;  %830 = vrot.lane.b32.xlu1 %v823_v11, %s6146_s22 }
 0x1f8   :  { %833 = vrot.lane.b32.xlu0 %v823_v11, %s6145_s21  ;;  %836 = vrot.lane.b32.xlu1 %v823_v11, %s6144_s20 }
 0x1fc   :  { %839 = vrot.lane.b32.xlu0 %v823_v11, %s6143_s19  ;;  %842 = vrot.lane.b32.xlu1 %v823_v11, %s6142_s18 }
 0x200   :  { %845 = vrot.lane.b32.xlu0 %v823_v11, %s6141_s17  ;;  %848 = vrot.lane.b32.xlu1 %v823_v11, %s6140_s16 }
 0x204   :  { %851 = vrot.lane.b32.xlu0 %v823_v11, %s6139_s15  ;;  %854 = vrot.lane.b32.xlu1 %v823_v11, %s6138_s0 }
 0x208   :  { %857 = vrot.lane.b32.xlu0 %v823_v11, %s6137_s14  ;;  %860 = vrot.lane.b32.xlu1 %v823_v11, %s6136_s30  ;;  %v3866_v11 = vld [vmem:[%s7607_s5 + $0xa8] sm:$0xff] }
 0x24a   :  { %v759_v13 = vpop.permute.xlu1 %758  ;;  %v756_v14 = vpop.permute.xlu0 %755 }
 0x24b   :  { %v795_v15 = vsel %vm794_vm6, %v6430_v50, %v756_v14  ;;  %v6630_v14 = vadd.s32 56, %v6416_v42 }
 0x24c   :  { %v797_v17 = vsel %vm796_vm7, %v795_v15, %v759_v13  ;;  %v6638_v15 = vadd.s32 64, %v6416_v42 }
 0x24e   :  { %v765_v16 = vpop.permute.xlu1 %764  ;;  %v762_v18 = vpop.permute.xlu0 %761 }
 0x24f   :  { %v799_v19 = vsel %vm798_vm8, %v797_v17, %v762_v18 }
 0x250   :  { %v801_v21 = vsel %vm800_vm9, %v799_v19, %v765_v16 }
 0x252   :  { %v771_v20 = vpop.permute.xlu1 %770  ;;  %v768_v22 = vpop.permute.xlu0 %767 }
 0x253   :  { %v803_v23 = vsel %vm802_vm10, %v801_v21, %v768_v22  ;;  %v3867_v22 = vld [vmem:[%s7607_s5 + $0xb0] sm:$0xff] }
 0x254   :  { %v805_v25 = vsel %vm804_vm11, %v803_v23, %v771_v20  ;;  %v3868_v23 = vld [vmem:[%s7607_s5 + $0xb8] sm:$0xff] }
 0x256   :  { %v777_v24 = vpop.permute.xlu1 %776  ;;  %v774_v26 = vpop.permute.xlu0 %773 }
 0x257   :  { %v807_v27 = vsel %vm806_vm12, %v805_v25, %v774_v26  ;;  %v6668_v25 = vadd.s32 72, %v6416_v42  ;;  %v6676_v26 = vadd.s32 80, %v6416_v42 }
 0x258   :  { %v808_v29 = vsel %vm79_vm1, %v807_v27, %v777_v24 }
 0x25a   :  { %v783_v28 = vpop.permute.xlu1 %782  ;;  %v780_v30 = vpop.permute.xlu0 %779 }
 0x25b   :  { %v810_v31 = vsel %vm809_vm13, %v808_v29, %v780_v30  ;;  %v6680_v30 = vpack.c.bf16 %v3868_v23, %v3867_v22 }
 0x25c   :  { %v812_v33 = vsel %vm811_vm14, %v810_v31, %v783_v28 }
 0x25e   :  { %v789_v32 = vpop.permute.xlu1 %788  ;;  %v786_v34 = vpop.permute.xlu0 %785 }
 0x25f   :  { %v814_v35 = vsel %vm813_vm15, %v812_v33, %v786_v34  ;;  %v3869_v33 = vld [vmem:[%s7607_s5 + $0xc0] sm:$0xff]  ;;  %v3870_v34 = vld [vmem:[%s7607_s5 + $0xc8] sm:$0xff] }
 0x260   :  { %v816_v40 = vsel %vm815_vm3, %v814_v35, %v789_v32  ;;  %v6716_v45 = vpack.c.bf16 %v3870_v34, %v3869_v33  ;;  %v3895_v33 = vld [vmem:[%s7607_s5 + $0x118] sm:$0xff] }
 0x262   :  { %v792_v41 = vpop.permute.xlu0 %791  ;;  %v825_v43 = vpop.permute.xlu1 %824 }
 0x263   :  { %v818_v44 = vsel %vm7626_vm2, %v816_v40, %v792_v41  ;;  %vm7630_vm2 = vcmp.eq.s32.totalorder %v6531_v39, %v6525_v36  ;;  %v863_v50 = vsel %vm794_vm6, %v6485_v10, %v825_v43  ;;  %v3865_v10 = vld [vmem:[%s7607_s5 + $0xa0] sm:$0xff]  ;;  %v6706_v40 = vadd.s32 88, %v6416_v42 }
 0x264   :  { %v6546_v46 = vrot.slane %v818_v44, %v6428_v47  ;;  %v6642_v19 = vpack.c.bf16 %v3866_v11, %v3865_v10  ;;  %v889_v41 = vadd.s32 96, %v6416_v42 }
 0x266   :  { %v828_v51 = vpop.permute.xlu0 %827  ;;  %v831_v52 = vpop.permute.xlu1 %830  ;;  %v6562_v53 = vsel %vm7628_vm0, %v6546_v46, 0.0  ;;  %v6568_v54 = vsel %vm7627_vm5, %v6546_v46, 0.0  ;;  %v6587_v63 = vsel %vm7630_vm2, %v6546_v46, 0.0  ;;  %vm7629_vm5 = vcmp.eq.s32.totalorder %v6549_v48, %v6525_v36 }
 0x267   :  { %v864_v58 = vsel %vm796_vm7, %v863_v50, %v828_v51  ;;  %4628 = vmatprep.mubr.msk.f32.mxu0 %vm585_vm4, %v6562_v53  ;;  %vm7632_vm0 = vcmp.eq.s32.totalorder %v6554_v49, %v6525_v36  ;;  %v6611_v9 = vsel %vm7629_vm5, %v6546_v46, 0.0  ;;  %vm7631_vm5 = vcmp.eq.s32.totalorder %v6592_v0, %v6525_v36 }
 0x268   :  { %4629 = vmatmul.mubr.msk.f32.vlgmr.msra.gmra.mrb[2].mxu0 %vm585_vm4, %v6568_v54  ;;  %v865_v3 = vsel %vm798_vm8, %v864_v58, %v831_v52  ;;  %v6625_v13 = vsel %vm7632_vm0, %v6546_v46, 0.0  ;;  %vm7634_vm2 = vcmp.eq.s32.totalorder %v6600_v2, %v6525_v36  ;;  %v6649_v21 = vsel %vm7631_vm5, %v6546_v46, 0.0  ;;  %v3871_v52 = vld [vmem:[%s7607_s5 + $0xd0] sm:$0xff]  ;;  %v3872_v58 = vld [vmem:[%s7607_s5 + $0xd8] sm:$0xff] }
 0x269   :  { %5543 = vmatpush3.bf16.msra.mxu0 %v6476_v8  ;;  %4631 = vmatprep.mubr.msk.f32.mxu0 %vm585_vm4, %v6587_v63  ;;  %v6663_v24 = vsel %vm7634_vm2, %v6546_v46, 0.0  ;;  %vm7633_vm5 = vcmp.eq.s32.totalorder %v6630_v14, %v6525_v36  ;;  %vm7636_vm0 = vcmp.eq.s32.totalorder %v6638_v15, %v6525_v36  ;;  %vm7637_vm2 = vcmp.eq.s32.totalorder %v6676_v26, %v6525_v36 }
 0x26a   :  { %v834_v4 = vpop.permute.xlu0 %833  ;;  %v837_v5 = vpop.permute.xlu1 %836  ;;  %5545 = vmatprep.subr.bf16.mxu0 %v6570_v57  ;;  %v6687_v32 = vsel %vm7633_vm5, %v6546_v46, 0.0  ;;  %v6701_v35 = vsel %vm7636_vm0, %v6546_v46, 0.0  ;;  %vm7635_vm5 = vcmp.eq.s32.totalorder %v6668_v25, %v6525_v36  ;;  %v6737_v61 = vsel %vm7637_vm2, %v6546_v46, 0.0 }
 0x26b   :  { %v866_v7 = vsel %vm800_vm9, %v865_v3, %v834_v4  ;;  %v6723_v51 = vsel %vm7635_vm5, %v6546_v46, 0.0  ;;  %vm7638_vm5 = vcmp.eq.s32.totalorder %v6706_v40, %v6525_v36  ;;  %vm905_vm0 = vcmp.eq.s32.totalorder %v889_v41, %v6525_v36  ;;  %v3897_v41 = vld [vmem:[%s7607_s5 + $0x128] sm:$0xff] }
 0x26c   :  { %4632 = vmatmul.mubr.msk.f32.gmra.mrb[4].mxu0 %vm585_vm4, %v6611_v9  ;;  %v867_v16 = vsel %vm802_vm10, %v866_v7, %v837_v5  ;;  %v6748_v7 = vpack.c.bf16 %v3872_v58, %v3871_v52  ;;  %v6755_v11 = vsel %vm7638_vm5, %v6546_v46, 0.0  ;;  %vm7639_vm2 = vcmask 850944  }
 0x26d   :  { %5547 = vmatpush3.bf16.msra.mxu0 %v6570_v57  ;;  %4634 = vmatprep.mubr.msk.f32.mxu0 %vm585_vm4, %v6625_v13  ;;  %vm906_vm5 = vcmp.eq.s32.totalorder %v890_v62, %v6525_v36 }
 0x26e   :  { %v840_v17 = vpop.permute.xlu0 %839  ;;  %v843_v18 = vpop.permute.xlu1 %842  ;;  %5549 = vmatprep.subr.bf16.mxu0 %v6604_v6  ;;  %v6782_v23 = vsel %vm906_vm5, %v6546_v46, 0.0 }
 0x26f   :  { %v868_v20 = vsel %vm804_vm11, %v867_v16, %v840_v17  ;;  %v3888_v16 = vld [vmem:[%s7607_s5 + $0xe0] sm:$0xff]  ;;  %v3889_v17 = vld [vmem:[%s7607_s5 + $0xe8] sm:$0xff] }
 0x270   :  { %4635 = vmatmul.mubr.msk.f32.gmra.mrb[6].mxu0 %vm585_vm4, %v6649_v21  ;;  %v869_v27 = vsel %vm806_vm12, %v868_v20, %v843_v18  ;;  %v6769_v20 = vsel %vm905_vm0, %v6546_v46, 0.0  ;;  %v6778_v22 = vpack.c.bf16 %v3889_v17, %v3888_v16  ;;  %vm7640_vm0 = vmmov 0   ;;  %v3892_v46 = vld [vmem:[%s7607_s5 + $0x100] sm:$0xff] }
 0x271   :  { %5551 = vmatpush3.bf16.msra.mxu0 %v6604_v6  ;;  %4637 = vmatprep.mubr.msk.f32.mxu0 %vm585_vm4, %v6663_v24 }
 0x272   :  { %v846_v28 = vpop.permute.xlu0 %845  ;;  %v849_v29 = vpop.permute.xlu1 %848  ;;  %5553 = vmatprep.subr.bf16.mxu0 %v6642_v19 }
 0x273   :  { %v870_v31 = vsel %vm79_vm1, %v869_v27, %v846_v28  ;;  %v3890_v27 = vld [vmem:[%s7607_s5 + $0xf0] sm:$0xff]  ;;  %v3891_v28 = vld [vmem:[%s7607_s5 + $0xf8] sm:$0xff] }
 0x274   :  { %4638 = vmatmul.mubr.msk.f32.gmra.mrb[8].mxu0 %vm585_vm4, %v6687_v32  ;;  %v871_v43 = vsel %vm809_vm13, %v870_v31, %v849_v29  ;;  %v3893_v29 = vld [vmem:[%s7607_s5 + $0x108] sm:$0xff]  ;;  %v3894_v31 = vld [vmem:[%s7607_s5 + $0x110] sm:$0xff] }
 0x275   :  { %5555 = vmatpush3.bf16.msra.mxu0 %v6642_v19  ;;  %4640 = vmatprep.mubr.msk.f32.mxu0 %vm585_vm4, %v6701_v35  ;;  %v5601_v34 = vpack.c.bf16 %v3895_v33, %v3894_v31 }
 0x276   :  { %v852_v44 = vpop.permute.xlu0 %851  ;;  %v855_v38 = vpop.permute.xlu1 %854  ;;  %5557 = vmatprep.subr.bf16.mxu0 %v6680_v30 }
 0x277   :  { %v872_v50 = vsel %vm811_vm14, %v871_v43, %v852_v44  ;;  %v3899_v44 = vld [vmem:[%s7607_s5 + $0x138] sm:$0xff] }
 0x278   :  { %4641 = vmatmul.mubr.msk.f32.gmra.mrb[10].mxu0 %vm585_vm4, %v6723_v51  ;;  %v873_v3 = vsel %vm813_vm15, %v872_v50, %v855_v38  ;;  %v3901_v50 = vld [vmem:[%s7607_s5 + $0x148] sm:$0xff] }
 0x279   :  { %5559 = vmatpush3.bf16.msra.mxu0 %v6680_v30  ;;  %4643 = vmatprep.mubr.msk.f32.mxu0 %vm585_vm4, %v6737_v61 }
 0x27a   :  { %v858_v4 = vpop.permute.xlu0 %857  ;;  %v861_v5 = vpop.permute.xlu1 %860  ;;  %5561 = vmatprep.subr.bf16.mxu0 %v6716_v45 }
 0x27b   :  { %v874_v10 = vsel %vm815_vm3, %v873_v3, %v858_v4 }
 0x27c   :  { %v6764_v18 = vsel %vm7639_vm2, %v874_v10, %v861_v5  ;;  %4644 = vmatmul.mubr.msk.f32.gmra.mrb[12].mxu0 %vm585_vm4, %v6755_v11  ;;  %vm7641_vm2 = vcmask 1046528  }
 0x27d   :  { %5563 = vmatpush3.bf16.msra.mxu0 %v6716_v45  ;;  %4646 = vmatprep.mubr.msk.f32.mxu0 %vm585_vm4, %v6769_v20  ;;  %vm7642_vm5 = vmmov %vm7641_vm2 }
 0x27e   :  { %4678 = vmatmul.mubr.msk.f32.vlgmr.msra.gmra.mrb[2].mxu1 %vm585_vm4, %v6764_v18  ;;  %5565 = vmatprep.subr.bf16.mxu0 %v6748_v7 }
 0x27f   :  { %5570 = vmatpush3.bf16.msra.mxu1 %v6476_v8  ;;  %4757 = vmatprep.mubr.msk.f32.mxu1 %vm7640_vm0, %v6151_v12  ;;  %v5593_v8 = vpack.c.bf16 %v3891_v28, %v3890_v27 }
 0x280   :  { %4647 = vmatmul.mubr.msk.f32.gmra.mrb[14].mxu0 %vm585_vm4, %v6782_v23  ;;  %5571 = vmatprep.subr.bf16.mxu1 %v6149_v1 }
 0x281   :  { %5567 = vmatpush3.bf16.msra.mxu0 %v6748_v7  ;;  %4708 = vmatprep.mubr.msk.f32.mxu0 %vm585_vm4, %v6562_v53 }
 0x282   :  { %5590 = vmatprep.subr.bf16.mxu0 %v6778_v22 }
 0x283   :  { %5573 = vmatpush3.bf16.msra.mxu1 %v6570_v57  ;;  %v5597_v57 = vpack.c.bf16 %v3893_v29, %v3892_v46 }
 0x284   :  { %4709 = vmatmul.mubr.msk.f32.vlgmr.msra.gmra.mrb[16].mxu0 %vm585_vm4, %v6568_v54  ;;  %5574 = vmatprep.subr.bf16.mxu1 %v6149_v1 }
 0x285   :  { %4711 = vmatprep.mubr.msk.f32.mxu0 %vm585_vm4, %v6587_v63  ;;  %5592 = vmatpush3.bf16.msra.mxu0 %v6778_v22 }
 0x286   :  { %5594 = vmatprep.subr.bf16.mxu0 %v5593_v8 }
 0x287   :  { %5576 = vmatpush3.bf16.msra.mxu1 %v6604_v6  ;;  %v3896_v6 = vld [vmem:[%s7607_s5 + $0x120] sm:$0xff] }
 0x288   :  { %4712 = vmatmul.mubr.msk.f32.gmra.mrb[18].mxu0 %vm585_vm4, %v6611_v9  ;;  %5577 = vmatprep.subr.bf16.mxu1 %v6149_v1  ;;  %v5605_v43 = vpack.c.bf16 %v3897_v41, %v3896_v6 }
 0x289   :  { %4714 = vmatprep.mubr.msk.f32.mxu0 %vm585_vm4, %v6625_v13  ;;  %5596 = vmatpush3.bf16.msra.mxu0 %v5593_v8 }
 0x28a   :  { %5598 = vmatprep.subr.bf16.mxu0 %v5597_v57 }
 0x28b   :  { %5579 = vmatpush3.bf16.msra.mxu1 %v6642_v19  ;;  %v3898_v19 = vld [vmem:[%s7607_s5 + $0x130] sm:$0xff] }
 0x28c   :  { %4715 = vmatmul.mubr.msk.f32.gmra.mrb[20].mxu0 %vm585_vm4, %v6649_v21  ;;  %5580 = vmatprep.subr.bf16.mxu1 %v6149_v1  ;;  %v5609_v38 = vpack.c.bf16 %v3899_v44, %v3898_v19 }
 0x28d   :  { %4717 = vmatprep.mubr.msk.f32.mxu0 %vm585_vm4, %v6663_v24  ;;  %5600 = vmatpush3.bf16.msra.mxu0 %v5597_v57 }
 0x28e   :  { %5602 = vmatprep.subr.bf16.mxu0 %v5601_v34 }
 0x28f   :  { %5582 = vmatpush3.bf16.msra.mxu1 %v6680_v30  ;;  %v3900_v30 = vld [vmem:[%s7607_s5 + $0x140] sm:$0xff] }
 0x290   :  { %4718 = vmatmul.mubr.msk.f32.gmra.mrb[22].mxu0 %vm585_vm4, %v6687_v32  ;;  %5583 = vmatprep.subr.bf16.mxu1 %v6149_v1  ;;  %v5613_v52 = vpack.c.bf16 %v3901_v50, %v3900_v30 }
 0x291   :  { %4720 = vmatprep.mubr.msk.f32.mxu0 %vm585_vm4, %v6701_v35  ;;  %5604 = vmatpush3.bf16.msra.mxu0 %v5601_v34 }
 0x292   :  { %5606 = vmatprep.subr.bf16.mxu0 %v5605_v43 }
 0x293   :  { %5585 = vmatpush3.bf16.msra.mxu1 %v6716_v45 }
 0x294   :  { %4721 = vmatmul.mubr.msk.f32.gmra.mrb[24].mxu0 %vm585_vm4, %v6723_v51  ;;  %5586 = vmatprep.subr.bf16.mxu1 %v6149_v1 }
 0x295   :  { %4723 = vmatprep.mubr.msk.f32.mxu0 %vm585_vm4, %v6737_v61  ;;  %5608 = vmatpush3.bf16.msra.mxu0 %v5605_v43 }
 0x296   :  { %5610 = vmatprep.subr.bf16.mxu0 %v5609_v38 }
 0x297   :  { %5588 = vmatpush3.bf16.msra.mxu1 %v6748_v7 }
 0x298   :  { %4724 = vmatmul.mubr.msk.f32.gmra.mrb[26].mxu0 %vm585_vm4, %v6755_v11  ;;  %5617 = vmatprep.subr.bf16.mxu1 %v6149_v1 }
 0x299   :  { %4726 = vmatprep.mubr.msk.f32.mxu0 %vm585_vm4, %v6769_v20  ;;  %5612 = vmatpush3.bf16.msra.mxu0 %v5609_v38 }
 0x29a   :  { %4758 = vmatmul.mubr.msk.f32.vlgmr.msra.gmra.mrb[2].mxu1 %vm585_vm4, %v6764_v18  ;;  %5614 = vmatprep.subr.bf16.mxu0 %v5613_v52 }
 0x29b   :  { %5619 = vmatpush3.bf16.msra.mxu1 %v6778_v22  ;;  %4837 = vmatprep.mubr.msk.f32.mxu1 %vm7640_vm0, %v6151_v12 }
 0x29c   :  { %4727 = vmatmul.mubr.msk.f32.gmra.mrb[28].mxu0 %vm585_vm4, %v6782_v23  ;;  %5620 = vmatprep.subr.bf16.mxu1 %v6149_v1 }
 0x29d   :  { %5616 = vmatpush3.bf16.msra.mxu0 %v5613_v52  ;;  %4788 = vmatprep.mubr.msk.f32.mxu0 %vm585_vm4, %v6562_v53  ;;  %v1889_v53 = vrot.slane %v6351_v60, 1 }
 0x29f   :  { %5622 = vmatpush3.bf16.msra.mxu1 %v5593_v8 }
 0x2a0   :  { %4789 = vmatmul.mubr.msk.f32.vlgmr.msra.gmra.mrb[30].mxu0 %vm585_vm4, %v6568_v54  ;;  %5623 = vmatprep.subr.bf16.mxu1 %v6149_v1  ;;  %v1890_v54 = vrot.slane %v6347_v56, 1 }
 0x2a1   :  { %4791 = vmatprep.mubr.msk.f32.mxu0 %vm585_vm4, %v6587_v63  ;;  %v1634_v63 = vrot.slane %v6349_v59, 1 }
 0x2a3   :  { %5625 = vmatpush3.bf16.msra.mxu1 %v5597_v57 }
 0x2a4   :  { %4792 = vmatmul.mubr.msk.f32.gmra.mrb[32].mxu0 %vm585_vm4, %v6611_v9  ;;  %5626 = vmatprep.subr.bf16.mxu1 %v6149_v1  ;;  %v1635_v9 = vrot.slane %v6345_v55, 1 }
 0x2a5   :  { %4794 = vmatprep.mubr.msk.f32.mxu0 %vm585_vm4, %v6625_v13  ;;  %v1891_v13 = vsel %vm7641_vm2, %v1889_v53, %v1890_v54  ;;  %vm7643_vm2 = vcmask 1045504  }
 0x2a7   :  { %5628 = vmatpush3.bf16.msra.mxu1 %v5601_v34 }
 0x2a8   :  { %4795 = vmatmul.mubr.msk.f32.gmra.mrb[34].mxu0 %vm585_vm4, %v6649_v21  ;;  %5629 = vmatprep.subr.bf16.mxu1 %v6149_v1  ;;  %v1636_v21 = vsel %vm7642_vm5, %v1634_v63, %v1635_v9  ;;  %vm7644_vm5 = vmmov %vm7643_vm2 }
 0x2a9   :  { %4797 = vmatprep.mubr.msk.f32.mxu0 %vm585_vm4, %v6663_v24 }
 0x2ab   :  { %5631 = vmatpush3.bf16.msra.mxu1 %v5605_v43 }
 0x2ac   :  { %4798 = vmatmul.mubr.msk.f32.gmra.mrb[36].mxu0 %vm585_vm4, %v6687_v32  ;;  %5632 = vmatprep.subr.bf16.mxu1 %v6149_v1 }
 0x2ad   :  { %4800 = vmatprep.mubr.msk.f32.mxu0 %vm585_vm4, %v6701_v35 }
 0x2af   :  { %5634 = vmatpush3.bf16.msra.mxu1 %v5609_v38 }
 0x2b0   :  { %4801 = vmatmul.mubr.msk.f32.gmra.mrb[38].mxu0 %vm585_vm4, %v6723_v51  ;;  %5635 = vmatprep.subr.bf16.mxu1 %v6149_v1 }
 0x2b1   :  { %4803 = vmatprep.mubr.msk.f32.mxu0 %vm585_vm4, %v6737_v61 }
 0x2b3   :  { %5637 = vmatpush3.bf16.msra.mxu1 %v5613_v52 }
 0x2b4   :  { %4804 = vmatmul.mubr.msk.f32.gmra.mrb[40].mxu0 %vm585_vm4, %v6755_v11 }
 0x2b5   :  { %4806 = vmatprep.mubr.msk.f32.mxu0 %vm585_vm4, %v6769_v20 }
 0x2b6   :  { %4838 = vmatmul.mubr.msk.f32.vlgmr.msra.gmra.mrb[2].mxu1 %vm585_vm4, %v6764_v18 }
 0x2b7   :  { %4961 = vmatprep.mubr.msk.f32.mxu1 %vm585_vm4, %v1891_v13 }
 0x2b8   :  { %4807 = vmatmul.mubr.msk.f32.gmra.mrb[42].mxu0 %vm585_vm4, %v6782_v23 }
 0x2b9   :  { %4868 = vmatprep.mubr.msk.f32.mxu0 %vm585_vm4, %v1636_v21 }
 0x33b   :  { %v4630_v24 = vpop.f32.mrb[2].mxu0 }
 0x33c   :  { %v1047_v32 = vpop.f32.mrb[3].mxu0 }
 0x33d   :  { %v6921_v35 = vpack.c.bf16 %v4630_v24, %v1047_v32 }
 0x33f   :  { %v4633_v45 = vpop.f32.mrb[4].mxu0 }
 0x340   :  { %v1057_v51 = vpop.f32.mrb[5].mxu0 }
 0x341   :  { %v6923_v58 = vpack.c.bf16 %v4633_v45, %v1057_v51 }
 0x343   :  { %v4636_v61 = vpop.f32.mrb[6].mxu0 }
 0x344   :  { %v1067_v62 = vpop.f32.mrb[7].mxu0 }
 0x345   :  { %v6925_v3 = vpack.c.bf16 %v4636_v61, %v1067_v62 }
 0x347   :  { %v4639_v4 = vpop.f32.mrb[8].mxu0 }
 0x348   :  { %v1077_v5 = vpop.f32.mrb[9].mxu0 }
 0x349   :  { %v6927_v7 = vpack.c.bf16 %v4639_v4, %v1077_v5 }
 0x34b   :  { %v4642_v10 = vpop.f32.mrb[10].mxu0 }
 0x34c   :  { %v1087_v11 = vpop.f32.mrb[11].mxu0 }
 0x34d   :  { %v6929_v16 = vpack.c.bf16 %v4642_v10, %v1087_v11 }
 0x34f   :  { %v4645_v17 = vpop.f32.mrb[12].mxu0 }
 0x350   :  { %v1097_v18 = vpop.f32.mrb[13].mxu0 }
 0x351   :  { %v6931_v20 = vpack.c.bf16 %v4645_v17, %v1097_v18 }
 0x353   :  { %v4648_v22 = vpop.f32.mrb[14].mxu0 }
 0x354   :  { %v1107_v23 = vpop.f32.mrb[15].mxu0 }
 0x355   :  { %v6933_v27 = vpack.c.bf16 %v4648_v22, %v1107_v23 }
 0x357   :  { %v4710_v28 = vpop.f32.mrb[16].mxu0 }
 0x358   :  { %v1271_v8 = vpop.f32.mrb[17].mxu0 }
 0x359   :  { %v5638_v46 = vpack.c.bf16 %v4710_v28, %v1271_v8 }
 0x35b   :  { %v4713_v29 = vpop.f32.mrb[18].mxu0  ;;  %5639 = vmatprep.subr.bf16.mxu0 %v5638_v46  ;;  %5723 = vmatprep.subr.bf16.mxu1 %v5638_v46 }
 0x35c   :  { %v1281_v57 = vpop.f32.mrb[19].mxu0  ;;  %5641 = vmatpush3.bf16.msra.mxu0 %v5638_v46  ;;  %5725 = vmatpush3.bf16.msra.mxu1 %v5638_v46 }
 0x35d   :  { %v5642_v31 = vpack.c.bf16 %v4713_v29, %v1281_v57  ;;  %v1796_v29 = vrot.slane %v6345_v55, 2  ;;  %v2050_v57 = vrot.slane %v6351_v60, 2 }
 0x35f   :  { %v4716_v33 = vpop.f32.mrb[20].mxu0  ;;  %5643 = vmatprep.subr.bf16.mxu0 %v5642_v31  ;;  %5727 = vmatprep.subr.bf16.mxu1 %v5642_v31 }
 0x360   :  { %v1291_v34 = vpop.f32.mrb[21].mxu0  ;;  %5645 = vmatpush3.bf16.msra.mxu0 %v5642_v31  ;;  %5729 = vmatpush3.bf16.msra.mxu1 %v5642_v31  ;;  %v2051_v31 = vrot.slane %v6347_v56, 2 }
 0x361   :  { %v5646_v6 = vpack.c.bf16 %v4716_v33, %v1291_v34 }
 0x363   :  { %v4719_v41 = vpop.f32.mrb[22].mxu0  ;;  %5647 = vmatprep.subr.bf16.mxu0 %v5646_v6  ;;  %5731 = vmatprep.subr.bf16.mxu1 %v5646_v6 }
 0x364   :  { %v1301_v43 = vpop.f32.mrb[23].mxu0  ;;  %5649 = vmatpush3.bf16.msra.mxu0 %v5646_v6  ;;  %5733 = vmatpush3.bf16.msra.mxu1 %v5646_v6 }
 0x365   :  { %v5650_v19 = vpack.c.bf16 %v4719_v41, %v1301_v43 }
 0x367   :  { %v4722_v44 = vpop.f32.mrb[24].mxu0  ;;  %5651 = vmatprep.subr.bf16.mxu0 %v5650_v19  ;;  %5735 = vmatprep.subr.bf16.mxu1 %v5650_v19 }
 0x368   :  { %v1311_v38 = vpop.f32.mrb[25].mxu0  ;;  %5653 = vmatpush3.bf16.msra.mxu0 %v5650_v19  ;;  %5737 = vmatpush3.bf16.msra.mxu1 %v5650_v19 }
 0x369   :  { %v5654_v30 = vpack.c.bf16 %v4722_v44, %v1311_v38 }
 0x36b   :  { %v4725_v50 = vpop.f32.mrb[26].mxu0  ;;  %5655 = vmatprep.subr.bf16.mxu0 %v5654_v30  ;;  %5739 = vmatprep.subr.bf16.mxu1 %v5654_v30 }
 0x36c   :  { %v1321_v52 = vpop.f32.mrb[27].mxu0  ;;  %5657 = vmatpush3.bf16.msra.mxu0 %v5654_v30  ;;  %5741 = vmatpush3.bf16.msra.mxu1 %v5654_v30 }
 0x36d   :  { %v5658_v53 = vpack.c.bf16 %v4725_v50, %v1321_v52 }
 0x36f   :  { %v4728_v63 = vpop.f32.mrb[28].mxu0  ;;  %5659 = vmatprep.subr.bf16.mxu0 %v5658_v53  ;;  %5743 = vmatprep.subr.bf16.mxu1 %v5658_v53 }
 0x370   :  { %v1331_v13 = vpop.f32.mrb[29].mxu0  ;;  %5661 = vmatpush3.bf16.msra.mxu0 %v5658_v53  ;;  %5745 = vmatpush3.bf16.msra.mxu1 %v5658_v53 }
 0x371   :  { %v5662_v21 = vpack.c.bf16 %v4728_v63, %v1331_v13 }
 0x373   :  { %v4790_v24 = vpop.f32.mrb[30].mxu0  ;;  %5663 = vmatprep.subr.bf16.mxu0 %v5662_v21  ;;  %5747 = vmatprep.subr.bf16.mxu1 %v5662_v21 }
 0x374   :  { %v1492_v32 = vpop.f32.mrb[31].mxu0  ;;  %5665 = vmatpush3.bf16.msra.mxu0 %v5662_v21  ;;  %5749 = vmatpush3.bf16.msra.mxu1 %v5662_v21 }
 0x375   :  { %v6935_v45 = vpack.c.bf16 %v4790_v24, %v1492_v32  ;;  %5667 = vmatprep.subr.bf16.mxu0 %v6921_v35  ;;  %5751 = vmatprep.subr.bf16.mxu1 %v6921_v35 }
 0x377   :  { %v4793_v51 = vpop.f32.mrb[32].mxu0  ;;  %4869 = vmatmul.mubr.msk.f32.vlgmr.msra.gmra.mrb[44].mxu0 %vm585_vm4, %v1635_v9  ;;  %4962 = vmatmul.mubr.msk.f32.vlgmr.msra.gmra.mrb[4].mxu1 %vm585_vm4, %v1890_v54 }
 0x378   :  { %v1502_v61 = vpop.f32.mrb[33].mxu0  ;;  %5669 = vmatpush3.bf16.msra.mxu0 %v6921_v35  ;;  %4899 = vmatprep.mubr.msk.f32.mxu0 %vm585_vm4, %v6349_v59 }
 0x379   :  { %v5698_v62 = vpack.c.bf16 %v4793_v51, %v1502_v61  ;;  %5753 = vmatpush3.bf16.msra.mxu1 %v6921_v35  ;;  %4992 = vmatprep.mubr.msk.f32.mxu1 %vm585_vm4, %v6351_v60  ;;  %v2052_v60 = vsel %vm7644_vm5, %v2050_v57, %v2051_v31  ;;  %vm7648_vm5 = vcmp.eq.s32.totalorder %v6528_v37, %v6525_v36 }
 0x37a   :  { %5671 = vmatprep.subr.bf16.mxu0 %v6923_v58  ;;  %5755 = vmatprep.subr.bf16.mxu1 %v6923_v58 }
 0x37b   :  { %v4796_v9 = vpop.f32.mrb[34].mxu0 }
 0x37c   :  { %v1512_v4 = vpop.f32.mrb[35].mxu0  ;;  %5673 = vmatpush3.bf16.msra.mxu0 %v6923_v58 }
 0x37d   :  { %v5702_v54 = vpack.c.bf16 %v4796_v9, %v1512_v4  ;;  %5757 = vmatpush3.bf16.msra.mxu1 %v6923_v58  ;;  %5675 = vmatprep.subr.bf16.mxu0 %v6925_v3 }
 0x37e   :  { %5759 = vmatprep.subr.bf16.mxu1 %v6925_v3 }
 0x37f   :  { %v4799_v5 = vpop.f32.mrb[36].mxu0 }
 0x380   :  { %v1522_v35 = vpop.f32.mrb[37].mxu0  ;;  %5677 = vmatpush3.bf16.msra.mxu0 %v6925_v3 }
 0x381   :  { %v5706_v10 = vpack.c.bf16 %v4799_v5, %v1522_v35  ;;  %5761 = vmatpush3.bf16.msra.mxu1 %v6925_v3  ;;  %5679 = vmatprep.subr.bf16.mxu0 %v6927_v7 }
 0x382   :  { %5763 = vmatprep.subr.bf16.mxu1 %v6927_v7 }
 0x383   :  { %v4802_v11 = vpop.f32.mrb[38].mxu0 }
 0x384   :  { %v1532_v17 = vpop.f32.mrb[39].mxu0  ;;  %5681 = vmatpush3.bf16.msra.mxu0 %v6927_v7 }
 0x385   :  { %v5710_v58 = vpack.c.bf16 %v4802_v11, %v1532_v17  ;;  %5765 = vmatpush3.bf16.msra.mxu1 %v6927_v7  ;;  %5683 = vmatprep.subr.bf16.mxu0 %v6929_v16 }
 0x386   :  { %5767 = vmatprep.subr.bf16.mxu1 %v6929_v16 }
 0x387   :  { %v4805_v18 = vpop.f32.mrb[40].mxu0 }
 0x388   :  { %v1542_v22 = vpop.f32.mrb[41].mxu0  ;;  %5685 = vmatpush3.bf16.msra.mxu0 %v6929_v16 }
 0x389   :  { %v1627_v3 = vpop.f32.mrb[2].mxu1  ;;  %v5714_v23 = vpack.c.bf16 %v4805_v18, %v1542_v22  ;;  %5769 = vmatpush3.bf16.msra.mxu1 %v6929_v16  ;;  %5687 = vmatprep.subr.bf16.mxu0 %v6931_v20  ;;  %v1795_v16 = vrot.slane %v6349_v59, 2 }
 0x38a   :  { %v4839_v28 = vpop.f32.mrb[3].mxu1  ;;  %5771 = vmatprep.subr.bf16.mxu1 %v6931_v20 }
 0x38b   :  { %v4808_v8 = vpop.f32.mrb[42].mxu0  ;;  %v1797_v59 = vsel %vm7643_vm2, %v1795_v16, %v1796_v29  ;;  %vm2139_vm2 = vcmask 781312  }
 0x38c   :  { %v1552_v46 = vpop.f32.mrb[43].mxu0  ;;  %5689 = vmatpush3.bf16.msra.mxu0 %v6931_v20 }
 0x38d   :  { %v5718_v7 = vpack.c.bf16 %v4808_v8, %v1552_v46  ;;  %5773 = vmatpush3.bf16.msra.mxu1 %v6931_v20  ;;  %5691 = vmatprep.subr.bf16.mxu0 %v6933_v27 }
 0x38e   :  { %5775 = vmatprep.subr.bf16.mxu1 %v6933_v27 }
 0x390   :  { %5693 = vmatpush3.bf16.msra.mxu0 %v6933_v27 }
 0x391   :  { %5777 = vmatpush3.bf16.msra.mxu1 %v6933_v27  ;;  %5695 = vmatprep.subr.bf16.mxu0 %v6935_v45 }
 0x392   :  { %5779 = vmatprep.subr.bf16.mxu1 %v6935_v45 }
 0x393   :  { %4900 = vmatmul.mubr.msk.f32.vlgmr.msra.gmra.mrb[44].mxu0 %vm585_vm4, %v6345_v55  ;;  %v749_v55 = vld [vmem:[%s7610_s6] sm:$0x1]  ;;  %s7645_s6 = smov 120  }
 0x394   :  { %4993 = vmatmul.mubr.msk.f32.vlgmr.msra.gmra.mrb[4].mxu1 %vm585_vm4, %v6347_v56  ;;  %5697 = vmatpush3.bf16.msra.mxu0 %v6935_v45  ;;  %v6076_v56 = vadd.f32 %v1627_v3, %v749_v55 }
 0x395   :  { %4930 = vmatprep.mubr.msk.f32.mxu0 %vm585_vm4, %v1797_v59  ;;  %5781 = vmatpush3.bf16.msra.mxu1 %v6935_v45 }
 0x396   :  { %5023 = vmatprep.mubr.msk.f32.mxu1 %vm585_vm4, %v2052_v60  ;;  %5699 = vmatprep.subr.bf16.mxu0 %v5698_v62  ;;  %v1883_v20 = vrot.slane %v6076_v56, %v6428_v47 }
 0x397   :  { %5783 = vmatprep.subr.bf16.mxu1 %v5698_v62 }
 0x398   :  { %5701 = vmatpush3.bf16.msra.mxu0 %v5698_v62 }
 0x399   :  { %5785 = vmatpush3.bf16.msra.mxu1 %v5698_v62  ;;  %5703 = vmatprep.subr.bf16.mxu0 %v5702_v54 }
 0x39a   :  { %5787 = vmatprep.subr.bf16.mxu1 %v5702_v54 }
 0x39c   :  { %5705 = vmatpush3.bf16.msra.mxu0 %v5702_v54 }
 0x39d   :  { %5789 = vmatpush3.bf16.msra.mxu1 %v5702_v54  ;;  %5707 = vmatprep.subr.bf16.mxu0 %v5706_v10 }
 0x39e   :  { %5791 = vmatprep.subr.bf16.mxu1 %v5706_v10 }
 0x3a0   :  { %5709 = vmatpush3.bf16.msra.mxu0 %v5706_v10 }
 0x3a1   :  { %5793 = vmatpush3.bf16.msra.mxu1 %v5706_v10  ;;  %5711 = vmatprep.subr.bf16.mxu0 %v5710_v58 }
 0x3a2   :  { %5795 = vmatprep.subr.bf16.mxu1 %v5710_v58 }
 0x3a4   :  { %5713 = vmatpush3.bf16.msra.mxu0 %v5710_v58 }
 0x3a5   :  { %5797 = vmatpush3.bf16.msra.mxu1 %v5710_v58  ;;  %5715 = vmatprep.subr.bf16.mxu0 %v5714_v23 }
 0x3a6   :  { %5799 = vmatprep.subr.bf16.mxu1 %v5714_v23 }
 0x3a8   :  { %5717 = vmatpush3.bf16.msra.mxu0 %v5714_v23 }
 0x3a9   :  { %5801 = vmatpush3.bf16.msra.mxu1 %v5714_v23  ;;  %5719 = vmatprep.subr.bf16.mxu0 %v5718_v7 }
 0x3aa   :  { %5803 = vmatprep.subr.bf16.mxu1 %v5718_v7 }
 0x3ac   :  { %5721 = vmatpush3.bf16.msra.mxu0 %v5718_v7 }
 0x3ad   :  { %5805 = vmatpush3.bf16.msra.mxu1 %v5718_v7 }
 0x3ae   :  { %5830 = vmatprep.subr.bf16.mxu1 %v6149_v1 }
 0x3af   :  { %4931 = vmatmul.mubr.msk.f32.vlgmr.msra.gmra.mrb[44].mxu0 %vm585_vm4, %v1796_v29 }
 0x3b0   :  { %5024 = vmatmul.mubr.msk.f32.vlgmr.msra.gmra.mrb[4].mxu1 %vm585_vm4, %v2051_v31  ;;  %vm7647_vm4 = vcmp.eq.s32.totalorder %v6416_v42, %v6525_v36  ;;  %v3947_v42 = vld [vmem:[%s7611_s9 + $0x88] sm:$0xff] }
 0x3b1   :  { %5092 = vmatprep.mubr.msk.f32.mxu1 %vm7640_vm0, %v6151_v12 }
 0x482   :  { %v4932_v27 = vpop.f32.mrb[44].mxu0 }
 0x483   :  { %v7000_v33 = vadd.f32 %v4932_v27, %v1883_v20  ;;  %v5025_v34 = vpop.f32.mrb[4].mxu1  ;;  %v1868_v6 = vpop.f32.mrb[45].mxu0 }
 0x484   :  { %v7002_v41 = vadd.f32 %v5025_v34, %v1883_v20  ;;  %v7004_v43 = vadd.f32 %v1883_v20, %v1868_v6  ;;  %v2123_v19 = vpop.f32.mrb[5].mxu1 }
 0x485   :  { %v2140_v44 = vsel %vm2139_vm2, %v7000_v33, 0.0  ;;  %v2150_v38 = vmul.f32 %v7000_v33, %v7000_v33  ;;  %v7010_v30 = vadd.f32 %v2123_v19, %v1883_v20 }
 0x486   :  { %v2162_v50 = vsel %vm2139_vm2, %v7002_v41, 0.0  ;;  %v2172_v52 = vmul.f32 %v7002_v41, %v7002_v41  ;;  %v2138_v53 = vsel %vm815_vm3, %v7004_v43, 0.0  ;;  %v2149_v63 = vmul.f32 %v7004_v43, %v7004_v43 }
 0x487   :  { %v2152_v13 = vsel %vm2139_vm2, %v2150_v38, 0.0  ;;  %v2141_v21 = vadd.f32 %v2140_v44, %v2138_v53  ;;  %v2161_v24 = vsel %vm815_vm3, %v7010_v30, 0.0  ;;  %v2171_v32 = vmul.f32 %v7010_v30, %v7010_v30 }
 0x488   :  { %v2174_v45 = vsel %vm2139_vm2, %v2172_v52, 0.0  ;;  %v2151_v51 = vsel %vm815_vm3, %v2149_v63, 0.0  ;;  %v2163_v61 = vadd.f32 %v2162_v50, %v2161_v24  ;;  %vm7649_vm2 = vcmp.eq.s32.totalorder %v6531_v39, %v6525_v36 }
 0x489   :  { %v2142_v62 = vrot.slane %v2141_v21, 4  ;;  %v2153_v9 = vadd.f32 %v2152_v13, %v2151_v51  ;;  %v2173_v4 = vsel %vm815_vm3, %v2171_v32, 0.0 }
 0x48a   :  { %v2164_v54 = vrot.slane %v2163_v61, 4  ;;  %v2175_v5 = vadd.f32 %v2174_v45, %v2173_v4 }
 0x48b   :  { %v2143_v35 = vadd.f32 %v2142_v62, %v2141_v21  ;;  %v2154_v10 = vrot.slane %v2153_v9, 4 }
 0x48c   :  { %v2165_v11 = vadd.f32 %v2164_v54, %v2163_v61  ;;  %v2176_v17 = vrot.slane %v2175_v5, 4 }
 0x48d   :  { %v2144_v58 = vrot.slane %v2143_v35, 2  ;;  %v2155_v18 = vadd.f32 %v2154_v10, %v2153_v9 }
 0x48e   :  { %v2166_v22 = vrot.slane %v2165_v11, 2  ;;  %v2177_v3 = vadd.f32 %v2176_v17, %v2175_v5 }
 0x48f   :  { %v2145_v23 = vadd.f32 %v2144_v58, %v2143_v35  ;;  %v2156_v28 = vrot.slane %v2155_v18, 2 }
 0x490   :  { %v2167_v8 = vadd.f32 %v2166_v22, %v2165_v11  ;;  %v2178_v46 = vrot.slane %v2177_v3, 2 }
 0x491   :  { %v2146_v7 = vrot.slane %v2145_v23, 1  ;;  %v2157_v16 = vadd.f32 %v2156_v28, %v2155_v18 }
 0x492   :  { %v2168_v29 = vrot.slane %v2167_v8, 1  ;;  %v2179_v57 = vadd.f32 %v2178_v46, %v2177_v3 }
 0x493   :  { %v2147_v31 = vadd.f32 %v2146_v7, %v2145_v23  ;;  %v2158_v59 = vrot.slane %v2157_v16, 1 }
 0x494   :  { %v2169_v60 = vadd.f32 %v2168_v29, %v2167_v8  ;;  %v2180_v55 = vrot.slane %v2179_v57, 1 }
 0x495   :  { %v2159_v56 = vadd.f32 %v2158_v59, %v2157_v16 }
 0x496   :  { %v2170_v20 = vadd.f32 %v2169_v60, %v2147_v31  ;;  %v2181_v27 = vadd.f32 %v2180_v55, %v2179_v57 }
 0x498   :  { %v2182_v34 = vadd.f32 %v2181_v27, %v2159_v56  ;;  %2186 = vrot.lane.b32.xlu0 %v2170_v20, %s7645_s6 }
 0x49a   :  { %2191 = vrot.lane.b32.xlu1 %v2182_v34, %s7645_s6 }
 0x49c   :  { %2195 = vrot.lane.b32.xlu0 %v2170_v20, %s7646_s27 }
 0x49e   :  { %2199 = vrot.lane.b32.xlu1 %v2182_v34, %s7646_s27 }
 0x4a0   :  { %2203 = vrot.lane.b32.xlu0 %v2170_v20, %s6136_s30 }
 0x4a2   :  { %2207 = vrot.lane.b32.xlu1 %v2182_v34, %s6136_s30 }
 0x4a4   :  { %2211 = vrot.lane.b32.xlu0 %v2170_v20, %s6137_s14 }
 0x4a6   :  { %2215 = vrot.lane.b32.xlu1 %v2182_v34, %s6137_s14 }
 0x4a8   :  { %2219 = vrot.lane.b32.xlu0 %v2170_v20, %s6138_s0 }
 0x4aa   :  { %2223 = vrot.lane.b32.xlu1 %v2182_v34, %s6138_s0 }
 0x4ac   :  { %2227 = vrot.lane.b32.xlu0 %v2170_v20, %s6139_s15 }
 0x4ae   :  { %2231 = vrot.lane.b32.xlu1 %v2182_v34, %s6139_s15 }
 0x4b0   :  { %2235 = vrot.lane.b32.xlu0 %v2170_v20, %s6140_s16 }
 0x4b2   :  { %2239 = vrot.lane.b32.xlu1 %v2182_v34, %s6140_s16 }
 0x4b4   :  { %2243 = vrot.lane.b32.xlu0 %v2170_v20, %s6141_s17 }
 0x4b6   :  { %2247 = vrot.lane.b32.xlu1 %v2182_v34, %s6141_s17 }
 0x4b8   :  { %2251 = vrot.lane.b32.xlu0 %v2170_v20, %s6142_s18 }
 0x4ba   :  { %2255 = vrot.lane.b32.xlu1 %v2182_v34, %s6142_s18 }
 0x4bc   :  { %2259 = vrot.lane.b32.xlu0 %v2170_v20, %s6143_s19 }
 0x4be   :  { %2263 = vrot.lane.b32.xlu1 %v2182_v34, %s6143_s19 }
 0x4c0   :  { %2267 = vrot.lane.b32.xlu0 %v2170_v20, %s6144_s20 }
 0x4c2   :  { %2271 = vrot.lane.b32.xlu1 %v2182_v34, %s6144_s20 }
 0x50a   :  { %v2187_v6 = vpop.permute.xlu0 %2186 }
 0x50b   :  { %v2189_v32 = vadd.f32 %v2187_v6, %v2170_v20 }
 0x50c   :  { %v2192_v19 = vpop.permute.xlu1 %2191 }
 0x50d   :  { %v2194_v51 = vadd.f32 %v2192_v19, %v2182_v34 }
 0x50e   :  { %v2196_v44 = vpop.permute.xlu0 %2195 }
 0x50f   :  { %v2198_v61 = vadd.f32 %v2196_v44, %v2189_v32  ;;  %v2136_v32 = vld [vmem:[%s7612_s7] sm:$0x1] }
 0x510   :  { %v2200_v38 = vpop.permute.xlu1 %2199 }
 0x511   :  { %v2202_v9 = vadd.f32 %v2200_v38, %v2194_v51  ;;  %v2404_v51 = vld [vmem:[%s7611_s9 + $0x20] sm:$0xff] }
 0x512   :  { %v2204_v50 = vpop.permute.xlu0 %2203 }
 0x513   :  { %v2206_v4 = vadd.f32 %v2204_v50, %v2198_v61  ;;  %v2405_v61 = vld [vmem:[%s7611_s9 + $0x28] sm:$0xff] }
 0x514   :  { %v2208_v52 = vpop.permute.xlu1 %2207 }
 0x515   :  { %v2210_v5 = vadd.f32 %v2208_v52, %v2202_v9  ;;  %v2400_v52 = vld [vmem:[%s7611_s9] sm:$0xff]  ;;  %v5814_v9 = vpack.c.bf16 %v2405_v61, %v2404_v51  ;;  %v3944_v51 = vld [vmem:[%s7611_s9 + $0x70] sm:$0xff]  ;;  %v3945_v61 = vld [vmem:[%s7611_s9 + $0x78] sm:$0xff] }
 0x516   :  { %v2212_v53 = vpop.permute.xlu0 %2211 }
 0x517   :  { %v2214_v35 = vadd.f32 %v2212_v53, %v2206_v4  ;;  %v2401_v53 = vld [vmem:[%s7611_s9 + $0x8] sm:$0xff] }
 0x518   :  { %v2216_v63 = vpop.permute.xlu1 %2215 }
 0x519   :  { %v2218_v11 = vadd.f32 %v2216_v63, %v2210_v5  ;;  %v5806_v63 = vpack.c.bf16 %v2401_v53, %v2400_v52  ;;  %v2407_v5 = vld [vmem:[%s7611_s9 + $0x38] sm:$0xff] }
 0x51a   :  { %v2220_v13 = vpop.permute.xlu0 %2219 }
 0x51b   :  { %v2222_v17 = vadd.f32 %v2220_v13, %v2214_v35  ;;  %5807 = vmatprep.subr.bf16.mxu0 %v5806_v63  ;;  %v2402_v13 = vld [vmem:[%s7611_s9 + $0x10] sm:$0xff]  ;;  %5832 = vmatpush3.bf16.msra.mxu1 %v5806_v63 }
 0x51c   :  { %v2224_v21 = vpop.permute.xlu1 %2223  ;;  %5809 = vmatpush3.bf16.msra.mxu0 %v5806_v63  ;;  %5833 = vmatprep.subr.bf16.mxu1 %v6149_v1 }
 0x51d   :  { %v2226_v18 = vadd.f32 %v2224_v21, %v2218_v11  ;;  %v2403_v21 = vld [vmem:[%s7611_s9 + $0x18] sm:$0xff]  ;;  %v2409_v11 = vld [vmem:[%s7611_s9 + $0x48] sm:$0xff] }
 0x51e   :  { %v2228_v24 = vpop.permute.xlu0 %2227 }
 0x51f   :  { %v2230_v22 = vadd.f32 %v2228_v24, %v2222_v17  ;;  %v5810_v24 = vpack.c.bf16 %v2403_v21, %v2402_v13 }
 0x520   :  { %v2232_v45 = vpop.permute.xlu1 %2231 }
 0x521   :  { %v2234_v23 = vadd.f32 %v2232_v45, %v2226_v18  ;;  %5811 = vmatprep.subr.bf16.mxu0 %v5810_v24  ;;  %5835 = vmatpush3.bf16.msra.mxu1 %v5810_v24  ;;  %v2411_v18 = vld [vmem:[%s7611_s9 + $0x58] sm:$0xff] }
 0x522   :  { %v2236_v62 = vpop.permute.xlu0 %2235  ;;  %5813 = vmatpush3.bf16.msra.mxu0 %v5810_v24  ;;  %5836 = vmatprep.subr.bf16.mxu1 %v6149_v1 }
 0x523   :  { %v2238_v28 = vadd.f32 %v2236_v62, %v2230_v22  ;;  %5815 = vmatprep.subr.bf16.mxu0 %v5814_v9 }
 0x524   :  { %v2240_v54 = vpop.permute.xlu1 %2239 }
 0x525   :  { %v2242_v46 = vadd.f32 %v2240_v54, %v2234_v23  ;;  %v2406_v54 = vld [vmem:[%s7611_s9 + $0x30] sm:$0xff]  ;;  %5838 = vmatpush3.bf16.msra.mxu1 %v5814_v9  ;;  %v2137_v23 = vld [vmem:[%s7613_s8] sm:$0x1] }
 0x526   :  { %v2244_v10 = vpop.permute.xlu0 %2243  ;;  %v5818_v35 = vpack.c.bf16 %v2407_v5, %v2406_v54  ;;  %5817 = vmatpush3.bf16.msra.mxu0 %v5814_v9  ;;  %5839 = vmatprep.subr.bf16.mxu1 %v6149_v1 }
 0x527   :  { %v2246_v7 = vadd.f32 %v2244_v10, %v2238_v28  ;;  %v2408_v10 = vld [vmem:[%s7611_s9 + $0x40] sm:$0xff] }
 0x528   :  { %v2248_v58 = vpop.permute.xlu1 %2247  ;;  %5819 = vmatprep.subr.bf16.mxu0 %v5818_v35  ;;  %v5822_v17 = vpack.c.bf16 %v2409_v11, %v2408_v10  ;;  %v3942_v28 = vld [vmem:[%s7611_s9 + $0x60] sm:$0xff]  ;;  %v7169_v10 = vpack.c.bf16 %v3945_v61, %v3944_v51  ;;  %v3973_v61 = vld [vmem:[%s7611_s9 + $0xf0] sm:$0xff] }
 0x529   :  { %v2250_v29 = vadd.f32 %v2248_v58, %v2242_v46  ;;  %5841 = vmatpush3.bf16.msra.mxu1 %v5818_v35  ;;  %v2410_v58 = vld [vmem:[%s7611_s9 + $0x50] sm:$0xff] }
 0x52a   :  { %v2252_v3 = vpop.permute.xlu0 %2251  ;;  %5821 = vmatpush3.bf16.msra.mxu0 %v5818_v35  ;;  %5842 = vmatprep.subr.bf16.mxu1 %v6149_v1  ;;  %v5826_v22 = vpack.c.bf16 %v2411_v18, %v2410_v58 }
 0x52b   :  { %v2254_v57 = vadd.f32 %v2252_v3, %v2246_v7  ;;  %5823 = vmatprep.subr.bf16.mxu0 %v5822_v17 }
 0x52c   :  { %v2256_v8 = vpop.permute.xlu1 %2255 }
 0x52d   :  { %v2258_v59 = vadd.f32 %v2256_v8, %v2250_v29  ;;  %5844 = vmatpush3.bf16.msra.mxu1 %v5822_v17  ;;  %v3943_v8 = vld [vmem:[%s7611_s9 + $0x68] sm:$0xff] }
 0x52e   :  { %v2260_v16 = vpop.permute.xlu0 %2259  ;;  %5825 = vmatpush3.bf16.msra.mxu0 %v5822_v17  ;;  %5845 = vmatprep.subr.bf16.mxu1 %v6149_v1  ;;  %v7116_v46 = vpack.c.bf16 %v3943_v8, %v3942_v28  ;;  %v3946_v17 = vld [vmem:[%s7611_s9 + $0x80] sm:$0xff]  ;;  %v3948_v28 = vld [vmem:[%s7611_s9 + $0x90] sm:$0xff]  ;;  %v3949_v8 = vld [vmem:[%s7611_s9 + $0x98] sm:$0xff] }
 0x52f   :  { %v2262_v60 = vadd.f32 %v2260_v16, %v2254_v57  ;;  %5827 = vmatprep.subr.bf16.mxu0 %v5826_v22 }
 0x530   :  { %v2264_v31 = vpop.permute.xlu1 %2263 }
 0x531   :  { %v2266_v56 = vadd.f32 %v2264_v31, %v2258_v59  ;;  %5847 = vmatpush3.bf16.msra.mxu1 %v5826_v22 }
 0x532   :  { %v2268_v55 = vpop.permute.xlu0 %2267  ;;  %5829 = vmatpush3.bf16.msra.mxu0 %v5826_v22  ;;  %5872 = vmatprep.subr.bf16.mxu1 %v6149_v1 }
 0x533   :  { %v2270_v20 = vadd.f32 %v2268_v55, %v2262_v60  ;;  %5849 = vmatprep.subr.bf16.mxu0 %v7116_v46 }
 0x534   :  { %v2272_v27 = vpop.permute.xlu1 %2271 }
 0x535   :  { %v2276_v34 = vmul.f32 0.0034722222, %v2270_v20  ;;  %v2274_v6 = vadd.f32 %v2272_v27, %v2266_v56 }
 0x537   :  { %v2278_v19 = vmul.f32 %v2276_v34, %v2276_v34  ;;  %v2277_v44 = vmul.f32 0.0034722222, %v2274_v6 }
 0x539   :  { %v2279_v38 = vsub.f32 %v2277_v44, %v2278_v19 }
 0x53b   :  { %v2280_v50 = vadd.f32 1e-05, %v2279_v38 }
 0x53d   :  { %6130 = vrsqrt.f32 %v2280_v50 }
 0x547   :  { %v6131_v45 = vpop.eup %6130 }
 0x548   :  { %v7072_v62 = vmul.f32 %v6131_v45, %v2136_v32 }
 0x54a   :  { %v2290_v4 = vrot.slane %v7072_v62, %v6428_v47  ;;  %v2283_v3 = vmul.f32 %v7072_v62, %v2276_v34 }
 0x54c   :  { %2294 = vrot.lane.b32.xlu1 %v2290_v4, %s6147_s24  ;;  %2291 = vrot.lane.b32.xlu0 %v2290_v4, %s6148_s25  ;;  %v2284_v7 = vsub.f32 %v2137_v23, %v2283_v3  ;;  %v7193_v3 = vpack.c.bf16 %v3947_v42, %v3946_v17  ;;  %v3978_v17 = vld [vmem:[%s7611_s9 + $0x118] sm:$0xff] }
 0x54e   :  { %v2339_v16 = vrot.slane %v2284_v7, %v6428_v47 }
 0x550   :  { %2300 = vrot.lane.b32.xlu1 %v2290_v4, %s6145_s21  ;;  %2297 = vrot.lane.b32.xlu0 %v2290_v4, %s6146_s22 }
 0x554   :  { %2306 = vrot.lane.b32.xlu1 %v2290_v4, %s6143_s19  ;;  %2303 = vrot.lane.b32.xlu0 %v2290_v4, %s6144_s20 }
 0x558   :  { %2312 = vrot.lane.b32.xlu1 %v2290_v4, %s6141_s17  ;;  %2309 = vrot.lane.b32.xlu0 %v2290_v4, %s6142_s18 }
 0x55c   :  { %2318 = vrot.lane.b32.xlu1 %v2290_v4, %s6139_s15  ;;  %2315 = vrot.lane.b32.xlu0 %v2290_v4, %s6140_s16 }
 0x560   :  { %2321 = vrot.lane.b32.xlu0 %v2290_v4, %s6138_s0  ;;  %2340 = vrot.lane.b32.xlu1 %v2339_v16, %s6148_s25 }
 0x564   :  { %2343 = vrot.lane.b32.xlu0 %v2339_v16, %s6147_s24  ;;  %2346 = vrot.lane.b32.xlu1 %v2339_v16, %s6146_s22 }
 0x568   :  { %2349 = vrot.lane.b32.xlu0 %v2339_v16, %s6145_s21  ;;  %2352 = vrot.lane.b32.xlu1 %v2339_v16, %s6144_s20 }
 0x56c   :  { %2355 = vrot.lane.b32.xlu0 %v2339_v16, %s6143_s19  ;;  %2358 = vrot.lane.b32.xlu1 %v2339_v16, %s6142_s18 }
 0x570   :  { %2361 = vrot.lane.b32.xlu0 %v2339_v16, %s6141_s17  ;;  %2364 = vrot.lane.b32.xlu1 %v2339_v16, %s6140_s16 }
 0x574   :  { %2367 = vrot.lane.b32.xlu0 %v2339_v16, %s6139_s15  ;;  %2370 = vrot.lane.b32.xlu1 %v2339_v16, %s6138_s0 }
 0x5be   :  { %v2295_v29 = vpop.permute.xlu1 %2294  ;;  %v2292_v57 = vpop.permute.xlu0 %2291 }
 0x5bf   :  { %v2324_v31 = vsel %vm794_vm6, %v7072_v62, %v2292_v57  ;;  %v7221_v57 = vpack.c.bf16 %v3949_v8, %v3948_v28 }
 0x5c0   :  { %v2325_v60 = vsel %vm796_vm7, %v2324_v31, %v2295_v29 }
 0x5c2   :  { %v2301_v59 = vpop.permute.xlu1 %2300  ;;  %v2298_v55 = vpop.permute.xlu0 %2297 }
 0x5c3   :  { %v2326_v56 = vsel %vm798_vm8, %v2325_v60, %v2298_v55  ;;  %v3951_v60 = vld [vmem:[%s7611_s9 + $0xa8] sm:$0xff] }
 0x5c4   :  { %v2327_v27 = vsel %vm800_vm9, %v2326_v56, %v2301_v59  ;;  %v3950_v59 = vld [vmem:[%s7611_s9 + $0xa0] sm:$0xff] }
 0x5c6   :  { %v2307_v20 = vpop.permute.xlu1 %2306  ;;  %v2304_v34 = vpop.permute.xlu0 %2303 }
 0x5c7   :  { %v2328_v6 = vsel %vm802_vm10, %v2327_v27, %v2304_v34  ;;  %v7249_v27 = vpack.c.bf16 %v3951_v60, %v3950_v59 }
 0x5c8   :  { %v2329_v44 = vsel %vm804_vm11, %v2328_v6, %v2307_v20  ;;  %v3952_v6 = vld [vmem:[%s7611_s9 + $0xb0] sm:$0xff] }
 0x5ca   :  { %v2313_v19 = vpop.permute.xlu1 %2312  ;;  %v2310_v38 = vpop.permute.xlu0 %2309 }
 0x5cb   :  { %v2330_v50 = vsel %vm806_vm12, %v2329_v44, %v2310_v38 }
 0x5cc   :  { %v2331_v53 = vsel %vm79_vm1, %v2330_v50, %v2313_v19  ;;  %v3953_v19 = vld [vmem:[%s7611_s9 + $0xb8] sm:$0xff] }
 0x5ce   :  { %v2319_v52 = vpop.permute.xlu1 %2318  ;;  %v2316_v63 = vpop.permute.xlu0 %2315 }
 0x5cf   :  { %v2332_v13 = vsel %vm809_vm13, %v2331_v53, %v2316_v63  ;;  %v3967_v63 = vld [vmem:[%s7611_s9 + $0xc0] sm:$0xff] }
 0x5d0   :  { %v2333_v21 = vsel %vm811_vm14, %v2332_v13, %v2319_v52  ;;  %v5868_v52 = vpack.c.bf16 %v3953_v19, %v3952_v6  ;;  %v3968_v13 = vld [vmem:[%s7611_s9 + $0xc8] sm:$0xff] }
 0x5d2   :  { %v2322_v24 = vpop.permute.xlu0 %2321  ;;  %v2341_v32 = vpop.permute.xlu1 %2340 }
 0x5d3   :  { %v2334_v45 = vsel %vm813_vm15, %v2333_v21, %v2322_v24  ;;  %v2373_v9 = vsel %vm794_vm6, %v2284_v7, %v2341_v32  ;;  %v5890_v24 = vpack.c.bf16 %v3968_v13, %v3967_v63 }
 0x5d4   :  { %v7154_v62 = vrot.slane %v2334_v45, %v6428_v47  ;;  %v3970_v45 = vld [vmem:[%s7611_s9 + $0xd8] sm:$0xff] }
 0x5d6   :  { %v2344_v4 = vpop.permute.xlu0 %2343  ;;  %v2347_v54 = vpop.permute.xlu1 %2346  ;;  %v7161_v5 = vsel %vm7647_vm4, %v7154_v62, 0.0  ;;  %v7167_v35 = vsel %vm7648_vm5, %v7154_v62, 0.0  ;;  %v7186_v37 = vsel %vm7649_vm2, %v7154_v62, 0.0  ;;  %vm7650_vm4 = vcmp.eq.s32.totalorder %v6549_v48, %v6525_v36 }
 0x5d7   :  { %v2374_v11 = vsel %vm796_vm7, %v2373_v9, %v2344_v4  ;;  %5050 = vmatprep.mubr.msk.f32.mxu0 %vm815_vm3, %v7161_v5  ;;  %v7200_v39 = vsel %vm7650_vm4, %v7154_v62, 0.0  ;;  %vm7651_vm5 = vcmp.eq.s32.totalorder %v6554_v49, %v6525_v36  ;;  %vm7652_vm2 = vcmp.eq.s32.totalorder %v6592_v0, %v6525_v36  ;;  %v3975_v4 = vld [vmem:[%s7611_s9 + $0x100] sm:$0xff] }
 0x5d8   :  { %5051 = vmatmul.mubr.msk.f32.vlgmr.msra.gmra.mrb[46].mxu0 %vm815_vm3, %v7167_v35  ;;  %v2375_v58 = vsel %vm798_vm8, %v2374_v11, %v2347_v54  ;;  %v7214_v7 = vsel %vm7651_vm5, %v7154_v62, 0.0  ;;  %v7228_v49 = vsel %vm7652_vm2, %v7154_v62, 0.0  ;;  %vm7653_vm4 = vcmp.eq.s32.totalorder %v6600_v2, %v6525_v36  ;;  %v3976_v54 = vld [vmem:[%s7611_s9 + $0x108] sm:$0xff]  ;;  %v3977_v11 = vld [vmem:[%s7611_s9 + $0x110] sm:$0xff] }
 0x5d9   :  { %5851 = vmatpush3.bf16.msra.mxu0 %v7116_v46  ;;  %5053 = vmatprep.mubr.msk.f32.mxu0 %vm815_vm3, %v7186_v37  ;;  %v7242_v55 = vsel %vm7653_vm4, %v7154_v62, 0.0  ;;  %vm7654_vm5 = vcmp.eq.s32.totalorder %v6630_v14, %v6525_v36  ;;  %vm7655_vm2 = vcmp.eq.s32.totalorder %v6638_v15, %v6525_v36  ;;  %vm7656_vm4 = vcmp.eq.s32.totalorder %v6668_v25, %v6525_v36 }
 0x5da   :  { %v2350_v18 = vpop.permute.xlu0 %2349  ;;  %v2353_v22 = vpop.permute.xlu1 %2352  ;;  %5853 = vmatprep.subr.bf16.mxu0 %v7169_v10  ;;  %v7256_v2 = vsel %vm7654_vm5, %v7154_v62, 0.0  ;;  %v7270_v44 = vsel %vm7655_vm2, %v7154_v62, 0.0  ;;  %v7282_v15 = vsel %vm7656_vm4, %v7154_v62, 0.0  ;;  %vm7657_vm5 = vcmp.eq.s32.totalorder %v6676_v26, %v6525_v36  ;;  %v3969_v26 = vld [vmem:[%s7611_s9 + $0xd0] sm:$0xff] }
 0x5db   :  { %v2376_v23 = vsel %vm800_vm9, %v2375_v58, %v2350_v18  ;;  %v7299_v25 = vsel %vm7657_vm5, %v7154_v62, 0.0  ;;  %v5910_v42 = vpack.c.bf16 %v3978_v17, %v3977_v11  ;;  %vm7661_vm4 = vcmask 1045504  }
 0x5dc   :  { %5054 = vmatmul.mubr.msk.f32.gmra.mrb[48].mxu0 %vm815_vm3, %v7200_v39  ;;  %v2377_v48 = vsel %vm802_vm10, %v2376_v23, %v2353_v22  ;;  %vm7662_vm5 = vmmov %vm7661_vm4 }
 0x5dd   :  { %5855 = vmatpush3.bf16.msra.mxu0 %v7169_v10  ;;  %5056 = vmatprep.mubr.msk.f32.mxu0 %vm815_vm3, %v7214_v7 }
 0x5de   :  { %v2356_v16 = vpop.permute.xlu0 %2355  ;;  %v2359_v29 = vpop.permute.xlu1 %2358  ;;  %5857 = vmatprep.subr.bf16.mxu0 %v7193_v3 }
 0x5df   :  { %v2378_v31 = vsel %vm804_vm11, %v2377_v48, %v2356_v16 }
 0x5e0   :  { %5057 = vmatmul.mubr.msk.f32.gmra.mrb[50].mxu0 %vm815_vm3, %v7228_v49  ;;  %v2379_v0 = vsel %vm806_vm12, %v2378_v31, %v2359_v29 }
 0x5e1   :  { %5859 = vmatpush3.bf16.msra.mxu0 %v7193_v3  ;;  %5059 = vmatprep.mubr.msk.f32.mxu0 %vm815_vm3, %v7242_v55 }
 0x5e2   :  { %v2362_v56 = vpop.permute.xlu0 %2361  ;;  %v2365_v20 = vpop.permute.xlu1 %2364  ;;  %5861 = vmatprep.subr.bf16.mxu0 %v7221_v57 }
 0x5e3   :  { %v2380_v34 = vsel %vm79_vm1, %v2379_v0, %v2362_v56 }
 0x5e4   :  { %5060 = vmatmul.mubr.msk.f32.gmra.mrb[52].mxu0 %vm815_vm3, %v7256_v2  ;;  %v2381_v14 = vsel %vm809_vm13, %v2380_v34, %v2365_v20 }
 0x5e5   :  { %5863 = vmatpush3.bf16.msra.mxu0 %v7221_v57  ;;  %5062 = vmatprep.mubr.msk.f32.mxu0 %vm815_vm3, %v7270_v44 }
 0x5e6   :  { %v2368_v38 = vpop.permute.xlu0 %2367  ;;  %v2371_v50 = vpop.permute.xlu1 %2370  ;;  %5865 = vmatprep.subr.bf16.mxu0 %v7249_v27 }
 0x5e7   :  { %v2382_v53 = vsel %vm811_vm14, %v2381_v14, %v2368_v38 }
 0x5e8   :  { %v7291_v21 = vsel %vm813_vm15, %v2382_v53, %v2371_v50  ;;  %5063 = vmatmul.mubr.msk.f32.gmra.mrb[54].mxu0 %vm815_vm3, %v7282_v15  ;;  %vm7658_vm15 = vcmp.eq.s32.totalorder %v6706_v40, %v6525_v36  ;;  %v5894_v36 = vpack.c.bf16 %v3970_v45, %v3969_v26  ;;  %v3971_v40 = vld [vmem:[%s7611_s9 + $0xe0] sm:$0xff] }
 0x5e9   :  { %5867 = vmatpush3.bf16.msra.mxu0 %v7249_v27  ;;  %5065 = vmatprep.mubr.msk.f32.mxu0 %vm815_vm3, %v7299_v25  ;;  %v7311_v32 = vsel %vm7658_vm15, %v7154_v62, 0.0  ;;  %v3974_v62 = vld [vmem:[%s7611_s9 + $0xf8] sm:$0xff]  ;;  %vm3572_vm15 = vcmask 648192  }
 0x5ea   :  { %5093 = vmatmul.mubr.msk.f32.vlgmr.msra.gmra.mrb[6].mxu1 %vm815_vm3, %v7291_v21  ;;  %5869 = vmatprep.subr.bf16.mxu0 %v5868_v52  ;;  %v5902_v9 = vpack.c.bf16 %v3974_v62, %v3973_v61 }
 0x5eb   :  { %5874 = vmatpush3.bf16.msra.mxu1 %v7116_v46  ;;  %5161 = vmatprep.mubr.msk.f32.mxu1 %vm7640_vm0, %v6151_v12  ;;  %v3972_v46 = vld [vmem:[%s7611_s9 + $0xe8] sm:$0xff] }
 0x5ec   :  { %5066 = vmatmul.mubr.msk.f32.gmra.mrb[56].mxu0 %vm815_vm3, %v7311_v32  ;;  %5875 = vmatprep.subr.bf16.mxu1 %v6149_v1  ;;  %v5898_v51 = vpack.c.bf16 %v3972_v46, %v3971_v40 }
 0x5ed   :  { %5871 = vmatpush3.bf16.msra.mxu0 %v5868_v52  ;;  %5119 = vmatprep.mubr.msk.f32.mxu0 %vm815_vm3, %v7161_v5 }
 0x5ee   :  { %5891 = vmatprep.subr.bf16.mxu0 %v5890_v24 }
 0x5ef   :  { %5877 = vmatpush3.bf16.msra.mxu1 %v7169_v10  ;;  %v5906_v10 = vpack.c.bf16 %v3976_v54, %v3975_v4 }
 0x5f0   :  { %5120 = vmatmul.mubr.msk.f32.vlgmr.msra.gmra.mrb[58].mxu0 %vm815_vm3, %v7167_v35  ;;  %5878 = vmatprep.subr.bf16.mxu1 %v6149_v1 }
 0x5f1   :  { %5122 = vmatprep.mubr.msk.f32.mxu0 %vm815_vm3, %v7186_v37  ;;  %5893 = vmatpush3.bf16.msra.mxu0 %v5890_v24 }
 0x5f2   :  { %5895 = vmatprep.subr.bf16.mxu0 %v5894_v36 }
 0x5f3   :  { %5880 = vmatpush3.bf16.msra.mxu1 %v7193_v3 }
 0x5f4   :  { %5123 = vmatmul.mubr.msk.f32.gmra.mrb[60].mxu0 %vm815_vm3, %v7200_v39  ;;  %5881 = vmatprep.subr.bf16.mxu1 %v6149_v1 }
 0x5f5   :  { %5125 = vmatprep.mubr.msk.f32.mxu0 %vm815_vm3, %v7214_v7  ;;  %5897 = vmatpush3.bf16.msra.mxu0 %v5894_v36 }
 0x5f6   :  { %5899 = vmatprep.subr.bf16.mxu0 %v5898_v51 }
 0x5f7   :  { %5883 = vmatpush3.bf16.msra.mxu1 %v7221_v57 }
 0x5f8   :  { %5126 = vmatmul.mubr.msk.f32.gmra.mrb[62].mxu0 %vm815_vm3, %v7228_v49  ;;  %5884 = vmatprep.subr.bf16.mxu1 %v6149_v1 }
 0x5f9   :  { %5128 = vmatprep.mubr.msk.f32.mxu0 %vm815_vm3, %v7242_v55  ;;  %5901 = vmatpush3.bf16.msra.mxu0 %v5898_v51 }
 0x5fa   :  { %5903 = vmatprep.subr.bf16.mxu0 %v5902_v9 }
 0x5fb   :  { %5886 = vmatpush3.bf16.msra.mxu1 %v7249_v27 }
 0x5fc   :  { %5129 = vmatmul.mubr.msk.f32.gmra.mrb[64].mxu0 %vm815_vm3, %v7256_v2  ;;  %5887 = vmatprep.subr.bf16.mxu1 %v6149_v1 }
 0x5fd   :  { %5131 = vmatprep.mubr.msk.f32.mxu0 %vm815_vm3, %v7270_v44  ;;  %5905 = vmatpush3.bf16.msra.mxu0 %v5902_v9 }
 0x5fe   :  { %5907 = vmatprep.subr.bf16.mxu0 %v5906_v10 }
 0x5ff   :  { %5889 = vmatpush3.bf16.msra.mxu1 %v5868_v52 }
 0x600   :  { %5132 = vmatmul.mubr.msk.f32.gmra.mrb[66].mxu0 %vm815_vm3, %v7282_v15  ;;  %5914 = vmatprep.subr.bf16.mxu1 %v6149_v1 }
 0x601   :  { %5134 = vmatprep.mubr.msk.f32.mxu0 %vm815_vm3, %v7299_v25  ;;  %5909 = vmatpush3.bf16.msra.mxu0 %v5906_v10 }
 0x602   :  { %5162 = vmatmul.mubr.msk.f32.vlgmr.msra.gmra.mrb[6].mxu1 %vm815_vm3, %v7291_v21  ;;  %5911 = vmatprep.subr.bf16.mxu0 %v5910_v42 }
 0x603   :  { %5916 = vmatpush3.bf16.msra.mxu1 %v5890_v24  ;;  %5230 = vmatprep.mubr.msk.f32.mxu1 %vm7640_vm0, %v6151_v12  ;;  %v3322_v12 = vrot.slane %v7010_v30, 1  ;;  %vm7659_vm0 = vcmask 1046528  }
 0x604   :  { %5135 = vmatmul.mubr.msk.f32.gmra.mrb[68].mxu0 %vm815_vm3, %v7311_v32  ;;  %5917 = vmatprep.subr.bf16.mxu1 %v6149_v1  ;;  %vm7660_vm2 = vmmov %vm7659_vm0 }
 0x605   :  { %5913 = vmatpush3.bf16.msra.mxu0 %v5910_v42  ;;  %5188 = vmatprep.mubr.msk.f32.mxu0 %vm815_vm3, %v7161_v5  ;;  %v3323_v5 = vrot.slane %v7002_v41, 1 }
 0x607   :  { %5919 = vmatpush3.bf16.msra.mxu1 %v5894_v36 }
 0x608   :  { %5189 = vmatmul.mubr.msk.f32.vlgmr.msra.gmra.mrb[70].mxu0 %vm815_vm3, %v7167_v35  ;;  %5920 = vmatprep.subr.bf16.mxu1 %v6149_v1  ;;  %v3067_v35 = vrot.slane %v7004_v43, 1 }
 0x609   :  { %5191 = vmatprep.mubr.msk.f32.mxu0 %vm815_vm3, %v7186_v37  ;;  %v3068_v37 = vrot.slane %v7000_v33, 1 }
 0x60b   :  { %5922 = vmatpush3.bf16.msra.mxu1 %v5898_v51  ;;  %v3069_v58 = vsel %vm7660_vm2, %v3067_v35, %v3068_v37 }
 0x60c   :  { %5192 = vmatmul.mubr.msk.f32.gmra.mrb[72].mxu0 %vm815_vm3, %v7200_v39  ;;  %5923 = vmatprep.subr.bf16.mxu1 %v6149_v1 }
 0x60d   :  { %5194 = vmatprep.mubr.msk.f32.mxu0 %vm815_vm3, %v7214_v7 }
 0x60f   :  { %5925 = vmatpush3.bf16.msra.mxu1 %v5902_v9 }
 0x610   :  { %5195 = vmatmul.mubr.msk.f32.gmra.mrb[74].mxu0 %vm815_vm3, %v7228_v49  ;;  %5926 = vmatprep.subr.bf16.mxu1 %v6149_v1 }
 0x611   :  { %5197 = vmatprep.mubr.msk.f32.mxu0 %vm815_vm3, %v7242_v55 }
 0x613   :  { %5928 = vmatpush3.bf16.msra.mxu1 %v5906_v10 }
 0x614   :  { %5198 = vmatmul.mubr.msk.f32.gmra.mrb[76].mxu0 %vm815_vm3, %v7256_v2  ;;  %5929 = vmatprep.subr.bf16.mxu1 %v6149_v1  ;;  %v3324_v1 = vsel %vm7659_vm0, %v3322_v12, %v3323_v5 }
 0x615   :  { %5200 = vmatprep.mubr.msk.f32.mxu0 %vm815_vm3, %v7270_v44 }
 0x617   :  { %5931 = vmatpush3.bf16.msra.mxu1 %v5910_v42 }
 0x618   :  { %5201 = vmatmul.mubr.msk.f32.gmra.mrb[78].mxu0 %vm815_vm3, %v7282_v15 }
 0x619   :  { %5203 = vmatprep.mubr.msk.f32.mxu0 %vm815_vm3, %v7299_v25 }
 0x61a   :  { %5231 = vmatmul.mubr.msk.f32.vlgmr.msra.gmra.mrb[6].mxu1 %vm815_vm3, %v7291_v21 }
 0x61b   :  { %5338 = vmatprep.mubr.msk.f32.mxu1 %vm815_vm3, %v3324_v1  ;;  %v3229_v1 = vrot.slane %v7000_v33, 2 }
 0x61c   :  { %5204 = vmatmul.mubr.msk.f32.gmra.mrb[80].mxu0 %vm815_vm3, %v7311_v32 }
 0x61d   :  { %5257 = vmatprep.mubr.msk.f32.mxu0 %vm815_vm3, %v3069_v58  ;;  %v3483_v58 = vrot.slane %v7010_v30, 2 }
 0x6ab   :  { %v5052_v18 = vpop.f32.mrb[46].mxu0 }
 0x6ac   :  { %v2514_v22 = vpop.f32.mrb[47].mxu0 }
 0x6ad   :  { %v7428_v3 = vpack.c.bf16 %v5052_v18, %v2514_v22  ;;  %v3484_v18 = vrot.slane %v7002_v41, 2 }
 0x6af   :  { %v5055_v23 = vpop.f32.mrb[48].mxu0 }
 0x6b0   :  { %v2524_v39 = vpop.f32.mrb[49].mxu0 }
 0x6b1   :  { %v7430_v28 = vpack.c.bf16 %v5055_v23, %v2524_v39 }
 0x6b3   :  { %v5058_v8 = vpop.f32.mrb[50].mxu0 }
 0x6b4   :  { %v2534_v7 = vpop.f32.mrb[51].mxu0 }
 0x6b5   :  { %v7432_v48 = vpack.c.bf16 %v5058_v8, %v2534_v7 }
 0x6b7   :  { %v5061_v16 = vpop.f32.mrb[52].mxu0 }
 0x6b8   :  { %v2544_v29 = vpop.f32.mrb[53].mxu0 }
 0x6b9   :  { %v7434_v57 = vpack.c.bf16 %v5061_v16, %v2544_v29 }
 0x6bb   :  { %v5064_v31 = vpop.f32.mrb[54].mxu0 }
 0x6bc   :  { %v2554_v49 = vpop.f32.mrb[55].mxu0 }
 0x6bd   :  { %v7436_v59 = vpack.c.bf16 %v5064_v31, %v2554_v49 }
 0x6bf   :  { %v5067_v60 = vpop.f32.mrb[56].mxu0 }
 0x6c0   :  { %v2564_v55 = vpop.f32.mrb[57].mxu0 }
 0x6c1   :  { %v7438_v0 = vpack.c.bf16 %v5067_v60, %v2564_v55 }
 0x6c3   :  { %v5121_v56 = vpop.f32.mrb[58].mxu0 }
 0x6c4   :  { %v2726_v20 = vpop.f32.mrb[59].mxu0 }
 0x6c5   :  { %v5932_v27 = vpack.c.bf16 %v5121_v56, %v2726_v20 }
 0x6c7   :  { %v5124_v34 = vpop.f32.mrb[60].mxu0  ;;  %5933 = vmatprep.subr.bf16.mxu0 %v5932_v27  ;;  %6005 = vmatprep.subr.bf16.mxu1 %v5932_v27 }
 0x6c8   :  { %v2736_v2 = vpop.f32.mrb[61].mxu0  ;;  %5935 = vmatpush3.bf16.msra.mxu0 %v5932_v27  ;;  %6007 = vmatpush3.bf16.msra.mxu1 %v5932_v27 }
 0x6c9   :  { %v5936_v6 = vpack.c.bf16 %v5124_v34, %v2736_v2 }
 0x6cb   :  { %v5127_v19 = vpop.f32.mrb[62].mxu0  ;;  %5937 = vmatprep.subr.bf16.mxu0 %v5936_v6  ;;  %6009 = vmatprep.subr.bf16.mxu1 %v5936_v6 }
 0x6cc   :  { %v2746_v44 = vpop.f32.mrb[63].mxu0  ;;  %5939 = vmatpush3.bf16.msra.mxu0 %v5936_v6  ;;  %6011 = vmatpush3.bf16.msra.mxu1 %v5936_v6 }
 0x6cd   :  { %v5940_v14 = vpack.c.bf16 %v5127_v19, %v2746_v44 }
 0x6cf   :  { %v5130_v38 = vpop.f32.mrb[64].mxu0  ;;  %5941 = vmatprep.subr.bf16.mxu0 %v5940_v14  ;;  %6013 = vmatprep.subr.bf16.mxu1 %v5940_v14 }
 0x6d0   :  { %v2756_v50 = vpop.f32.mrb[65].mxu0  ;;  %5943 = vmatpush3.bf16.msra.mxu0 %v5940_v14  ;;  %6015 = vmatpush3.bf16.msra.mxu1 %v5940_v14 }
 0x6d1   :  { %v5944_v52 = vpack.c.bf16 %v5130_v38, %v2756_v50 }
 0x6d3   :  { %v5133_v53 = vpop.f32.mrb[66].mxu0  ;;  %5945 = vmatprep.subr.bf16.mxu0 %v5944_v52  ;;  %6017 = vmatprep.subr.bf16.mxu1 %v5944_v52 }
 0x6d4   :  { %v2766_v15 = vpop.f32.mrb[67].mxu0  ;;  %5947 = vmatpush3.bf16.msra.mxu0 %v5944_v52  ;;  %6019 = vmatpush3.bf16.msra.mxu1 %v5944_v52 }
 0x6d5   :  { %v5948_v63 = vpack.c.bf16 %v5133_v53, %v2766_v15 }
 0x6d7   :  { %v5136_v13 = vpop.f32.mrb[68].mxu0  ;;  %5949 = vmatprep.subr.bf16.mxu0 %v5948_v63  ;;  %6021 = vmatprep.subr.bf16.mxu1 %v5948_v63 }
 0x6d8   :  { %v2776_v21 = vpop.f32.mrb[69].mxu0  ;;  %5951 = vmatpush3.bf16.msra.mxu0 %v5948_v63  ;;  %6023 = vmatpush3.bf16.msra.mxu1 %v5948_v63 }
 0x6d9   :  { %v5952_v25 = vpack.c.bf16 %v5136_v13, %v2776_v21 }
 0x6db   :  { %v5190_v24 = vpop.f32.mrb[70].mxu0  ;;  %5953 = vmatprep.subr.bf16.mxu0 %v5952_v25  ;;  %6025 = vmatprep.subr.bf16.mxu1 %v5952_v25 }
 0x6dc   :  { %v2935_v32 = vpop.f32.mrb[71].mxu0  ;;  %5955 = vmatpush3.bf16.msra.mxu0 %v5952_v25  ;;  %6027 = vmatpush3.bf16.msra.mxu1 %v5952_v25 }
 0x6dd   :  { %v5980_v26 = vpack.c.bf16 %v5190_v24, %v2935_v32  ;;  %5957 = vmatprep.subr.bf16.mxu0 %v7428_v3  ;;  %6029 = vmatprep.subr.bf16.mxu1 %v7428_v3 }
 0x6df   :  { %v5193_v45 = vpop.f32.mrb[72].mxu0  ;;  %5258 = vmatmul.mubr.msk.f32.vlgmr.msra.gmra.mrb[82].mxu0 %vm815_vm3, %v3068_v37  ;;  %5339 = vmatmul.mubr.msk.f32.vlgmr.msra.gmra.mrb[8].mxu1 %vm815_vm3, %v3323_v5  ;;  %v3228_v37 = vrot.slane %v7004_v43, 2 }
 0x6e0   :  { %v2945_v36 = vpop.f32.mrb[73].mxu0  ;;  %5959 = vmatpush3.bf16.msra.mxu0 %v7428_v3  ;;  %5284 = vmatprep.mubr.msk.f32.mxu0 %vm815_vm3, %v7004_v43  ;;  %v3485_v43 = vsel %vm7662_vm5, %v3483_v58, %v3484_v18 }
 0x6e1   :  { %v5984_v40 = vpack.c.bf16 %v5193_v45, %v2945_v36  ;;  %6031 = vmatpush3.bf16.msra.mxu1 %v7428_v3  ;;  %5365 = vmatprep.mubr.msk.f32.mxu1 %vm815_vm3, %v7010_v30  ;;  %v3230_v22 = vsel %vm7661_vm4, %v3228_v37, %v3229_v1 }
 0x6e2   :  { %5961 = vmatprep.subr.bf16.mxu0 %v7430_v28  ;;  %6033 = vmatprep.subr.bf16.mxu1 %v7430_v28 }
 0x6e3   :  { %v5196_v46 = vpop.f32.mrb[74].mxu0 }
 0x6e4   :  { %v2955_v51 = vpop.f32.mrb[75].mxu0  ;;  %5963 = vmatpush3.bf16.msra.mxu0 %v7430_v28 }
 0x6e5   :  { %v5988_v61 = vpack.c.bf16 %v5196_v46, %v2955_v51  ;;  %6035 = vmatpush3.bf16.msra.mxu1 %v7430_v28  ;;  %5965 = vmatprep.subr.bf16.mxu0 %v7432_v48 }
 0x6e6   :  { %6037 = vmatprep.subr.bf16.mxu1 %v7432_v48 }
 0x6e7   :  { %v5199_v62 = vpop.f32.mrb[76].mxu0 }
 0x6e8   :  { %v2965_v9 = vpop.f32.mrb[77].mxu0  ;;  %5967 = vmatpush3.bf16.msra.mxu0 %v7432_v48 }
 0x6e9   :  { %v5992_v4 = vpack.c.bf16 %v5199_v62, %v2965_v9  ;;  %6039 = vmatpush3.bf16.msra.mxu1 %v7432_v48  ;;  %5969 = vmatprep.subr.bf16.mxu0 %v7434_v57 }
 0x6ea   :  { %6041 = vmatprep.subr.bf16.mxu1 %v7434_v57 }
 0x6eb   :  { %v5202_v54 = vpop.f32.mrb[78].mxu0 }
 0x6ec   :  { %v2975_v10 = vpop.f32.mrb[79].mxu0  ;;  %5971 = vmatpush3.bf16.msra.mxu0 %v7434_v57 }
 0x6ed   :  { %v3060_v11 = vpop.f32.mrb[6].mxu1  ;;  %v5996_v17 = vpack.c.bf16 %v5202_v54, %v2975_v10  ;;  %6043 = vmatpush3.bf16.msra.mxu1 %v7434_v57  ;;  %5973 = vmatprep.subr.bf16.mxu0 %v7436_v59 }
 0x6ee   :  { %v5232_v42 = vpop.f32.mrb[7].mxu1  ;;  %6045 = vmatprep.subr.bf16.mxu1 %v7436_v59 }
 0x6ef   :  { %v5205_v12 = vpop.f32.mrb[80].mxu0 }
 0x6f0   :  { %v2985_v5 = vpop.f32.mrb[81].mxu0  ;;  %5975 = vmatpush3.bf16.msra.mxu0 %v7436_v59 }
 0x6f1   :  { %v6000_v35 = vpack.c.bf16 %v5205_v12, %v2985_v5  ;;  %6047 = vmatpush3.bf16.msra.mxu1 %v7436_v59  ;;  %5977 = vmatprep.subr.bf16.mxu0 %v7438_v0 }
 0x6f2   :  { %6049 = vmatprep.subr.bf16.mxu1 %v7438_v0 }
 0x6f4   :  { %5979 = vmatpush3.bf16.msra.mxu0 %v7438_v0 }
 0x6f5   :  { %6051 = vmatpush3.bf16.msra.mxu1 %v7438_v0  ;;  %5981 = vmatprep.subr.bf16.mxu0 %v5980_v26 }
 0x6f6   :  { %6053 = vmatprep.subr.bf16.mxu1 %v5980_v26 }
 0x6f7   :  { %5285 = vmatmul.mubr.msk.f32.vlgmr.msra.gmra.mrb[82].mxu0 %vm815_vm3, %v7000_v33  ;;  %v2285_v33 = vld [vmem:[%s7614_s10] sm:$0x1] }
 0x6f8   :  { %5366 = vmatmul.mubr.msk.f32.vlgmr.msra.gmra.mrb[8].mxu1 %vm815_vm3, %v7002_v41  ;;  %5983 = vmatpush3.bf16.msra.mxu0 %v5980_v26  ;;  %v6077_v41 = vadd.f32 %v3060_v11, %v2285_v33 }
 0x6f9   :  { %5311 = vmatprep.mubr.msk.f32.mxu0 %vm815_vm3, %v3230_v22  ;;  %6055 = vmatpush3.bf16.msra.mxu1 %v5980_v26 }
 0x6fa   :  { %5392 = vmatprep.mubr.msk.f32.mxu1 %vm815_vm3, %v3485_v43  ;;  %5985 = vmatprep.subr.bf16.mxu0 %v5984_v40  ;;  %v3316_v30 = vrot.slane %v6077_v41, %v6428_v47 }
 0x6fb   :  { %6057 = vmatprep.subr.bf16.mxu1 %v5984_v40 }
 0x6fc   :  { %5987 = vmatpush3.bf16.msra.mxu0 %v5984_v40 }
 0x6fd   :  { %6059 = vmatpush3.bf16.msra.mxu1 %v5984_v40  ;;  %5989 = vmatprep.subr.bf16.mxu0 %v5988_v61 }
 0x6fe   :  { %6061 = vmatprep.subr.bf16.mxu1 %v5988_v61 }
 0x700   :  { %5991 = vmatpush3.bf16.msra.mxu0 %v5988_v61 }
 0x701   :  { %6063 = vmatpush3.bf16.msra.mxu1 %v5988_v61  ;;  %5993 = vmatprep.subr.bf16.mxu0 %v5992_v4 }
 0x702   :  { %6065 = vmatprep.subr.bf16.mxu1 %v5992_v4 }
 0x704   :  { %5995 = vmatpush3.bf16.msra.mxu0 %v5992_v4 }
 0x705   :  { %6067 = vmatpush3.bf16.msra.mxu1 %v5992_v4  ;;  %5997 = vmatprep.subr.bf16.mxu0 %v5996_v17 }
 0x706   :  { %6069 = vmatprep.subr.bf16.mxu1 %v5996_v17 }
 0x708   :  { %5999 = vmatpush3.bf16.msra.mxu0 %v5996_v17 }
 0x709   :  { %6071 = vmatpush3.bf16.msra.mxu1 %v5996_v17  ;;  %6001 = vmatprep.subr.bf16.mxu0 %v6000_v35 }
 0x70a   :  { %6073 = vmatprep.subr.bf16.mxu1 %v6000_v35 }
 0x70c   :  { %6003 = vmatpush3.bf16.msra.mxu0 %v6000_v35 }
 0x70d   :  { %6075 = vmatpush3.bf16.msra.mxu1 %v6000_v35 }
 0x70f   :  { %5312 = vmatmul.mubr.msk.f32.vlgmr.msra.gmra.mrb[82].mxu0 %vm815_vm3, %v3229_v1 }
 0x710   :  { %5393 = vmatmul.mubr.msk.f32.vlgmr.msra.gmra.mrb[8].mxu1 %vm815_vm3, %v3484_v18 }
 0x7e2   :  { %v5313_v3 = vpop.f32.mrb[82].mxu0 }
 0x7e3   :  { %v7492_v23 = vadd.f32 %v5313_v3, %v3316_v30  ;;  %v5394_v39 = vpop.f32.mrb[8].mxu1  ;;  %v3301_v28 = vpop.f32.mrb[83].mxu0 }
 0x7e4   :  { %v7494_v8 = vadd.f32 %v5394_v39, %v3316_v30  ;;  %v7496_v7 = vadd.f32 %v3316_v30, %v3301_v28  ;;  %v3556_v48 = vpop.f32.mrb[9].mxu1 }
 0x7e5   :  { %v3573_v16 = vsel %vm3572_vm15, %v7492_v23, 0.0  ;;  %v3583_v29 = vmul.f32 %v7492_v23, %v7492_v23  ;;  %v7502_v57 = vadd.f32 %v3556_v48, %v3316_v30 }
 0x7e6   :  { %v3595_v31 = vsel %vm3572_vm15, %v7494_v8, 0.0  ;;  %v3605_v49 = vmul.f32 %v7494_v8, %v7494_v8  ;;  %v3571_v59 = vsel %vm811_vm14, %v7496_v7, 0.0  ;;  %v3582_v60 = vmul.f32 %v7496_v7, %v7496_v7 }
 0x7e7   :  { %v3585_v55 = vsel %vm3572_vm15, %v3583_v29, 0.0  ;;  %v3574_v0 = vadd.f32 %v3573_v16, %v3571_v59  ;;  %v3594_v56 = vsel %vm811_vm14, %v7502_v57, 0.0  ;;  %v3604_v20 = vmul.f32 %v7502_v57, %v7502_v57 }
 0x7e8   :  { %v3607_v27 = vsel %vm3572_vm15, %v3605_v49, 0.0  ;;  %v3584_v34 = vsel %vm811_vm14, %v3582_v60, 0.0  ;;  %v3596_v2 = vadd.f32 %v3595_v31, %v3594_v56 }
 0x7e9   :  { %v3575_v6 = vrot.slane %v3574_v0, 4  ;;  %v3586_v19 = vadd.f32 %v3585_v55, %v3584_v34  ;;  %v3606_v44 = vsel %vm811_vm14, %v3604_v20, 0.0 }
 0x7ea   :  { %v3597_v14 = vrot.slane %v3596_v2, 4  ;;  %v3608_v38 = vadd.f32 %v3607_v27, %v3606_v44 }
 0x7eb   :  { %v3576_v50 = vadd.f32 %v3575_v6, %v3574_v0  ;;  %v3587_v52 = vrot.slane %v3586_v19, 4 }
 0x7ec   :  { %v3598_v53 = vadd.f32 %v3597_v14, %v3596_v2  ;;  %v3609_v15 = vrot.slane %v3608_v38, 4 }
 0x7ed   :  { %v3577_v63 = vrot.slane %v3576_v50, 2  ;;  %v3588_v13 = vadd.f32 %v3587_v52, %v3586_v19 }
 0x7ee   :  { %v3599_v21 = vrot.slane %v3598_v53, 2  ;;  %v3610_v25 = vadd.f32 %v3609_v15, %v3608_v38 }
 0x7ef   :  { %v3578_v24 = vadd.f32 %v3577_v63, %v3576_v50  ;;  %v3589_v32 = vrot.slane %v3588_v13, 2 }
 0x7f0   :  { %v3600_v26 = vadd.f32 %v3599_v21, %v3598_v53  ;;  %v3611_v45 = vrot.slane %v3610_v25, 2  ;;  %v3569_v21 = vld [vmem:[%s7615_s11] sm:$0x1] }
 0x7f1   :  { %v3579_v36 = vrot.slane %v3578_v24, 1  ;;  %v3590_v40 = vadd.f32 %v3589_v32, %v3588_v13  ;;  %v3570_v32 = vld [vmem:[%s7616_s12] sm:$0x1] }
 0x7f2   :  { %v3601_v46 = vrot.slane %v3600_v26, 1  ;;  %v3612_v51 = vadd.f32 %v3611_v45, %v3610_v25 }
 0x7f3   :  { %v3580_v61 = vadd.f32 %v3579_v36, %v3578_v24  ;;  %v3591_v62 = vrot.slane %v3590_v40, 1 }
 0x7f4   :  { %v3602_v9 = vadd.f32 %v3601_v46, %v3600_v26  ;;  %v3613_v4 = vrot.slane %v3612_v51, 1 }
 0x7f5   :  { %v3592_v54 = vadd.f32 %v3591_v62, %v3590_v40 }
 0x7f6   :  { %v3603_v10 = vadd.f32 %v3602_v9, %v3580_v61  ;;  %v3614_v11 = vadd.f32 %v3613_v4, %v3612_v51 }
 0x7f8   :  { %v3615_v17 = vadd.f32 %v3614_v11, %v3592_v54  ;;  %3619 = vrot.lane.b32.xlu0 %v3603_v10, %s7645_s6 }
 0x7fa   :  { %3624 = vrot.lane.b32.xlu1 %v3615_v17, %s7645_s6 }
 0x7fc   :  { %3628 = vrot.lane.b32.xlu0 %v3603_v10, %s7646_s27 }
 0x7fe   :  { %3632 = vrot.lane.b32.xlu1 %v3615_v17, %s7646_s27 }
 0x800   :  { %3636 = vrot.lane.b32.xlu0 %v3603_v10, %s6136_s30 }
 0x802   :  { %3640 = vrot.lane.b32.xlu1 %v3615_v17, %s6136_s30 }
 0x804   :  { %3644 = vrot.lane.b32.xlu0 %v3603_v10, %s6137_s14 }
 0x806   :  { %3648 = vrot.lane.b32.xlu1 %v3615_v17, %s6137_s14 }
 0x808   :  { %3652 = vrot.lane.b32.xlu0 %v3603_v10, %s6138_s0 }
 0x80a   :  { %3656 = vrot.lane.b32.xlu1 %v3615_v17, %s6138_s0 }
 0x80c   :  { %3660 = vrot.lane.b32.xlu0 %v3603_v10, %s6139_s15 }
 0x80e   :  { %3664 = vrot.lane.b32.xlu1 %v3615_v17, %s6139_s15 }
 0x810   :  { %3668 = vrot.lane.b32.xlu0 %v3603_v10, %s6140_s16 }
 0x812   :  { %3672 = vrot.lane.b32.xlu1 %v3615_v17, %s6140_s16 }
 0x814   :  { %3676 = vrot.lane.b32.xlu0 %v3603_v10, %s6141_s17 }
 0x816   :  { %3680 = vrot.lane.b32.xlu1 %v3615_v17, %s6141_s17 }
 0x818   :  { %3684 = vrot.lane.b32.xlu0 %v3603_v10, %s6142_s18 }
 0x81a   :  { %3688 = vrot.lane.b32.xlu1 %v3615_v17, %s6142_s18 }
 0x86a   :  { %v3620_v42 = vpop.permute.xlu0 %3619 }
 0x86b   :  { %v3622_v43 = vadd.f32 %v3620_v42, %v3603_v10 }
 0x86c   :  { %v3625_v12 = vpop.permute.xlu1 %3624 }
 0x86d   :  { %v3627_v41 = vadd.f32 %v3625_v12, %v3615_v17 }
 0x86e   :  { %v3629_v5 = vpop.permute.xlu0 %3628 }
 0x86f   :  { %v3631_v30 = vadd.f32 %v3629_v5, %v3622_v43 }
 0x870   :  { %v3633_v35 = vpop.permute.xlu1 %3632 }
 0x871   :  { %v3635_v39 = vadd.f32 %v3633_v35, %v3627_v41 }
 0x872   :  { %v3637_v37 = vpop.permute.xlu0 %3636 }
 0x873   :  { %v3639_v28 = vadd.f32 %v3637_v37, %v3631_v30 }
 0x874   :  { %v3641_v1 = vpop.permute.xlu1 %3640 }
 0x875   :  { %v3643_v16 = vadd.f32 %v3641_v1, %v3635_v39 }
 0x876   :  { %v3645_v58 = vpop.permute.xlu0 %3644 }
 0x877   :  { %v3647_v29 = vadd.f32 %v3645_v58, %v3639_v28 }
 0x878   :  { %v3649_v18 = vpop.permute.xlu1 %3648 }
 0x879   :  { %v3651_v49 = vadd.f32 %v3649_v18, %v3643_v16 }
 0x87a   :  { %v3653_v22 = vpop.permute.xlu0 %3652 }
 0x87b   :  { %v3655_v59 = vadd.f32 %v3653_v22, %v3647_v29 }
 0x87c   :  { %v3657_v33 = vpop.permute.xlu1 %3656 }
 0x87d   :  { %v3659_v55 = vadd.f32 %v3657_v33, %v3651_v49 }
 0x87e   :  { %v3661_v3 = vpop.permute.xlu0 %3660 }
 0x87f   :  { %v3663_v0 = vadd.f32 %v3661_v3, %v3655_v59 }
 0x880   :  { %v3665_v48 = vpop.permute.xlu1 %3664 }
 0x881   :  { %v3667_v20 = vadd.f32 %v3665_v48, %v3659_v55 }
 0x882   :  { %v3669_v31 = vpop.permute.xlu0 %3668 }
 0x883   :  { %v3671_v27 = vadd.f32 %v3669_v31, %v3663_v0 }
 0x884   :  { %v3673_v60 = vpop.permute.xlu1 %3672 }
 0x885   :  { %v3675_v2 = vadd.f32 %v3673_v60, %v3667_v20 }
 0x886   :  { %v3677_v56 = vpop.permute.xlu0 %3676 }
 0x887   :  { %v3679_v6 = vadd.f32 %v3677_v56, %v3671_v27 }
 0x888   :  { %v3681_v34 = vpop.permute.xlu1 %3680 }
 0x889   :  { %v3683_v44 = vadd.f32 %v3681_v34, %v3675_v2 }
 0x88a   :  { %v3685_v19 = vpop.permute.xlu0 %3684 }
 0x88b   :  { %v3687_v14 = vadd.f32 %v3685_v19, %v3679_v6 }
 0x88c   :  { %v3689_v38 = vpop.permute.xlu1 %3688 }
 0x88d   :  { %v3693_v50 = vmul.f32 0.005, %v3687_v14  ;;  %v3691_v52 = vadd.f32 %v3689_v38, %v3683_v44 }
 0x88f   :  { %v3695_v53 = vmul.f32 %v3693_v50, %v3693_v50  ;;  %v3694_v15 = vmul.f32 0.005, %v3691_v52 }
 0x891   :  { %v3696_v63 = vsub.f32 %v3694_v15, %v3695_v53 }
 0x893   :  { %v3697_v13 = vadd.f32 1e-05, %v3696_v63 }
 0x895   :  { %6132 = vrsqrt.f32 %v3697_v13 }
 0x89f   :  { %v6133_v25 = vpop.eup %6132 }
 0x8a0   :  { %v3699_v24 = vmul.f32 %v6133_v25, %v3569_v21 }
 0x8a2   :  { %v3700_v26 = vmul.f32 %v3699_v24, %v3693_v50  ;;  %v3706_v45 = vrot.slane %v3699_v24, %v6428_v47 }
 0x8a4   :  { %v3701_v36 = vsub.f32 %v3570_v32, %v3700_v26  ;;  %3710 = vrot.lane.b32.xlu1 %v3706_v45, %s6147_s24  ;;  %3707 = vrot.lane.b32.xlu0 %v3706_v45, %s6148_s25 }
 0x8a6   :  { %v3747_v40 = vrot.slane %v3701_v36, %v6428_v47 }
 0x8a8   :  { %3713 = vrot.lane.b32.xlu0 %v3706_v45, %s6146_s22  ;;  %3748 = vrot.lane.b32.xlu1 %v3747_v40, %s6148_s25 }
 0x8ac   :  { %3716 = vrot.lane.b32.xlu0 %v3706_v45, %s6145_s21  ;;  %3751 = vrot.lane.b32.xlu1 %v3747_v40, %s6147_s24 }
 0x8b0   :  { %3719 = vrot.lane.b32.xlu0 %v3706_v45, %s6144_s20  ;;  %3754 = vrot.lane.b32.xlu1 %v3747_v40, %s6146_s22 }
 0x8b4   :  { %3722 = vrot.lane.b32.xlu0 %v3706_v45, %s6143_s19  ;;  %3757 = vrot.lane.b32.xlu1 %v3747_v40, %s6145_s21 }
 0x8b8   :  { %3725 = vrot.lane.b32.xlu0 %v3706_v45, %s6142_s18  ;;  %3760 = vrot.lane.b32.xlu1 %v3747_v40, %s6144_s20 }
 0x8bc   :  { %3728 = vrot.lane.b32.xlu0 %v3706_v45, %s6141_s17  ;;  %3763 = vrot.lane.b32.xlu1 %v3747_v40, %s6143_s19 }
 0x8c0   :  { %3731 = vrot.lane.b32.xlu0 %v3706_v45, %s6140_s16  ;;  %3766 = vrot.lane.b32.xlu1 %v3747_v40, %s6142_s18 }
 0x8c4   :  { %3769 = vrot.lane.b32.xlu0 %v3747_v40, %s6141_s17  ;;  %3772 = vrot.lane.b32.xlu1 %v3747_v40, %s6140_s16 }
 0x916   :  { %v3711_v46 = vpop.permute.xlu1 %3710  ;;  %v3708_v51 = vpop.permute.xlu0 %3707 }
 0x917   :  { %v3734_v42 = vsel %vm794_vm6, %v3699_v24, %v3708_v51 }
 0x918   :  { %v3735_v35 = vsel %vm796_vm7, %v3734_v42, %v3711_v46 }
 0x91a   :  { %v3714_v61 = vpop.permute.xlu0 %3713  ;;  %v3749_v62 = vpop.permute.xlu1 %3748 }
 0x91b   :  { %v3736_v37 = vsel %vm798_vm8, %v3735_v35, %v3714_v61  ;;  %v3775_v43 = vsel %vm794_vm6, %v3701_v36, %v3749_v62 }
 0x91e   :  { %v3717_v9 = vpop.permute.xlu0 %3716  ;;  %v3752_v4 = vpop.permute.xlu1 %3751 }
 0x91f   :  { %v3737_v1 = vsel %vm800_vm9, %v3736_v37, %v3717_v9  ;;  %v3776_v41 = vsel %vm796_vm7, %v3775_v43, %v3752_v4 }
 0x922   :  { %v3720_v54 = vpop.permute.xlu0 %3719  ;;  %v3755_v10 = vpop.permute.xlu1 %3754 }
 0x923   :  { %v3738_v22 = vsel %vm802_vm10, %v3737_v1, %v3720_v54  ;;  %v3777_v3 = vsel %vm798_vm8, %v3776_v41, %v3755_v10 }
 0x926   :  { %v3723_v11 = vpop.permute.xlu0 %3722  ;;  %v3758_v17 = vpop.permute.xlu1 %3757 }
 0x927   :  { %v3739_v33 = vsel %vm804_vm11, %v3738_v22, %v3723_v11  ;;  %v3778_v16 = vsel %vm800_vm9, %v3777_v3, %v3758_v17 }
 0x92a   :  { %v3726_v12 = vpop.permute.xlu0 %3725  ;;  %v3761_v5 = vpop.permute.xlu1 %3760 }
 0x92b   :  { %v3740_v30 = vsel %vm806_vm12, %v3739_v33, %v3726_v12  ;;  %v3779_v31 = vsel %vm802_vm10, %v3778_v16, %v3761_v5 }
 0x92e   :  { %v3729_v58 = vpop.permute.xlu0 %3728  ;;  %v3764_v18 = vpop.permute.xlu1 %3763 }
 0x92f   :  { %v3741_v39 = vsel %vm79_vm1, %v3740_v30, %v3729_v58  ;;  %v3780_v59 = vsel %vm804_vm11, %v3779_v31, %v3764_v18 }
 0x932   :  { %v3732_v28 = vpop.permute.xlu0 %3731  ;;  %v3767_v48 = vpop.permute.xlu1 %3766 }
 0x933   :  { %v3742_v29 = vsel %vm809_vm13, %v3741_v39, %v3732_v28  ;;  %v3781_v60 = vsel %vm806_vm12, %v3780_v59, %v3767_v48 }
 0x934   :  { %v3787_v49 = vrot.slane %v3742_v29, %v6428_v47 }
 0x936   :  { %v3770_v55 = vpop.permute.xlu0 %3769  ;;  %v3773_v0 = vpop.permute.xlu1 %3772  ;;  %v3788_v20 = vmul.f32 %v3787_v49, %v7496_v7  ;;  %v3789_v34 = vmul.f32 %v3787_v49, %v7492_v23  ;;  %v3800_v2 = vmul.f32 %v3787_v49, %v7502_v57  ;;  %v3801_v6 = vmul.f32 %v3787_v49, %v7494_v8 }
 0x937   :  { %v3782_v56 = vsel %vm79_vm1, %v3781_v60, %v3770_v55 }
 0x938   :  { %v3783_v27 = vsel %vm809_vm13, %v3782_v56, %v3773_v0 }
 0x939   :  { %v3793_v19 = vrot.slane %v3783_v27, %v6428_v47 }
 0x93b   :  { %v3794_v44 = vadd.f32 %v3793_v19, %v3788_v20  ;;  %v3795_v14 = vadd.f32 %v3793_v19, %v3789_v34  ;;  %v3802_v38 = vadd.f32 %v3800_v2, %v3793_v19  ;;  %v3803_v50 = vadd.f32 %v3801_v6, %v3793_v19 }
 0x93d   :  { %v3796_v52 = vmax.f32 %v3794_v44, 0.0  ;;  %v3797_v53 = vmax.f32 %v3795_v14, 0.0  ;;  %v3804_v15 = vmax.f32 %v3802_v38, 0.0  ;;  %v3805_v63 = vmax.f32 %v3803_v50, 0.0 }
 0x93f   :  { %3798 = vst.msk [vmem:[%s7617_s13] sm:$0xff] %vm811_vm14, %v3796_v52  ;;  %4004 = vst.msk [vmem:[%s7617_s13 + $0x10] sm:$0xff] %vm811_vm14, %v3804_v15 }
 0x940   :  { %3799 = vst.msk [vmem:[%s7617_s13 + $0x8] sm:$0x3] %vm3572_vm15, %v3797_v53  ;;  %4005 = vst.msk [vmem:[%s7617_s13 + $0x18] sm:$0x3] %vm3572_vm15, %v3805_v63 }

</bundles_post_ra>
